<compile_context>
chip_gen: v5e
topology: v5e:2x2
jax: 0.10.0
libtpu: 0.0.40
codegen_flags: <defaults>
</compile_context>

<pallas_src>
import functools

import jax
import jax.numpy as jnp
from jax import lax
from jax.experimental import pallas as pl
from jax.experimental.pallas import tpu as pltpu

HIDDEN = 768
NUM_LAYERS = 7  # 7 linears, exact GELU after the first 6

_INV_SQRT2 = 0.7071067811865476


def _gelu_exact(x):
    # PyTorch nn.GELU() default: exact erf-based GELU (computed in f32).
    return 0.5 * x * (1.0 + lax.erf(x * _INV_SQRT2))


def _round_up(n, m):
    return ((n + m - 1) // m) * m


def _cdiv(a, b):
    return (a + b - 1) // b


def _choose_tile_b(B):
    """Adaptive batch tile.

    * B <= 512 rows: one tile -- the kernel is weight-DMA / latency bound and
      splitting would re-stream the 1.125 MiB/layer bf16 weights.
    * larger B: tiles of 512..1024 rows (arithmetic intensity ~tb FLOP per
      weight byte, above the v6e/v7x knee) and >= 2 batch blocks so the
      "parallel" batch axis can shard across v7x's two TensorCores.
    """
    Bp16 = _round_up(max(B, 1), 16)  # bf16 sublane granule
    if Bp16 <= 512:
        return Bp16
    tb = _round_up(_cdiv(Bp16, 2), 16)
    return max(512, min(tb, 1024))


def mlp_kernel(x_ref, w_ref, b_ref, o_ref, h_ref):
    # x_ref: [TB, 768]   bf16 input tile (same block for every layer step)
    # w_ref: [768, 768]  bf16 weights for layer l (leading layer dim squeezed)
    # b_ref: [1, 768]    f32 bias for layer l
    # o_ref: [TB, 768]   output tile, written only at the last layer
    # h_ref: [TB, 768]   bf16 VMEM scratch carrying activations across layers
    l = pl.program_id(1)

    @pl.when(l == 0)
    def _():
        h_ref[...] = x_ref[...]

    # bf16 x bf16 -> f32 accumulation on the MXU.
    y = jnp.dot(h_ref[...], w_ref[...], preferred_element_type=jnp.float32)
    y = y + b_ref[...]  # (1, 768) broadcast over (TB, 768)

    @pl.when(l < NUM_LAYERS - 1)
    def _():
        # Exact erf GELU in f32 (PyTorch semantics); single bf16 rounding on
        # store (the next matmul consumes bf16 anyway).
        h_ref[...] = _gelu_exact(y).astype(jnp.bfloat16)

    @pl.when(l == NUM_LAYERS - 1)
    def _():
        o_ref[...] = y.astype(o_ref.dtype)


@functools.partial(jax.jit, static_argnames=("tile_b",))
def mlp_forward(x, weights, biases, *, tile_b=None):
    """x: [B, 768], weights: [7, 768, 768] (in->out layout), biases: [7, 768]."""
    B, D = x.shape
    assert D == HIDDEN

    # bf16 weight / activation stream (MXU-native, halves HBM traffic);
    # bias, matmul accumulation and GELU stay in f32.
    w_bf16 = weights.astype(jnp.bfloat16)
    b3 = biases.astype(jnp.float32).reshape(NUM_LAYERS, 1, HIDDEN)

    if tile_b is None:
        tb = _choose_tile_b(B)
    else:
        tb = _round_up(min(tile_b, _round_up(B, 16)), 16)
    Bp = _round_up(B, tb)

    x_bf16 = x.astype(jnp.bfloat16)
    if Bp != B:
        x_bf16 = jnp.pad(x_bf16, ((0, Bp - B), (0, 0)))

    grid = (Bp // tb, NUM_LAYERS)  # layer axis innermost (sequential carry)

    out = pl.pallas_call(
        mlp_kernel,
        out_shape=jax.ShapeDtypeStruct((Bp, HIDDEN), x.dtype),
        grid_spec=pltpu.PrefetchScalarGridSpec(
            num_scalar_prefetch=0,
            grid=grid,
            in_specs=[
                pl.BlockSpec((tb, HIDDEN), lambda i, l: (i, 0)),
                pl.BlockSpec((pl.Squeezed(), HIDDEN, HIDDEN), lambda i, l: (l, 0, 0)),
                pl.BlockSpec((pl.Squeezed(), 1, HIDDEN), lambda i, l: (l, 0, 0)),
            ],
            out_specs=pl.BlockSpec((tb, HIDDEN), lambda i, l: (i, 0)),
            scratch_shapes=[pltpu.VMEM((tb, HIDDEN), jnp.bfloat16)],
        ),
        compiler_params=pltpu.CompilerParams(
            dimension_semantics=("parallel", "arbitrary"),
            vmem_limit_bytes=48 * 1024 * 1024,  # v7x-safe (64 MiB physical)
        ),
    )(x_bf16, w_bf16, b3)

    return out[:B] if Bp != B else out


def init_params(key):
    """Synthetic init mimicking nn.Linear's U(-1/sqrt(fan_in), 1/sqrt(fan_in)).

    Weights are stored [layer, in_features, out_features] so y = x @ W + b
    (equivalent to PyTorch's y = x @ W.T + b with W stored [out, in])."""
    kw, kb = jax.random.split(key)
    bound = 1.0 / jnp.sqrt(jnp.float32(HIDDEN))
    weights = jax.random.uniform(
        kw, (NUM_LAYERS, HIDDEN, HIDDEN), dtype=jnp.float32, minval=-bound, maxval=bound
    )
    biases = jax.random.uniform(
        kb, (NUM_LAYERS, HIDDEN), dtype=jnp.float32, minval=-bound, maxval=bound
    )
    return weights, biases


def reference_forward(x, weights, biases):
    h = x.astype(jnp.float32)
    for i in range(NUM_LAYERS):
        h = h @ weights[i].astype(jnp.float32) + biases[i].astype(jnp.float32)
        if i < NUM_LAYERS - 1:
            h = _gelu_exact(h)
    return h.astype(x.dtype)


if __name__ == "__main__":
    key = jax.random.PRNGKey(0)
    k_x1, k_x2, k_p = jax.random.split(key, 3)

    weights, biases = init_params(k_p)
    # Reference uses the same bf16-rounded weights (in f32 math); tolerance is
    # loosened because the kernel streams bf16 activations to the MXU.
    w_ref = weights.astype(jnp.bfloat16).astype(jnp.float32)

    # Case 1: small batch, single tile (adaptive tile path).
    B1 = 16
    x1 = jax.random.normal(k_x1, (B1, HIDDEN), dtype=jnp.float32)
    out1 = jax.block_until_ready(mlp_forward(x1, weights, biases))
    assert out1.shape == (B1, HIDDEN)
    ref1 = reference_forward(x1, w_ref, biases)
    assert jnp.allclose(out1, ref1, atol=3e-2, rtol=3e-2), "mismatch (single tile)"

    # Case 2: uneven batch with an explicit small tile -> exercises padding and
    # the multi-block "parallel" batch axis (grid = (3, 7)).
    B2 = 40
    x2 = jax.random.normal(k_x2, (B2, HIDDEN), dtype=jnp.float32)
    out2 = jax.block_until_ready(mlp_forward(x2, weights, biases, tile_b=16))
    assert out2.shape == (B2, HIDDEN)
    ref2 = reference_forward(x2, w_ref, biases)
    assert jnp.allclose(out2, ref2, atol=3e-2, rtol=3e-2), "mismatch (multi tile)"

    print("KERNEL_OK")
</pallas_src>

<mosaic_0001>
module attributes {stable_mosaic.version = 11 : i64} {
  func.func @mlp_kernel(%arg0: i32, %arg1: i32, %arg2: memref<16x768xbf16, #tpu.memory_space<vmem>>, %arg3: memref<1x768x768xbf16, #tpu.memory_space<vmem>>, %arg4: memref<1x1x768xf32, #tpu.memory_space<vmem>>, %arg5: memref<16x768xf32, #tpu.memory_space<vmem>>, %arg6: memref<16x768xbf16, #tpu.memory_space<vmem>>) attributes {dimension_semantics = [#tpu.dimension_semantics<parallel>, #tpu.dimension_semantics<arbitrary>], iteration_bounds = array<i64: 1, 7>, scalar_prefetch = 0 : i64, scratch_operands = 1 : i64, tpu.core_type = #tpu.core_type<tc>, window_params = [{transform_indices = @transform_0, window_bounds = array<i64: 16, 768>}, {transform_indices = @transform_1, window_bounds = array<i64: 1, 768, 768>}, {transform_indices = @transform_2, window_bounds = array<i64: 1, 1, 768>}, {transform_indices = @transform_3, window_bounds = array<i64: 16, 768>}]} {
    %c0_i32 = arith.constant 0 : i32
    %0 = arith.cmpi eq, %arg1, %c0_i32 : i32
    %1 = arith.extui %0 : i1 to i32
    %c0_i32_0 = arith.constant 0 : i32
    %2 = arith.cmpi ne, %1, %c0_i32_0 : i32
    scf.if %2 {
      %c0_11 = arith.constant 0 : index
      %c0_12 = arith.constant 0 : index
      %17 = vector.load %arg2[%c0_11, %c0_12] : memref<16x768xbf16, #tpu.memory_space<vmem>>, vector<16x768xbf16>
      %c0_13 = arith.constant 0 : index
      %c0_14 = arith.constant 0 : index
      %18 = vector.load %arg6[%c0_13, %c0_14] : memref<16x768xbf16, #tpu.memory_space<vmem>>, vector<16x768xbf16>
      tpu.vector_store %arg6[%c0_13, %c0_14], %17 {strides = array<i32>} : memref<16x768xbf16, #tpu.memory_space<vmem>>, vector<16x768xbf16>,
    } else {
    }
    %c0 = arith.constant 0 : index
    %c0_1 = arith.constant 0 : index
    %3 = vector.load %arg6[%c0, %c0_1] : memref<16x768xbf16, #tpu.memory_space<vmem>>, vector<16x768xbf16>
    %c0_2 = arith.constant 0 : index
    %c0_3 = arith.constant 0 : index
    %c0_4 = arith.constant 0 : index
    %4 = vector.load %arg3[%c0_2, %c0_3, %c0_4] : memref<1x768x768xbf16, #tpu.memory_space<vmem>>, vector<1x768x768xbf16>
    %5 = vector.shape_cast %4 : vector<1x768x768xbf16> to vector<768x768xbf16>
    %cst = arith.constant dense<0.000000e+00> : vector<16x768xf32>
    %6 = tpu.matmul %3, %5, %cst {dimension_numbers = #tpu.dot_dimension_numbers<[1], [0], [0], [1], [0, 0, 1, 1], [], []>} : vector<16x768xbf16>, vector<768x768xbf16>, vector<16x768xf32> -> vector<16x768xf32>
    %c0_5 = arith.constant 0 : index
    %c0_6 = arith.constant 0 : index
    %c0_7 = arith.constant 0 : index
    %7 = vector.load %arg4[%c0_5, %c0_6, %c0_7] : memref<1x1x768xf32, #tpu.memory_space<vmem>>, vector<1x1x768xf32>
    %8 = vector.shape_cast %7 : vector<1x1x768xf32> to vector<1x768xf32>
    %9 = vector.broadcast %8 : vector<1x768xf32> to vector<16x768xf32>
    %10 = arith.addf %6, %9 : vector<16x768xf32>
    %c6_i32 = arith.constant 6 : i32
    %11 = arith.cmpi slt, %arg1, %c6_i32 : i32
    %12 = arith.extui %11 : i1 to i32
    %c0_i32_8 = arith.constant 0 : i32
    %13 = arith.cmpi ne, %12, %c0_i32_8 : i32
    scf.if %13 {
      %cst_11 = arith.constant 5.000000e-01 : f32
      %17 = vector.broadcast %cst_11 : f32 to vector<16x768xf32>
      %18 = arith.mulf %17, %10 : vector<16x768xf32>
      %cst_12 = arith.constant 0.707106769 : f32
      %19 = vector.broadcast %cst_12 : f32 to vector<16x768xf32>
      %20 = arith.mulf %10, %19 : vector<16x768xf32>
      %21 = math.erf %20 : vector<16x768xf32>
      %cst_13 = arith.constant 1.000000e+00 : f32
      %22 = vector.broadcast %cst_13 : f32 to vector<16x768xf32>
      %23 = arith.addf %22, %21 : vector<16x768xf32>
      %24 = arith.mulf %18, %23 : vector<16x768xf32>
      %25 = arith.truncf %24 : vector<16x768xf32> to vector<16x768xbf16>
      %c0_14 = arith.constant 0 : index
      %c0_15 = arith.constant 0 : index
      %26 = vector.load %arg6[%c0_14, %c0_15] : memref<16x768xbf16, #tpu.memory_space<vmem>>, vector<16x768xbf16>
      tpu.vector_store %arg6[%c0_14, %c0_15], %25 {strides = array<i32>} : memref<16x768xbf16, #tpu.memory_space<vmem>>, vector<16x768xbf16>,
    } else {
    }
    %c6_i32_9 = arith.constant 6 : i32
    %14 = arith.cmpi eq, %arg1, %c6_i32_9 : i32
    %15 = arith.extui %14 : i1 to i32
    %c0_i32_10 = arith.constant 0 : i32
    %16 = arith.cmpi ne, %15, %c0_i32_10 : i32
    scf.if %16 {
      %c0_11 = arith.constant 0 : index
      %c0_12 = arith.constant 0 : index
      %17 = vector.load %arg5[%c0_11, %c0_12] : memref<16x768xf32, #tpu.memory_space<vmem>>, vector<16x768xf32>
      tpu.vector_store %arg5[%c0_11, %c0_12], %10 {strides = array<i32>} : memref<16x768xf32, #tpu.memory_space<vmem>>, vector<16x768xf32>,
    } else {
    }
    return
  }
  func.func @transform_0(%arg0: i32, %arg1: i32) -> (i32, i32) {
    %c0_i32 = arith.constant 0 : i32
    %c0_i32_0 = arith.constant 0 : i32
    return %arg0, %c0_i32 : i32, i32
  }
  func.func @transform_1(%arg0: i32, %arg1: i32) -> (i32, i32, i32) {
    %c0_i32 = arith.constant 0 : i32
    %c0_i32_0 = arith.constant 0 : i32
    %c0_i32_1 = arith.constant 0 : i32
    return %arg1, %c0_i32, %c0_i32_0 : i32, i32, i32
  }
  func.func @transform_2(%arg0: i32, %arg1: i32) -> (i32, i32, i32) {
    %c0_i32 = arith.constant 0 : i32
    %c0_i32_0 = arith.constant 0 : i32
    %c0_i32_1 = arith.constant 0 : i32
    return %arg1, %c0_i32, %c0_i32_0 : i32, i32, i32
  }
  func.func @transform_3(%arg0: i32, %arg1: i32) -> (i32, i32) {
    %c0_i32 = arith.constant 0 : i32
    %c0_i32_0 = arith.constant 0 : i32
    return %arg0, %c0_i32 : i32, i32
  }
}

</mosaic_0001>

<bundles_post_ra>
// kernel: mlp_forward.1
= control target key start
LH: loop header
LB: loop body
LE: loop exit
PB: predicated region body
PF: predicated region fallthrough
CT: control target
= control target key end

     0   :  { %8 = vsyncpa [#allocation4], 0  ;;  %s4801_s12 = smov 0   ;;  %s4803_s13 = smov 0   ;;  %s6123_s0 = inlined_call_operand.vmem [shape: bf16[16,768], index: 0, kind: input, shape index: {}]   ;;  %s6124_s1 = inlined_call_operand.vmem [shape: bf16[7,768,768], index: 1, kind: input, shape index: {}]   ;;  %s6125_s2 = inlined_call_operand.vmem [shape: f32[7,1,768], index: 2, kind: input, shape index: {}]   ;;  %s6126_s3 = inlined_call_operand.hbm [shape: f32[16,768], index: 3, kind: output, shape index: {}]  }
   0x1   :  { %s4805_s14 = smov 0  }
   0x2 LB: > { %s3167_s15 = sadd.s32 4294967295, %s4776_s14   ;;  %s23_s16 = sadd.s32 1, %s4772_s13  ;;  %s4776_s14 = sphi %s4805_s14, %s14_s14   ;;  %s4772_s13 = sphi %s4803_s13, %s6189_s13   ;;  %s4768_s12 = sphi %s4801_s12, %s6188_s12  }
   0x3   : > { %p24_p0 = scmp.ge.s32.totalorder %s23_s16, 7  ;;  %p3171_p1 = scmp.ge.s32.totalorder %s4776_s14, 1 }
   0x4   : > { %p171_p2 = scmp.lt.s32.totalorder %s4776_s14, 8 }
   0x5   : > { %s6191_s16 = smov (%p24_p0, %s23_s16), 0 }
   0x6   : > { %p172_p3 = pnand %p3171_p1, %p171_p2 }
   0x8   : > { %175 = sbr.rel (%p172_p3) target bundleno = 634 (0x27a), region = 32 }
   0xd   : > { %p207_p4 = scmp.lt.s32.totalorder %s4768_s12, 6  ;;  %p3173_p5 = scmp.ne.s32.totalorder %s4768_s12, 0 }
   0xf   : > { %s208_s17 = scalar_select %p207_p4, %s4768_s12, 6 }
  0x10   : > { %220 = sbr.rel (%p3173_p5) target bundleno = 28 (0x1c), region = 36 }
  0x11   : > { %s4662_s18 = smul.u32 2304, %s208_s17 }
  0x12   : > { %s4663_s19 = smul.u32 6, %s208_s17 }
  0x13   : > { %s4827_s22 = scalar_lea.vmem %s6124_s1, %s4662_s18 }
  0x14   : > { %s4832_s25 = scalar_lea.vmem %s6125_s2, %s4663_s19 }
  0x15   : > { %v221_v0 = vld [vmem:[%s6123_s0] sm:$0xff]  ;;  %v222_v1 = vld [vmem:[%s6123_s0 + $0x8] sm:$0xff]  ;;  %v223_v2 = vld [vmem:[%s6123_s0 + $0x10] sm:$0xff] }
  0x16   : > { %227 = vst [vmem:[#allocation2] sm:$0xff] %v221_v0  ;;  %v224_v3 = vld [vmem:[%s6123_s0 + $0x18] sm:$0xff]  ;;  %v225_v4 = vld [vmem:[%s6123_s0 + $0x20] sm:$0xff]  ;;  %v226_v5 = vld [vmem:[%s6123_s0 + $0x28] sm:$0xff] }
  0x17   : > { %228 = vst [vmem:[#allocation2 + $0x8] sm:$0xff] %v222_v1 }
  0x18   : > { %229 = vst [vmem:[#allocation2 + $0x10] sm:$0xff] %v223_v2 }
  0x19   : > { %230 = vst [vmem:[#allocation2 + $0x18] sm:$0xff] %v224_v3 }
  0x1a   : > { %231 = vst [vmem:[#allocation2 + $0x20] sm:$0xff] %v225_v4 }
  0x1b   : > { %232 = vst [vmem:[#allocation2 + $0x28] sm:$0xff] %v226_v5 }
  0x1c PF: > { %v3368_v6 = vld [vmem:[%s4827_s22 + $0x150] sm:$0xf]  ;;  %v4419_v7 = vld [vmem:[%s4827_s22 + $0x164] sm:$0xf0]  ;;  %v3344_v17 = vld [vmem:[%s4827_s22 + $0x120] sm:$0xf] }
  0x1d   : > { %v3560_v8 = vld [vmem:[%s4827_s22 + $0x2d0] sm:$0xf]  ;;  %v3369_v9 = vor.u32 %v4419_v7, %v3368_v6  ;;  %v4467_v10 = vld [vmem:[%s4827_s22 + $0x2e4] sm:$0xf0]  ;;  %v4413_v19 = vld [vmem:[%s4827_s22 + $0x134] sm:$0xf0] }
  0x1e   : > { %v3752_v11 = vld [vmem:[%s4827_s22 + $0x450] sm:$0xf]  ;;  %v4515_v12 = vld [vmem:[%s4827_s22 + $0x464] sm:$0xf0]  ;;  %v3561_v13 = vor.u32 %v4467_v10, %v3560_v8  ;;  %v3536_v20 = vld [vmem:[%s4827_s22 + $0x2a0] sm:$0xf]  ;;  %v3345_v22 = vor.u32 %v4413_v19, %v3344_v17 }
  0x1f   : > { %v3753_v14 = vor.u32 %v4515_v12, %v3752_v11  ;;  %v3944_v15 = vld [vmem:[%s4827_s22 + $0x5d0] sm:$0xf]  ;;  %v4563_v16 = vld [vmem:[%s4827_s22 + $0x5e4] sm:$0xf0]  ;;  %2011 = vmatpush.bf16.msra.mxu0 %v3369_v9  ;;  %v4461_v21 = vld [vmem:[%s4827_s22 + $0x2b4] sm:$0xf0] }
  0x20   : > { %v3945_v18 = vor.u32 %v4563_v16, %v3944_v15  ;;  %2025 = vmatpush.bf16.msra.mxu1 %v3561_v13  ;;  %v3537_v23 = vor.u32 %v4461_v21, %v3536_v20  ;;  %v3728_v24 = vld [vmem:[%s4827_s22 + $0x420] sm:$0xf]  ;;  %v4509_v25 = vld [vmem:[%s4827_s22 + $0x434] sm:$0xf0]  ;;  %v3320_v29 = vld [vmem:[%s4827_s22 + $0xf0] sm:$0xf] }
  0x21   : > { %2039 = vmatpush.bf16.msra.mxu2 %v3753_v14  ;;  %v3920_v26 = vld [vmem:[%s4827_s22 + $0x5a0] sm:$0xf]  ;;  %v3729_v27 = vor.u32 %v4509_v25, %v3728_v24  ;;  %v4557_v28 = vld [vmem:[%s4827_s22 + $0x5b4] sm:$0xf0]  ;;  %v4407_v30 = vld [vmem:[%s4827_s22 + $0x104] sm:$0xf0] }
  0x22   : > { %2053 = vmatpush.bf16.msra.mxu3 %v3945_v18  ;;  %v3921_v31 = vor.u32 %v4557_v28, %v3920_v26  ;;  %v3512_v32 = vld [vmem:[%s4827_s22 + $0x270] sm:$0xf]  ;;  %v4455_v33 = vld [vmem:[%s4827_s22 + $0x284] sm:$0xf0]  ;;  %v3321_v35 = vor.u32 %v4407_v30, %v3320_v29  ;;  %v3296_v41 = vld [vmem:[%s4827_s22 + $0xc0] sm:$0xf] }
  0x23   : > { %v3704_v34 = vld [vmem:[%s4827_s22 + $0x3f0] sm:$0xf]  ;;  %2012 = vmatpush.bf16.msra.mxu0 %v3345_v22  ;;  %v4503_v36 = vld [vmem:[%s4827_s22 + $0x404] sm:$0xf0]  ;;  %v3513_v39 = vor.u32 %v4455_v33, %v3512_v32  ;;  %v4401_v42 = vld [vmem:[%s4827_s22 + $0xd4] sm:$0xf0] }
  0x24   : > { %v3896_v37 = vld [vmem:[%s4827_s22 + $0x570] sm:$0xf]  ;;  %v4551_v38 = vld [vmem:[%s4827_s22 + $0x584] sm:$0xf0]  ;;  %2026 = vmatpush.bf16.msra.mxu1 %v3537_v23  ;;  %v3705_v40 = vor.u32 %v4503_v36, %v3704_v34  ;;  %v3488_v43 = vld [vmem:[%s4827_s22 + $0x240] sm:$0xf]  ;;  %v3297_v50 = vor.u32 %v4401_v42, %v3296_v41 }
  0x25   : > { %2040 = vmatpush.bf16.msra.mxu2 %v3729_v27  ;;  %v3897_v44 = vor.u32 %v4551_v38, %v3896_v37  ;;  %v4449_v45 = vld [vmem:[%s4827_s22 + $0x254] sm:$0xf0]  ;;  %v3680_v46 = vld [vmem:[%s4827_s22 + $0x3c0] sm:$0xf]  ;;  %v3272_v53 = vld [vmem:[%s4827_s22 + $0x90] sm:$0xf] }
  0x26   : > { %2054 = vmatpush.bf16.msra.mxu3 %v3921_v31  ;;  %v4497_v47 = vld [vmem:[%s4827_s22 + $0x3d4] sm:$0xf0]  ;;  %v3872_v48 = vld [vmem:[%s4827_s22 + $0x540] sm:$0xf]  ;;  %v3489_v51 = vor.u32 %v4449_v45, %v3488_v43  ;;  %v4395_v54 = vld [vmem:[%s4827_s22 + $0xa4] sm:$0xf0] }
  0x27   : > { %v4545_v49 = vld [vmem:[%s4827_s22 + $0x554] sm:$0xf0]  ;;  %2013 = vmatpush.bf16.msra.mxu0 %v3321_v35  ;;  %v3681_v52 = vor.u32 %v4497_v47, %v3680_v46  ;;  %v3464_v55 = vld [vmem:[%s4827_s22 + $0x210] sm:$0xf]  ;;  %v4443_v57 = vld [vmem:[%s4827_s22 + $0x224] sm:$0xf0]  ;;  %v3273_v62 = vor.u32 %v4395_v54, %v3272_v53 }
  0x28   : > { %2027 = vmatpush.bf16.msra.mxu1 %v3513_v39  ;;  %v3873_v56 = vor.u32 %v4545_v49, %v3872_v48  ;;  %v3656_v58 = vld [vmem:[%s4827_s22 + $0x390] sm:$0xf]  ;;  %v4491_v59 = vld [vmem:[%s4827_s22 + $0x3a4] sm:$0xf0]  ;;  %v3465_v63 = vor.u32 %v4443_v57, %v3464_v55  ;;  %v3248_v1 = vld [vmem:[%s4827_s22 + $0x60] sm:$0xf] }
  0x29   : > { %2041 = vmatpush.bf16.msra.mxu2 %v3705_v40  ;;  %v3848_v60 = vld [vmem:[%s4827_s22 + $0x510] sm:$0xf]  ;;  %v4539_v61 = vld [vmem:[%s4827_s22 + $0x524] sm:$0xf0]  ;;  %v3657_v0 = vor.u32 %v4491_v59, %v3656_v58  ;;  %v4389_v2 = vld [vmem:[%s4827_s22 + $0x74] sm:$0xf0] }
  0x2a   : > { %2055 = vmatpush.bf16.msra.mxu3 %v3897_v44  ;;  %v3440_v3 = vld [vmem:[%s4827_s22 + $0x1e0] sm:$0xf]  ;;  %v3849_v4 = vor.u32 %v4539_v61, %v3848_v60  ;;  %v4437_v5 = vld [vmem:[%s4827_s22 + $0x1f4] sm:$0xf0]  ;;  %v3249_v10 = vor.u32 %v4389_v2, %v3248_v1  ;;  %v3224_v13 = vld [vmem:[%s4827_s22 + $0x30] sm:$0xf] }
  0x2b   : > { %2014 = vmatpush.bf16.msra.mxu0 %v3297_v50  ;;  %v3632_v6 = vld [vmem:[%s4827_s22 + $0x360] sm:$0xf]  ;;  %v4485_v7 = vld [vmem:[%s4827_s22 + $0x374] sm:$0xf0]  ;;  %v3441_v11 = vor.u32 %v4437_v5, %v3440_v3  ;;  %v4383_v14 = vld [vmem:[%s4827_s22 + $0x44] sm:$0xf0] }
  0x2c   : > { %2028 = vmatpush.bf16.msra.mxu1 %v3489_v51  ;;  %v3824_v8 = vld [vmem:[%s4827_s22 + $0x4e0] sm:$0xf]  ;;  %v4533_v9 = vld [vmem:[%s4827_s22 + $0x4f4] sm:$0xf0]  ;;  %v3633_v12 = vor.u32 %v4485_v7, %v3632_v6  ;;  %v3416_v15 = vld [vmem:[%s4827_s22 + $0x1b0] sm:$0xf]  ;;  %v3225_v22 = vor.u32 %v4383_v14, %v3224_v13 }
  0x2d   : > { %2042 = vmatpush.bf16.msra.mxu2 %v3681_v52  ;;  %v3825_v16 = vor.u32 %v4533_v9, %v3824_v8  ;;  %v4431_v17 = vld [vmem:[%s4827_s22 + $0x1c4] sm:$0xf0]  ;;  %v3608_v18 = vld [vmem:[%s4827_s22 + $0x330] sm:$0xf]  ;;  %v3200_v23 = vld [vmem:[%s4827_s22] sm:$0xf] }
  0x2e   : > { %2056 = vmatpush.bf16.msra.mxu3 %v3873_v56  ;;  %v4479_v19 = vld [vmem:[%s4827_s22 + $0x344] sm:$0xf0]  ;;  %v3800_v20 = vld [vmem:[%s4827_s22 + $0x4b0] sm:$0xf]  ;;  %v4377_v24 = vld [vmem:[%s4827_s22 + $0x14] sm:$0xf0]  ;;  %v3417_v25 = vor.u32 %v4431_v17, %v3416_v15 }
  0x2f   : > { %2015 = vmatpush.bf16.msra.mxu0 %v3273_v62  ;;  %v4527_v21 = vld [vmem:[%s4827_s22 + $0x4c4] sm:$0xf0]  ;;  %v3609_v26 = vor.u32 %v4479_v19, %v3608_v18  ;;  %v3392_v27 = vld [vmem:[%s4827_s22 + $0x180] sm:$0xf]  ;;  %v4425_v28 = vld [vmem:[%s4827_s22 + $0x194] sm:$0xf0]  ;;  %v3201_v37 = vor.u32 %v4377_v24, %v3200_v23 }
  0x30   : > { %2029 = vmatpush.bf16.msra.mxu1 %v3465_v63  ;;  %v3584_v29 = vld [vmem:[%s4827_s22 + $0x300] sm:$0xf]  ;;  %v3801_v30 = vor.u32 %v4527_v21, %v3800_v20  ;;  %v4473_v31 = vld [vmem:[%s4827_s22 + $0x314] sm:$0xf0]  ;;  %v4136_v34 = vld [vmem:[%s4827_s22 + $0x750] sm:$0xf]  ;;  %v3393_v41 = vor.u32 %v4425_v28, %v3392_v27 }
  0x31   : > { %2043 = vmatpush.bf16.msra.mxu2 %v3657_v0  ;;  %v3776_v32 = vld [vmem:[%s4827_s22 + $0x480] sm:$0xf]  ;;  %v4521_v33 = vld [vmem:[%s4827_s22 + $0x494] sm:$0xf0]  ;;  %v4611_v35 = vld [vmem:[%s4827_s22 + $0x764] sm:$0xf0]  ;;  %v3585_v42 = vor.u32 %v4473_v31, %v3584_v29 }
  0x32   : > { %2057 = vmatpush.bf16.msra.mxu3 %v3849_v4  ;;  %v4328_v36 = vld [vmem:[%s4827_s22 + $0x8d0] sm:$0xf]  ;;  %v4659_v38 = vld [vmem:[%s4827_s22 + $0x8e4] sm:$0xf0]  ;;  %v4416_v39 = vld [vmem:[%s4827_s22 + $0x154] sm:$0xf]  ;;  %v3777_v45 = vor.u32 %v4521_v33, %v3776_v32  ;;  %v4137_v46 = vor.u32 %v4611_v35, %v4136_v34 }
  0x33   : > { %2016 = vmatpush.bf16.msra.mxu0 %v3249_v10  ;;  %v3370_v40 = vld [vmem:[%s4827_s22 + $0x168] sm:$0xf0]  ;;  %v4464_v43 = vld [vmem:[%s4827_s22 + $0x2d4] sm:$0xf]  ;;  %v4112_v47 = vld [vmem:[%s4827_s22 + $0x720] sm:$0xf]  ;;  %v4329_v48 = vor.u32 %v4659_v38, %v4328_v36 }
  0x34   : > { %2030 = vmatpush.bf16.msra.mxu1 %v3441_v11  ;;  %v3562_v44 = vld [vmem:[%s4827_s22 + $0x2e8] sm:$0xf0]  ;;  %v3373_v49 = vor.u32 %v4416_v39, %v3370_v40  ;;  %v4605_v50 = vld [vmem:[%s4827_s22 + $0x734] sm:$0xf0]  ;;  %v4304_v51 = vld [vmem:[%s4827_s22 + $0x8a0] sm:$0xf] }
  0x35   : > { %2044 = vmatpush.bf16.msra.mxu2 %v3633_v12  ;;  %v4653_v52 = vld [vmem:[%s4827_s22 + $0x8b4] sm:$0xf0]  ;;  %v3565_v53 = vor.u32 %v4464_v43, %v3562_v44  ;;  %v4410_v54 = vld [vmem:[%s4827_s22 + $0x124] sm:$0xf]  ;;  %v3346_v55 = vld [vmem:[%s4827_s22 + $0x138] sm:$0xf0]  ;;  %v4113_v60 = vor.u32 %v4605_v50, %v4112_v47 }
  0x36   : > { %2058 = vmatpush.bf16.msra.mxu3 %v3825_v16  ;;  %v4458_v56 = vld [vmem:[%s4827_s22 + $0x2a4] sm:$0xf]  ;;  %v3538_v57 = vld [vmem:[%s4827_s22 + $0x2b8] sm:$0xf0]  ;;  %v3176_v58 = vld [vmem:[#allocation2] sm:$0xf]  ;;  %v4305_v0 = vor.u32 %v4653_v52, %v4304_v51  ;;  %v3349_v1 = vor.u32 %v4410_v54, %v3346_v55 }
  0x37   : > { %2017 = vmatpush.bf16.msra.mxu0 %v3225_v22  ;;  %v4371_v59 = vld [vmem:[#allocation2 + $0x14] sm:$0xf0]  ;;  %v4088_v61 = vld [vmem:[%s4827_s22 + $0x6f0] sm:$0xf]  ;;  %v4599_v62 = vld [vmem:[%s4827_s22 + $0x704] sm:$0xf0]  ;;  %v3541_v5 = vor.u32 %v4458_v56, %v3538_v57 }
  0x38   : > { %2031 = vmatpush.bf16.msra.mxu1 %v3417_v25  ;;  %v4935_v63 = vor.u32 %v4371_v59, %v3176_v58  ;;  %v4280_v2 = vld [vmem:[%s4827_s22 + $0x870] sm:$0xf]  ;;  %v4647_v3 = vld [vmem:[%s4827_s22 + $0x884] sm:$0xf0]  ;;  %v4404_v4 = vld [vmem:[%s4827_s22 + $0xf4] sm:$0xf]  ;;  %v4089_v13 = vor.u32 %v4599_v62, %v4088_v61 }
  0x39   : > { %2045 = vmatpush.bf16.msra.mxu2 %v3609_v26  ;;  %v3322_v6 = vld [vmem:[%s4827_s22 + $0x108] sm:$0xf0]  ;;  %v4368_v7 = vld [vmem:[#allocation2 + $0x4] sm:$0xf]  ;;  %v3178_v8 = vld [vmem:[#allocation2 + $0x18] sm:$0xf0]  ;;  %v4281_v17 = vor.u32 %v4647_v3, %v4280_v2 }
  0x3a   : > { %2059 = vmatpush.bf16.msra.mxu3 %v3801_v30  ;;  %v4452_v9 = vld [vmem:[%s4827_s22 + $0x274] sm:$0xf]  ;;  %v3514_v10 = vld [vmem:[%s4827_s22 + $0x288] sm:$0xf0]  ;;  %v4064_v11 = vld [vmem:[%s4827_s22 + $0x6c0] sm:$0xf]  ;;  %v4945_v12 = vor.u32 %v4368_v7, %v3178_v8  ;;  %v3325_v18 = vor.u32 %v4404_v4, %v3322_v6 }
  0x3b   : > { %2018 = vmatpush.bf16.msra.mxu0 %v3201_v37  ;;  %v4593_v14 = vld [vmem:[%s4827_s22 + $0x6d4] sm:$0xf0]  ;;  %v4256_v15 = vld [vmem:[%s4827_s22 + $0x840] sm:$0xf]  ;;  %v4398_v19 = vld [vmem:[%s4827_s22 + $0xc4] sm:$0xf]  ;;  %v3517_v22 = vor.u32 %v4452_v9, %v3514_v10 }
  0x3c   : > { %2032 = vmatpush.bf16.msra.mxu1 %v3393_v41  ;;  %v4641_v16 = vld [vmem:[%s4827_s22 + $0x854] sm:$0xf0]  ;;  %v3298_v20 = vld [vmem:[%s4827_s22 + $0xd8] sm:$0xf0]  ;;  %v3184_v21 = vld [vmem:[#allocation2 + $0x8] sm:$0xf]  ;;  %v4065_v30 = vor.u32 %v4593_v14, %v4064_v11 }
  0x3d   : > { %2046 = vmatpush.bf16.msra.mxu2 %v3585_v42  ;;  %v4372_v23 = vld [vmem:[#allocation2 + $0x1c] sm:$0xf0]  ;;  %v4369_v24 = vld [vmem:[#allocation2 + $0xc] sm:$0xf]  ;;  %v3186_v25 = vld [vmem:[#allocation2 + $0x20] sm:$0xf0]  ;;  %v4257_v31 = vor.u32 %v4641_v16, %v4256_v15  ;;  %v3301_v32 = vor.u32 %v4398_v19, %v3298_v20 }
  0x3e   : > { %2060 = vmatpush.bf16.msra.mxu3 %v3777_v45  ;;  %2019 = vmatmul.bf16.vlgmr.msra.gmra.mxu0 %v4935_v63  ;;  %v4446_v26 = vld [vmem:[%s4827_s22 + $0x244] sm:$0xf]  ;;  %v3490_v27 = vld [vmem:[%s4827_s22 + $0x258] sm:$0xf0]  ;;  %v4955_v28 = vor.u32 %v4372_v23, %v3184_v21  ;;  %v4957_v29 = vor.u32 %v4369_v24, %v3186_v25  ;;  %v4040_v33 = vld [vmem:[%s4827_s22 + $0x690] sm:$0xf] }
  0x3f   : > { %2067 = vmatpush.bf16.msrb.mxu0 %v4137_v46  ;;  %2033 = vmatmul.bf16.vlgmr.msra.gmra.mxu1 %v4945_v12  ;;  %v4587_v34 = vld [vmem:[%s4827_s22 + $0x6a4] sm:$0xf0]  ;;  %v4232_v35 = vld [vmem:[%s4827_s22 + $0x810] sm:$0xf]  ;;  %v3493_v36 = vor.u32 %v4446_v26, %v3490_v27  ;;  %v4392_v38 = vld [vmem:[%s4827_s22 + $0x94] sm:$0xf] }
  0x40   : > { %2081 = vmatpush.bf16.msrb.mxu1 %v4329_v48  ;;  %v4635_v37 = vld [vmem:[%s4827_s22 + $0x824] sm:$0xf0]  ;;  %v3274_v39 = vld [vmem:[%s4827_s22 + $0xa8] sm:$0xf0]  ;;  %2047 = vmatmul.bf16.vlgmr.msra.gmra.mxu2 %v4955_v28  ;;  %v4440_v40 = vld [vmem:[%s4827_s22 + $0x214] sm:$0xf]  ;;  %v4041_v42 = vor.u32 %v4587_v34, %v4040_v33 }
  0x41   : > { %2095 = vmatpush.bf16.msrb.mxu2 %v3373_v49  ;;  %v3466_v41 = vld [vmem:[%s4827_s22 + $0x228] sm:$0xf0]  ;;  %2061 = vmatmul.bf16.vlgmr.msra.gmra.mxu3 %v4957_v29  ;;  %v4233_v43 = vor.u32 %v4635_v37, %v4232_v35  ;;  %v3277_v44 = vor.u32 %v4392_v38, %v3274_v39  ;;  %v4016_v45 = vld [vmem:[%s4827_s22 + $0x660] sm:$0xf]  ;;  %v4581_v46 = vld [vmem:[%s4827_s22 + $0x674] sm:$0xf0] }
  0x42   : > { %2109 = vmatpush.bf16.msrb.mxu3 %v3565_v53  ;;  %v4208_v47 = vld [vmem:[%s4827_s22 + $0x7e0] sm:$0xf]  ;;  %v3469_v48 = vor.u32 %v4440_v40, %v3466_v41  ;;  %v4629_v49 = vld [vmem:[%s4827_s22 + $0x7f4] sm:$0xf0]  ;;  %v4386_v50 = vld [vmem:[%s4827_s22 + $0x64] sm:$0xf]  ;;  %v4017_v54 = vor.u32 %v4581_v46, %v4016_v45 }
  0x43   : > { %2068 = vmatpush.bf16.msrb.mxu0 %v4113_v60  ;;  %v3250_v51 = vld [vmem:[%s4827_s22 + $0x78] sm:$0xf0]  ;;  %v4434_v52 = vld [vmem:[%s4827_s22 + $0x1e4] sm:$0xf]  ;;  %v4209_v55 = vor.u32 %v4629_v49, %v4208_v47  ;;  %v3992_v57 = vld [vmem:[%s4827_s22 + $0x630] sm:$0xf] }
  0x44   : > { %2082 = vmatpush.bf16.msrb.mxu1 %v4305_v0  ;;  %v3442_v53 = vld [vmem:[%s4827_s22 + $0x1f8] sm:$0xf0]  ;;  %v3253_v56 = vor.u32 %v4386_v50, %v3250_v51  ;;  %v4575_v58 = vld [vmem:[%s4827_s22 + $0x644] sm:$0xf0]  ;;  %v4184_v59 = vld [vmem:[%s4827_s22 + $0x7b0] sm:$0xf] }
  0x45   : > { %2096 = vmatpush.bf16.msrb.mxu2 %v3349_v1  ;;  %v3445_v60 = vor.u32 %v4434_v52, %v3442_v53  ;;  %v4623_v61 = vld [vmem:[%s4827_s22 + $0x7c4] sm:$0xf0]  ;;  %v4380_v62 = vld [vmem:[%s4827_s22 + $0x34] sm:$0xf]  ;;  %v3226_v0 = vld [vmem:[%s4827_s22 + $0x48] sm:$0xf0]  ;;  %v3993_v3 = vor.u32 %v4575_v58, %v3992_v57 }
  0x46   : > { %2110 = vmatpush.bf16.msrb.mxu3 %v3541_v5  ;;  %v4428_v1 = vld [vmem:[%s4827_s22 + $0x1b4] sm:$0xf]  ;;  %v3418_v2 = vld [vmem:[%s4827_s22 + $0x1c8] sm:$0xf0]  ;;  %v3968_v4 = vld [vmem:[%s4827_s22 + $0x600] sm:$0xf]  ;;  %v4185_v7 = vor.u32 %v4623_v61, %v4184_v59  ;;  %v3229_v8 = vor.u32 %v4380_v62, %v3226_v0 }
  0x47   : > { %2069 = vmatpush.bf16.msrb.mxu0 %v4089_v13  ;;  %v4569_v5 = vld [vmem:[%s4827_s22 + $0x614] sm:$0xf0]  ;;  %v4160_v6 = vld [vmem:[%s4827_s22 + $0x780] sm:$0xf]  ;;  %v4374_v10 = vld [vmem:[%s4827_s22 + $0x4] sm:$0xf]  ;;  %v3421_v13 = vor.u32 %v4428_v1, %v3418_v2 }
  0x48   : > { %2083 = vmatpush.bf16.msrb.mxu1 %v4281_v17  ;;  %v4617_v9 = vld [vmem:[%s4827_s22 + $0x794] sm:$0xf0]  ;;  %v3202_v11 = vld [vmem:[%s4827_s22 + $0x18] sm:$0xf0]  ;;  %v4422_v14 = vld [vmem:[%s4827_s22 + $0x184] sm:$0xf]  ;;  %v3969_v20 = vor.u32 %v4569_v5, %v3968_v4 }
  0x49   : > { %2097 = vmatpush.bf16.msrb.mxu2 %v3325_v18  ;;  %v3394_v15 = vld [vmem:[%s4827_s22 + $0x198] sm:$0xf0]  ;;  %v4512_v16 = vld [vmem:[%s4827_s22 + $0x454] sm:$0xf]  ;;  %v3754_v17 = vld [vmem:[%s4827_s22 + $0x468] sm:$0xf0]  ;;  %v4161_v24 = vor.u32 %v4617_v9, %v4160_v6  ;;  %v3205_v25 = vor.u32 %v4374_v10, %v3202_v11 }
  0x4a   : > { %2111 = vmatpush.bf16.msrb.mxu3 %v3517_v22  ;;  %v4560_v18 = vld [vmem:[%s4827_s22 + $0x5d4] sm:$0xf]  ;;  %v3946_v19 = vld [vmem:[%s4827_s22 + $0x5e8] sm:$0xf0]  ;;  %v3192_v27 = vld [vmem:[#allocation2 + $0x10] sm:$0xf] }
  0x4b   : > { %2070 = vmatpush.bf16.msrb.mxu0 %v4065_v30  ;;  %v4608_v21 = vld [vmem:[%s4827_s22 + $0x754] sm:$0xf]  ;;  %v4138_v22 = vld [vmem:[%s4827_s22 + $0x768] sm:$0xf0]  ;;  %v4373_v30 = vld [vmem:[#allocation2 + $0x24] sm:$0xf0]  ;;  %v3949_v35 = vor.u32 %v4560_v18, %v3946_v19 }
  0x4c   : > { %2084 = vmatpush.bf16.msrb.mxu1 %v4257_v31  ;;  %v4656_v23 = vld [vmem:[%s4827_s22 + $0x8d4] sm:$0xf]  ;;  %v4330_v26 = vld [vmem:[%s4827_s22 + $0x8e8] sm:$0xf0]  ;;  %v3397_v31 = vor.u32 %v4422_v14, %v3394_v15  ;;  %v4506_v37 = vld [vmem:[%s4827_s22 + $0x424] sm:$0xf]  ;;  %v5004_v41 = vor.u32 %v4373_v30, %v3192_v27 }
  0x4d   : > { %2098 = vmatpush.bf16.msrb.mxu2 %v3301_v32  ;;  %v3757_v32 = vor.u32 %v4512_v16, %v3754_v17  ;;  %v4370_v33 = vld [vmem:[#allocation2 + $0x14] sm:$0xf]  ;;  %v3194_v34 = vld [vmem:[#allocation2 + $0x28] sm:$0xf0]  ;;  %v3730_v38 = vld [vmem:[%s4827_s22 + $0x438] sm:$0xf0]  ;;  %v4333_v40 = vor.u32 %v4656_v23, %v4330_v26 }
  0x4e   : > { %2112 = vmatpush.bf16.msrb.mxu3 %v3493_v36  ;;  %v4141_v36 = vor.u32 %v4608_v21, %v4138_v22  ;;  %v4554_v39 = vld [vmem:[%s4827_s22 + $0x5a4] sm:$0xf]  ;;  %v5009_v45 = vor.u32 %v4370_v33, %v3194_v34  ;;  %v4306_v47 = vld [vmem:[%s4827_s22 + $0x8b8] sm:$0xf0]  ;;  %v4500_v51 = vld [vmem:[%s4827_s22 + $0x3f4] sm:$0xf] }
  0x4f   : > { %2071 = vmatpush.bf16.msrb.mxu0 %v4041_v42  ;;  %v3922_v42 = vld [vmem:[%s4827_s22 + $0x5b8] sm:$0xf0]  ;;  %v4650_v46 = vld [vmem:[%s4827_s22 + $0x8a4] sm:$0xf]  ;;  %v3706_v52 = vld [vmem:[%s4827_s22 + $0x408] sm:$0xf0] }
  0x50   : > { %2085 = vmatpush.bf16.msrb.mxu1 %v4233_v43  ;;  %v4602_v43 = vld [vmem:[%s4827_s22 + $0x724] sm:$0xf]  ;;  %v3925_v49 = vor.u32 %v4554_v39, %v3922_v42  ;;  %v4548_v53 = vld [vmem:[%s4827_s22 + $0x574] sm:$0xf]  ;;  %v4090_v57 = vld [vmem:[%s4827_s22 + $0x708] sm:$0xf0] }
  0x51   : > { %2099 = vmatpush.bf16.msrb.mxu2 %v3277_v44  ;;  %v4114_v44 = vld [vmem:[%s4827_s22 + $0x738] sm:$0xf0]  ;;  %v4644_v58 = vld [vmem:[%s4827_s22 + $0x874] sm:$0xf]  ;;  %v4282_v59 = vld [vmem:[%s4827_s22 + $0x888] sm:$0xf0] }
  0x52   : > { %2113 = vmatpush.bf16.msrb.mxu3 %v3469_v48  ;;  %v3733_v48 = vor.u32 %v4506_v37, %v3730_v38  ;;  %v4117_v50 = vor.u32 %v4602_v43, %v4114_v44  ;;  %v4494_v0 = vld [vmem:[%s4827_s22 + $0x3c4] sm:$0xf]  ;;  %v3682_v1 = vld [vmem:[%s4827_s22 + $0x3d8] sm:$0xf0]  ;;  %v3658_v14 = vld [vmem:[%s4827_s22 + $0x3a8] sm:$0xf0] }
  0x53   : > { %2072 = vmatpush.bf16.msrb.mxu0 %v4017_v54  ;;  %v4309_v54 = vor.u32 %v4650_v46, %v4306_v47  ;;  %v4542_v2 = vld [vmem:[%s4827_s22 + $0x544] sm:$0xf]  ;;  %v3874_v4 = vld [vmem:[%s4827_s22 + $0x558] sm:$0xf0]  ;;  %v3685_v9 = vor.u32 %v4494_v0, %v3682_v1  ;;  %v4536_v15 = vld [vmem:[%s4827_s22 + $0x514] sm:$0xf] }
  0x54   : > { %2086 = vmatpush.bf16.msrb.mxu1 %v4209_v55  ;;  %v3898_v55 = vld [vmem:[%s4827_s22 + $0x588] sm:$0xf0]  ;;  %v4590_v5 = vld [vmem:[%s4827_s22 + $0x6c4] sm:$0xf]  ;;  %v4066_v6 = vld [vmem:[%s4827_s22 + $0x6d8] sm:$0xf0]  ;;  %v3877_v10 = vor.u32 %v4542_v2, %v3874_v4 }
  0x55   : > { %2100 = vmatpush.bf16.msrb.mxu2 %v3253_v56  ;;  %v4596_v56 = vld [vmem:[%s4827_s22 + $0x6f4] sm:$0xf]  ;;  %v3901_v61 = vor.u32 %v4548_v53, %v3898_v55  ;;  %v4069_v11 = vor.u32 %v4590_v5, %v4066_v6  ;;  %v3850_v17 = vld [vmem:[%s4827_s22 + $0x528] sm:$0xf0]  ;;  %v3634_v26 = vld [vmem:[%s4827_s22 + $0x378] sm:$0xf0] }
  0x56   : > { %2114 = vmatpush.bf16.msrb.mxu3 %v3445_v60  ;;  %v3709_v60 = vor.u32 %v4500_v51, %v3706_v52  ;;  %v4093_v62 = vor.u32 %v4596_v56, %v4090_v57  ;;  %v4584_v18 = vld [vmem:[%s4827_s22 + $0x694] sm:$0xf]  ;;  %v4042_v19 = vld [vmem:[%s4827_s22 + $0x6a8] sm:$0xf0]  ;;  %v3853_v23 = vor.u32 %v4536_v15, %v3850_v17  ;;  %v4530_v27 = vld [vmem:[%s4827_s22 + $0x4e4] sm:$0xf] }
  0x57   : > { %2073 = vmatpush.bf16.msrb.mxu0 %v3993_v3  ;;  %v4285_v3 = vor.u32 %v4644_v58, %v4282_v59  ;;  %v4234_v21 = vld [vmem:[%s4827_s22 + $0x828] sm:$0xf0]  ;;  %v4018_v33 = vld [vmem:[%s4827_s22 + $0x678] sm:$0xf0]  ;;  %v4626_v34 = vld [vmem:[%s4827_s22 + $0x7e4] sm:$0xf] }
  0x58   : > { %2087 = vmatpush.bf16.msrb.mxu1 %v4185_v7  ;;  %v4638_v7 = vld [vmem:[%s4827_s22 + $0x844] sm:$0xf]  ;;  %v4476_v39 = vld [vmem:[%s4827_s22 + $0x334] sm:$0xf]  ;;  %v3802_v44 = vld [vmem:[%s4827_s22 + $0x4c8] sm:$0xf0] }
  0x59   : > { %2101 = vmatpush.bf16.msrb.mxu2 %v3229_v8  ;;  %v4258_v8 = vld [vmem:[%s4827_s22 + $0x858] sm:$0xf0]  ;;  %v4524_v42 = vld [vmem:[%s4827_s22 + $0x4b4] sm:$0xf]  ;;  %v3994_v47 = vld [vmem:[%s4827_s22 + $0x648] sm:$0xf0] }
  0x5a   : > { %2115 = vmatpush.bf16.msrb.mxu3 %v3421_v13  ;;  %v4488_v13 = vld [vmem:[%s4827_s22 + $0x394] sm:$0xf]  ;;  %v4261_v16 = vor.u32 %v4638_v7, %v4258_v8  ;;  %v4470_v51 = vld [vmem:[%s4827_s22 + $0x304] sm:$0xf]  ;;  %v3586_v52 = vld [vmem:[%s4827_s22 + $0x318] sm:$0xf0]  ;;  %v3805_v53 = vor.u32 %v4524_v42, %v3802_v44 }
  0x5b   : > { %2074 = vmatpush.bf16.msrb.mxu0 %v3969_v20  ;;  %v4632_v20 = vld [vmem:[%s4827_s22 + $0x814] sm:$0xf]  ;;  %v3661_v22 = vor.u32 %v4488_v13, %v3658_v14  ;;  %v4518_v55 = vld [vmem:[%s4827_s22 + $0x484] sm:$0xf]  ;;  %v3778_v56 = vld [vmem:[%s4827_s22 + $0x498] sm:$0xf0]  ;;  %v3589_v2 = vor.u32 %v4470_v51, %v3586_v52 }
  0x5c   : > { %2088 = vmatpush.bf16.msrb.mxu1 %v4161_v24  ;;  %v4045_v24 = vor.u32 %v4584_v18, %v4042_v19  ;;  %v4237_v30 = vor.u32 %v4632_v20, %v4234_v21  ;;  %v4572_v46 = vld [vmem:[%s4827_s22 + $0x634] sm:$0xf]  ;;  %v4566_v57 = vld [vmem:[%s4827_s22 + $0x604] sm:$0xf]  ;;  %v3970_v59 = vld [vmem:[%s4827_s22 + $0x618] sm:$0xf0]  ;;  %v3781_v6 = vor.u32 %v4518_v55, %v3778_v56 }
  0x5d   : > { %2102 = vmatpush.bf16.msrb.mxu2 %v3205_v25  ;;  %v4482_v25 = vld [vmem:[%s4827_s22 + $0x364] sm:$0xf]  ;;  %v4420_v0 = vld [vmem:[%s4827_s22 + $0x16c] sm:$0xf0]  ;;  %v3568_v1 = vld [vmem:[%s4827_s22 + $0x2d8] sm:$0xf]  ;;  %v3973_v7 = vor.u32 %v4566_v57, %v3970_v59 }
  0x5e   : > { %2116 = vmatpush.bf16.msrb.mxu3 %v3397_v31  ;;  %2075 = vmatmul.bf16.vlgmr.msrb.gmra.mxu0 %v5004_v41  ;;  %v3826_v31 = vld [vmem:[%s4827_s22 + $0x4f8] sm:$0xf0]  ;;  %v3760_v4 = vld [vmem:[%s4827_s22 + $0x458] sm:$0xf]  ;;  %v4516_v5 = vld [vmem:[%s4827_s22 + $0x46c] sm:$0xf0] }
  0x5f   : > { %2123 = vmatpush.bf16.msra.mxu0 %v3757_v32  ;;  %2089 = vmatmul.bf16.vlgmr.msrb.gmra.mxu1 %v5009_v45  ;;  %v4578_v32 = vld [vmem:[%s4827_s22 + $0x664] sm:$0xf]  ;;  %v3829_v37 = vor.u32 %v4530_v27, %v3826_v31  ;;  %v3952_v8 = vld [vmem:[%s4827_s22 + $0x5d8] sm:$0xf]  ;;  %v3761_v14 = vor.u32 %v4516_v5, %v3760_v4  ;;  %v3352_v15 = vld [vmem:[%s4827_s22 + $0x128] sm:$0xf] }
  0x60   : > { %2137 = vmatpush.bf16.msra.mxu1 %v3949_v35  ;;  %2103 = vmatmul.bf16.vlgmr.msrb.gmra.mxu2 %v4935_v63  ;;  %v4210_v35 = vld [vmem:[%s4827_s22 + $0x7f8] sm:$0xf0]  ;;  %v4021_v38 = vor.u32 %v4578_v32, %v4018_v33  ;;  %v3544_v17 = vld [vmem:[%s4827_s22 + $0x2a8] sm:$0xf]  ;;  %v4462_v19 = vld [vmem:[%s4827_s22 + $0x2bc] sm:$0xf0] }
  0x61   : > { %2151 = vmatpush.bf16.msra.mxu2 %v4141_v36  ;;  %2117 = vmatmul.bf16.vlgmr.msrb.gmra.mxu3 %v4945_v12  ;;  %v3637_v36 = vor.u32 %v4482_v25, %v3634_v26  ;;  %v4213_v43 = vor.u32 %v4626_v34, %v4210_v35  ;;  %v3736_v20 = vld [vmem:[%s4827_s22 + $0x428] sm:$0xf]  ;;  %v4510_v21 = vld [vmem:[%s4827_s22 + $0x43c] sm:$0xf0]  ;;  %v3545_v25 = vor.u32 %v4462_v19, %v3544_v17  ;;  %v3328_v27 = vld [vmem:[%s4827_s22 + $0xf8] sm:$0xf] }
  0x62   : > { %2165 = vmatpush.bf16.msra.mxu3 %v4333_v40  ;;  %v3610_v40 = vld [vmem:[%s4827_s22 + $0x348] sm:$0xf0]  ;;  %v3737_v26 = vor.u32 %v4510_v21, %v3736_v20  ;;  %v3520_v31 = vld [vmem:[%s4827_s22 + $0x278] sm:$0xf]  ;;  %v4456_v33 = vld [vmem:[%s4827_s22 + $0x28c] sm:$0xf0] }
  0x63   : > { %2124 = vmatpush.bf16.msra.mxu0 %v3733_v48  ;;  %v4620_v48 = vld [vmem:[%s4827_s22 + $0x7b4] sm:$0xf]  ;;  %v3712_v34 = vld [vmem:[%s4827_s22 + $0x3f8] sm:$0xf]  ;;  %v4504_v35 = vld [vmem:[%s4827_s22 + $0x40c] sm:$0xf0] }
  0x64   : > { %2138 = vmatpush.bf16.msra.mxu1 %v3925_v49  ;;  %v4186_v49 = vld [vmem:[%s4827_s22 + $0x7c8] sm:$0xf0]  ;;  %v3304_v42 = vld [vmem:[%s4827_s22 + $0xc8] sm:$0xf]  ;;  %v4546_v51 = vld [vmem:[%s4827_s22 + $0x55c] sm:$0xf0] }
  0x65   : > { %2152 = vmatpush.bf16.msra.mxu2 %v4117_v50  ;;  %v3613_v50 = vor.u32 %v4476_v39, %v3610_v40  ;;  %v4189_v58 = vor.u32 %v4620_v48, %v4186_v49  ;;  %v3521_v39 = vor.u32 %v4456_v33, %v3520_v31  ;;  %v3713_v40 = vor.u32 %v4504_v35, %v3712_v34  ;;  %v3496_v44 = vld [vmem:[%s4827_s22 + $0x248] sm:$0xf]  ;;  %v4498_v49 = vld [vmem:[%s4827_s22 + $0x3dc] sm:$0xf0]  ;;  %v3280_v55 = vld [vmem:[%s4827_s22 + $0x98] sm:$0xf] }
  0x66   : > { %2166 = vmatpush.bf16.msra.mxu3 %v4309_v54  ;;  %v3997_v54 = vor.u32 %v4572_v46, %v3994_v47  ;;  %v4450_v47 = vld [vmem:[%s4827_s22 + $0x25c] sm:$0xf0]  ;;  %v3688_v48 = vld [vmem:[%s4827_s22 + $0x3c8] sm:$0xf]  ;;  %v4396_v56 = vld [vmem:[%s4827_s22 + $0xac] sm:$0xf0] }
  0x67   : > { %2125 = vmatpush.bf16.msra.mxu0 %v3709_v60  ;;  %v4614_v60 = vld [vmem:[%s4827_s22 + $0x784] sm:$0xf]  ;;  %v3472_v57 = vld [vmem:[%s4827_s22 + $0x218] sm:$0xf]  ;;  %v4444_v59 = vld [vmem:[%s4827_s22 + $0x22c] sm:$0xf0] }
  0x68   : > { %2139 = vmatpush.bf16.msra.mxu1 %v3901_v61  ;;  %v4162_v61 = vld [vmem:[%s4827_s22 + $0x798] sm:$0xf0]  ;;  %v3256_v4 = vld [vmem:[%s4827_s22 + $0x68] sm:$0xf]  ;;  %v4390_v5 = vld [vmem:[%s4827_s22 + $0x7c] sm:$0xf0] }
  0x69   : > { %2153 = vmatpush.bf16.msra.mxu2 %v4093_v62  ;;  %v3376_v62 = vld [vmem:[%s4827_s22 + $0x158] sm:$0xf]  ;;  %v4432_v21 = vld [vmem:[%s4827_s22 + $0x1cc] sm:$0xf0]  ;;  %v3400_v33 = vld [vmem:[%s4827_s22 + $0x188] sm:$0xf] }
  0x6a   : > { %2167 = vmatpush.bf16.msra.mxu3 %v4285_v3  ;;  %v4468_v3 = vld [vmem:[%s4827_s22 + $0x2ec] sm:$0xf0]  ;;  %v3232_v17 = vld [vmem:[%s4827_s22 + $0x38] sm:$0xf]  ;;  %v4426_v34 = vld [vmem:[%s4827_s22 + $0x19c] sm:$0xf0] }
  0x6b   : > { %2126 = vmatpush.bf16.msra.mxu0 %v3685_v9  ;;  %v4564_v9 = vld [vmem:[%s4827_s22 + $0x5ec] sm:$0xf0]  ;;  %v3569_v13 = vor.u32 %v4468_v3, %v3568_v1  ;;  %v3281_v1 = vor.u32 %v4396_v56, %v3280_v55  ;;  %v3424_v19 = vld [vmem:[%s4827_s22 + $0x1b8] sm:$0xf]  ;;  %v3592_v35 = vld [vmem:[%s4827_s22 + $0x308] sm:$0xf] }
  0x6c   : > { %2140 = vmatpush.bf16.msra.mxu1 %v3877_v10  ;;  %v4165_v10 = vor.u32 %v4614_v60, %v4162_v61  ;;  %v3953_v18 = vor.u32 %v4564_v9, %v3952_v8  ;;  %v3664_v60 = vld [vmem:[%s4827_s22 + $0x398] sm:$0xf]  ;;  %v4492_v61 = vld [vmem:[%s4827_s22 + $0x3ac] sm:$0xf0]  ;;  %v4438_v8 = vld [vmem:[%s4827_s22 + $0x1fc] sm:$0xf0]  ;;  %v3425_v31 = vor.u32 %v4432_v21, %v3424_v19 }
  0x6d   : > { %2154 = vmatpush.bf16.msra.mxu2 %v4069_v11  ;;  %v3377_v11 = vor.u32 %v4420_v0, %v3376_v62  ;;  %v3856_v62 = vld [vmem:[%s4827_s22 + $0x518] sm:$0xf]  ;;  %v4540_v0 = vld [vmem:[%s4827_s22 + $0x52c] sm:$0xf0]  ;;  %v3665_v3 = vor.u32 %v4492_v61, %v3664_v60  ;;  %v3640_v9 = vld [vmem:[%s4827_s22 + $0x368] sm:$0xf] }
  0x6e   : > { %2168 = vmatpush.bf16.msra.mxu3 %v4261_v16  ;;  %v4414_v16 = vld [vmem:[%s4827_s22 + $0x13c] sm:$0xf0]  ;;  %v4072_v19 = vld [vmem:[%s4827_s22 + $0x6c8] sm:$0xf]  ;;  %p4350_p6 = scmp.ge.s32.totalorder %s4768_s12, 6 }
  0x6f   : > { %2127 = vmatpush.bf16.msra.mxu0 %v3661_v22  ;;  %v3928_v22 = vld [vmem:[%s4827_s22 + $0x5a8] sm:$0xf]  ;;  %v4654_v61 = vld [vmem:[%s4827_s22 + $0x8bc] sm:$0xf0] }
  0x70   : > { %2141 = vmatpush.bf16.msra.mxu1 %v3853_v23  ;;  %v4558_v23 = vld [vmem:[%s4827_s22 + $0x5bc] sm:$0xf0]  ;;  %v4264_v21 = vld [vmem:[%s4827_s22 + $0x848] sm:$0xf] }
  0x71   : > { %2155 = vmatpush.bf16.msra.mxu2 %v4045_v24  ;;  %v3353_v24 = vor.u32 %v4414_v16, %v3352_v15  ;;  %v3929_v32 = vor.u32 %v4558_v23, %v3928_v22  ;;  %v3616_v22 = vld [vmem:[%s4827_s22 + $0x338] sm:$0xf]  ;;  %v4480_v23 = vld [vmem:[%s4827_s22 + $0x34c] sm:$0xf0] }
  0x72   : > { %2169 = vmatpush.bf16.msra.mxu3 %v4237_v30  ;;  %v4408_v30 = vld [vmem:[%s4827_s22 + $0x10c] sm:$0xf0] }
  0x73   : > { %2128 = vmatpush.bf16.msra.mxu0 %v3637_v36  ;;  %v3904_v36 = vld [vmem:[%s4827_s22 + $0x578] sm:$0xf] }
  0x74   : > { %2142 = vmatpush.bf16.msra.mxu1 %v3829_v37  ;;  %v4552_v37 = vld [vmem:[%s4827_s22 + $0x58c] sm:$0xf0] }
  0x75   : > { %2156 = vmatpush.bf16.msra.mxu2 %v4021_v38  ;;  %v3329_v38 = vor.u32 %v4408_v30, %v3328_v27  ;;  %v3905_v46 = vor.u32 %v4552_v37, %v3904_v36  ;;  %v3208_v27 = vld [vmem:[%s4827_s22 + $0x8] sm:$0xf]  ;;  %v4378_v30 = vld [vmem:[%s4827_s22 + $0x1c] sm:$0xf0] }
  0x76   : > { %2170 = vmatpush.bf16.msra.mxu3 %v4213_v43  ;;  %v4402_v43 = vld [vmem:[%s4827_s22 + $0xdc] sm:$0xf0] }
  0x77   : > { %2129 = vmatpush.bf16.msra.mxu0 %v3613_v50  ;;  %v3880_v50 = vld [vmem:[%s4827_s22 + $0x548] sm:$0xf]  ;;  %v3305_v52 = vor.u32 %v4402_v43, %v3304_v42  ;;  %v4474_v37 = vld [vmem:[%s4827_s22 + $0x31c] sm:$0xf0]  ;;  %v4612_v42 = vld [vmem:[%s4827_s22 + $0x76c] sm:$0xf0] }
  0x78   : > { %2143 = vmatpush.bf16.msra.mxu1 %v3805_v53  ;;  %v3497_v53 = vor.u32 %v4450_v47, %v3496_v44  ;;  %v4336_v43 = vld [vmem:[%s4827_s22 + $0x8d8] sm:$0xf]  ;;  %v3209_v44 = vor.u32 %v4378_v30, %v3208_v27  ;;  %v4417_v47 = vld [vmem:[%s4827_s22 + $0x15c] sm:$0xf]  ;;  %v3498_v27 = vld [vmem:[%s4827_s22 + $0x260] sm:$0xf0] }
  0x79   : > { %2157 = vmatpush.bf16.msra.mxu2 %v3997_v54  ;;  %v3689_v54 = vor.u32 %v4498_v49, %v3688_v48  ;;  %v3378_v48 = vld [vmem:[%s4827_s22 + $0x170] sm:$0xf0]  ;;  %v3401_v49 = vor.u32 %v4426_v34, %v3400_v33  ;;  %v4048_v33 = vld [vmem:[%s4827_s22 + $0x698] sm:$0xf]  ;;  %v4588_v34 = vld [vmem:[%s4827_s22 + $0x6ac] sm:$0xf0] }
  0x7a   : > { %2171 = vmatpush.bf16.msra.mxu3 %v4189_v58  ;;  %v3881_v58 = vor.u32 %v4546_v51, %v3880_v50  ;;  %v3593_v50 = vor.u32 %v4474_v37, %v3592_v35  ;;  %v4465_v51 = vld [vmem:[%s4827_s22 + $0x2dc] sm:$0xf]  ;;  %v3381_v56 = vor.u32 %v4417_v47, %v3378_v48  ;;  %v4240_v35 = vld [vmem:[%s4827_s22 + $0x818] sm:$0xf]  ;;  %v4636_v37 = vld [vmem:[%s4827_s22 + $0x82c] sm:$0xf0] }
  0x7b   : > { %2130 = vmatpush.bf16.msra.mxu0 %v3589_v2  ;;  %v3473_v2 = vor.u32 %v4444_v59, %v3472_v57  ;;  %v4120_v57 = vld [vmem:[%s4827_s22 + $0x728] sm:$0xf]  ;;  %v4582_v48 = vld [vmem:[%s4827_s22 + $0x67c] sm:$0xf0] }
  0x7c   : > { %2144 = vmatpush.bf16.msra.mxu1 %v3781_v6  ;;  %v3448_v6 = vld [vmem:[%s4827_s22 + $0x1e8] sm:$0xf] }
  0x7d   : > { %2158 = vmatpush.bf16.msra.mxu2 %v3973_v7  ;;  %v3857_v7 = vor.u32 %v4540_v0, %v3856_v62  ;;  %v3449_v15 = vor.u32 %v4438_v8, %v3448_v6  ;;  %v4312_v59 = vld [vmem:[%s4827_s22 + $0x8a8] sm:$0xf]  ;;  %v4411_v62 = vld [vmem:[%s4827_s22 + $0x12c] sm:$0xf]  ;;  %v3354_v0 = vld [vmem:[%s4827_s22 + $0x140] sm:$0xf0] }
  0x7e   : > { %2172 = vmatpush.bf16.msra.mxu3 %v4165_v10  ;;  %2131 = vmatmul.bf16.vlgmr.msra.gmra.mxu0 %v4955_v28  ;;  %v4486_v10 = vld [vmem:[%s4827_s22 + $0x37c] sm:$0xf0]  ;;  %v4096_v6 = vld [vmem:[%s4827_s22 + $0x6f8] sm:$0xf]  ;;  %v4024_v47 = vld [vmem:[%s4827_s22 + $0x668] sm:$0xf] }
  0x7f   : > { %2179 = vmatpush.bf16.msrb.mxu0 %v3377_v11  ;;  %2145 = vmatmul.bf16.vlgmr.msra.gmra.mxu1 %v4957_v29  ;;  %v3832_v11 = vld [vmem:[%s4827_s22 + $0x4e8] sm:$0xf]  ;;  %v3641_v16 = vor.u32 %v4486_v10, %v3640_v9  ;;  %v4288_v8 = vld [vmem:[%s4827_s22 + $0x878] sm:$0xf]  ;;  %v4648_v10 = vld [vmem:[%s4827_s22 + $0x88c] sm:$0xf0] }
  0x80   : > { %2193 = vmatpush.bf16.msrb.mxu1 %v3569_v13  ;;  %2159 = vmatmul.bf16.vlgmr.msra.gmra.mxu2 %v5004_v41  ;;  %v4534_v13 = vld [vmem:[%s4827_s22 + $0x4fc] sm:$0xf0] }
  0x81   : > { %2207 = vmatpush.bf16.msrb.mxu2 %v3761_v14  ;;  %2173 = vmatmul.bf16.vlgmr.msra.gmra.mxu3 %v5009_v45  ;;  %v3257_v14 = vor.u32 %v4390_v5, %v3256_v4  ;;  %v3833_v20 = vor.u32 %v4534_v13, %v3832_v11  ;;  %v4313_v4 = vor.u32 %v4654_v61, %v4312_v59  ;;  %v4405_v11 = vld [vmem:[%s4827_s22 + $0xfc] sm:$0xf]  ;;  %v3330_v13 = vld [vmem:[%s4827_s22 + $0x110] sm:$0xf0]  ;;  %v4000_v59 = vld [vmem:[%s4827_s22 + $0x638] sm:$0xf] }
  0x82   : > { %2221 = vmatpush.bf16.msrb.mxu3 %v3953_v18  ;;  %v4384_v18 = vld [vmem:[%s4827_s22 + $0x4c] sm:$0xf0]  ;;  %v3357_v5 = vor.u32 %v4411_v62, %v3354_v0  ;;  %v4192_v61 = vld [vmem:[%s4827_s22 + $0x7b8] sm:$0xf] }
  0x83   : > { %2180 = vmatpush.bf16.msrb.mxu0 %v3353_v24  ;;  %v3808_v24 = vld [vmem:[%s4827_s22 + $0x4b8] sm:$0xf]  ;;  %v4624_v0 = vld [vmem:[%s4827_s22 + $0x7cc] sm:$0xf0] }
  0x84   : > { %2194 = vmatpush.bf16.msrb.mxu1 %v3545_v25  ;;  %v4528_v25 = vld [vmem:[%s4827_s22 + $0x4cc] sm:$0xf0] }
  0x85   : > { %2208 = vmatpush.bf16.msrb.mxu2 %v3737_v26  ;;  %v3233_v26 = vor.u32 %v4384_v18, %v3232_v17  ;;  %v3809_v36 = vor.u32 %v4528_v25, %v3808_v24  ;;  %v4289_v17 = vor.u32 %v4648_v10, %v4288_v8  ;;  %v3333_v18 = vor.u32 %v4405_v11, %v3330_v13  ;;  %v4399_v24 = vld [vmem:[%s4827_s22 + $0xcc] sm:$0xf]  ;;  %v3306_v25 = vld [vmem:[%s4827_s22 + $0xe0] sm:$0xf0]  ;;  %v4168_v10 = vld [vmem:[%s4827_s22 + $0x788] sm:$0xf] }
  0x86   : > { %2222 = vmatpush.bf16.msrb.mxu3 %v3929_v32  ;;  %v3617_v32 = vor.u32 %v4480_v23, %v3616_v22  ;;  %v4642_v23 = vld [vmem:[%s4827_s22 + $0x85c] sm:$0xf0]  ;;  %v4193_v8 = vor.u32 %v4624_v0, %v4192_v61  ;;  %v4375_v13 = vld [vmem:[%s4827_s22 + $0xc] sm:$0xf] }
  0x87   : > { %2181 = vmatpush.bf16.msrb.mxu0 %v3329_v38  ;;  %v3784_v38 = vld [vmem:[%s4827_s22 + $0x488] sm:$0xf]  ;;  %v4618_v11 = vld [vmem:[%s4827_s22 + $0x79c] sm:$0xf0]  ;;  %v4495_v0 = vld [vmem:[%s4827_s22 + $0x3cc] sm:$0xf] }
  0x88   : > { %2195 = vmatpush.bf16.msrb.mxu1 %v3521_v39  ;;  %v4522_v39 = vld [vmem:[%s4827_s22 + $0x49c] sm:$0xf0] }
  0x89   : > { %2209 = vmatpush.bf16.msrb.mxu2 %v3713_v40  ;;  %v4144_v40 = vld [vmem:[%s4827_s22 + $0x758] sm:$0xf] }
  0x8a   : > { %2223 = vmatpush.bf16.msrb.mxu3 %v3905_v46  ;;  %v4660_v46 = vld [vmem:[%s4827_s22 + $0x8ec] sm:$0xf0] }
  0x8b   : > { %2182 = vmatpush.bf16.msrb.mxu0 %v3305_v52  ;;  %v3570_v52 = vld [vmem:[%s4827_s22 + $0x2f0] sm:$0xf0]  ;;  %v4337_v55 = vor.u32 %v4660_v46, %v4336_v43  ;;  %v4049_v43 = vor.u32 %v4588_v34, %v4048_v33 }
  0x8c   : > { %2196 = vmatpush.bf16.msrb.mxu1 %v3497_v53  ;;  %v3785_v53 = vor.u32 %v4522_v39, %v3784_v38  ;;  %v3573_v60 = vor.u32 %v4465_v51, %v3570_v52  ;;  %v4393_v38 = vld [vmem:[%s4827_s22 + $0x9c] sm:$0xf]  ;;  %v3282_v39 = vld [vmem:[%s4827_s22 + $0xb0] sm:$0xf0]  ;;  %v4630_v51 = vld [vmem:[%s4827_s22 + $0x7fc] sm:$0xf0] }
  0x8d   : > { %2210 = vmatpush.bf16.msrb.mxu2 %v3689_v54  ;;  %v4145_v54 = vor.u32 %v4612_v42, %v4144_v40  ;;  %v4441_v40 = vld [vmem:[%s4827_s22 + $0x21c] sm:$0xf]  ;;  %v3474_v42 = vld [vmem:[%s4827_s22 + $0x230] sm:$0xf0]  ;;  %v3285_v46 = vor.u32 %v4393_v38, %v3282_v39  ;;  %v4387_v52 = vld [vmem:[%s4827_s22 + $0x6c] sm:$0xf] }
  0x8e   : > { %2224 = vmatpush.bf16.msrb.mxu3 %v3881_v58  ;;  %v4606_v58 = vld [vmem:[%s4827_s22 + $0x73c] sm:$0xf0]  ;;  %v3930_v39 = vld [vmem:[%s4827_s22 + $0x5c0] sm:$0xf0] }
  0x8f   : > { %2183 = vmatpush.bf16.msrb.mxu0 %v3281_v1  ;;  %v4459_v1 = vld [vmem:[%s4827_s22 + $0x2ac] sm:$0xf] }
  0x90   : > { %2197 = vmatpush.bf16.msrb.mxu1 %v3473_v2  ;;  %v3546_v2 = vld [vmem:[%s4827_s22 + $0x2c0] sm:$0xf0] }
  0x91   : > { %2211 = vmatpush.bf16.msrb.mxu2 %v3665_v3  ;;  %v4121_v3 = vor.u32 %v4606_v58, %v4120_v57  ;;  %v3549_v9 = vor.u32 %v4459_v1, %v3546_v2  ;;  %v4381_v1 = vld [vmem:[%s4827_s22 + $0x3c] sm:$0xf]  ;;  %v3234_v2 = vld [vmem:[%s4827_s22 + $0x50] sm:$0xf0] }
  0x92   : > { %2225 = vmatpush.bf16.msrb.mxu3 %v3857_v7  ;;  %v4600_v7 = vld [vmem:[%s4827_s22 + $0x70c] sm:$0xf0] }
  0x93   : > { %2184 = vmatpush.bf16.msrb.mxu0 %v3257_v14  ;;  %v4453_v14 = vld [vmem:[%s4827_s22 + $0x27c] sm:$0xf] }
  0x94   : > { %2198 = vmatpush.bf16.msrb.mxu1 %v3449_v15  ;;  %v3522_v15 = vld [vmem:[%s4827_s22 + $0x290] sm:$0xf0] }
  0x95   : > { %2212 = vmatpush.bf16.msrb.mxu2 %v3641_v16  ;;  %v4097_v16 = vor.u32 %v4600_v7, %v4096_v6  ;;  %v3525_v22 = vor.u32 %v4453_v14, %v3522_v15  ;;  %v3976_v6 = vld [vmem:[%s4827_s22 + $0x608] sm:$0xf]  ;;  %v4570_v7 = vld [vmem:[%s4827_s22 + $0x61c] sm:$0xf0]  ;;  %v3210_v15 = vld [vmem:[%s4827_s22 + $0x20] sm:$0xf0] }
  0x96   : > { %2226 = vmatpush.bf16.msrb.mxu3 %v3833_v20  ;;  %v4594_v20 = vld [vmem:[%s4827_s22 + $0x6dc] sm:$0xf0] }
  0x97   : > { %2185 = vmatpush.bf16.msrb.mxu0 %v3233_v26  ;;  %v4447_v26 = vld [vmem:[%s4827_s22 + $0x24c] sm:$0xf]  ;;  %v4073_v30 = vor.u32 %v4594_v20, %v4072_v19  ;;  %v3762_v19 = vld [vmem:[%s4827_s22 + $0x470] sm:$0xf0]  ;;  %v4561_v20 = vld [vmem:[%s4827_s22 + $0x5dc] sm:$0xf] }
  0x98   : > { %2199 = vmatpush.bf16.msrb.mxu1 %v3425_v31  ;;  %v4265_v31 = vor.u32 %v4642_v23, %v4264_v21  ;;  %v3977_v21 = vor.u32 %v4570_v7, %v3976_v6  ;;  %v4609_v23 = vld [vmem:[%s4827_s22 + $0x75c] sm:$0xf]  ;;  %v4074_v6 = vld [vmem:[%s4827_s22 + $0x6e0] sm:$0xf0]  ;;  %v4639_v7 = vld [vmem:[%s4827_s22 + $0x84c] sm:$0xf] }
  0x99   : > { %2213 = vmatpush.bf16.msrb.mxu2 %v3617_v32  ;;  %v3309_v32 = vor.u32 %v4399_v24, %v3306_v25  ;;  %v4146_v24 = vld [vmem:[%s4827_s22 + $0x770] sm:$0xf0]  ;;  %v4169_v25 = vor.u32 %v4618_v11, %v4168_v10 }
  0x9a   : > { %2227 = vmatpush.bf16.msrb.mxu3 %v3809_v36  ;;  %v3501_v36 = vor.u32 %v4447_v26, %v3498_v27  ;;  %v3213_v26 = vor.u32 %v4375_v13, %v3210_v15  ;;  %v4657_v27 = vld [vmem:[%s4827_s22 + $0x8dc] sm:$0xf]  ;;  %v4149_v34 = vor.u32 %v4609_v23, %v4146_v24  ;;  %v4242_v23 = vld [vmem:[%s4827_s22 + $0x830] sm:$0xf0] }
  0x9b   : > { %2186 = vmatpush.bf16.msrb.mxu0 %v3209_v44  ;;  %v4241_v44 = vor.u32 %v4636_v37, %v4240_v35  ;;  %v4507_v35 = vld [vmem:[%s4827_s22 + $0x42c] sm:$0xf]  ;;  %v4489_v15 = vld [vmem:[%s4827_s22 + $0x39c] sm:$0xf] }
  0x9c   : > { %2200 = vmatpush.bf16.msrb.mxu1 %v3401_v49  ;;  %v4216_v49 = vld [vmem:[%s4827_s22 + $0x7e8] sm:$0xf]  ;;  %v4555_v37 = vld [vmem:[%s4827_s22 + $0x5ac] sm:$0xf] }
  0x9d   : > { %2214 = vmatpush.bf16.msrb.mxu2 %v3593_v50  ;;  %v3477_v50 = vor.u32 %v4441_v40, %v3474_v42  ;;  %v4217_v57 = vor.u32 %v4630_v51, %v4216_v49  ;;  %v4603_v40 = vld [vmem:[%s4827_s22 + $0x72c] sm:$0xf]  ;;  %v4122_v42 = vld [vmem:[%s4827_s22 + $0x740] sm:$0xf0]  ;;  %v4549_v51 = vld [vmem:[%s4827_s22 + $0x57c] sm:$0xf] }
  0x9e   : > { %2228 = vmatpush.bf16.msrb.mxu3 %v3785_v53  ;;  %2187 = vmatmul.bf16.vlgmr.msrb.gmra.mxu0 %v4935_v63  ;;  %v3258_v53 = vld [vmem:[%s4827_s22 + $0x80] sm:$0xf0]  ;;  %v4125_v49 = vor.u32 %v4603_v40, %v4122_v42 }
  0x9f   : > { %2235 = vmatpush.bf16.msra.mxu0 %v4145_v54  ;;  %2201 = vmatmul.bf16.vlgmr.msrb.gmra.mxu1 %v4945_v12  ;;  %v4435_v54 = vld [vmem:[%s4827_s22 + $0x1ec] sm:$0xf]  ;;  %v3261_v58 = vor.u32 %v4387_v52, %v3258_v53  ;;  %v5221_v52 = vld [vmem:[%s4832_s25] sm:$0x3f] }
  0xa0   : > { %2249 = vmatpush.bf16.msra.mxu1 %v4337_v55  ;;  %2215 = vmatmul.bf16.vlgmr.msrb.gmra.mxu2 %v4955_v28  ;;  %v3450_v55 = vld [vmem:[%s4827_s22 + $0x200] sm:$0xf0] }
  0xa1   : > { %2263 = vmatpush.bf16.msra.mxu2 %v3381_v56  ;;  %2229 = vmatmul.bf16.vlgmr.msrb.gmra.mxu3 %v4957_v29  ;;  %v4025_v56 = vor.u32 %v4582_v48, %v4024_v47  ;;  %v3453_v62 = vor.u32 %v4435_v54, %v3450_v55  ;;  %v4501_v47 = vld [vmem:[%s4827_s22 + $0x3fc] sm:$0xf]  ;;  %v3933_v48 = vor.u32 %v4555_v37, %v3930_v39  ;;  %v3906_v54 = vld [vmem:[%s4827_s22 + $0x590] sm:$0xf0]  ;;  %v4026_v37 = vld [vmem:[%s4827_s22 + $0x680] sm:$0xf0] }
  0xa2   : > { %2277 = vmatpush.bf16.msra.mxu3 %v3573_v60  ;;  %v4576_v60 = vld [vmem:[%s4827_s22 + $0x64c] sm:$0xf0]  ;;  %v4597_v55 = vld [vmem:[%s4827_s22 + $0x6fc] sm:$0xf]  ;;  %v3909_v61 = vor.u32 %v4549_v51, %v3906_v54  ;;  %v4218_v39 = vld [vmem:[%s4827_s22 + $0x800] sm:$0xf0] }
  0xa3   : > { %2236 = vmatpush.bf16.msra.mxu0 %v4121_v3  ;;  %v4429_v3 = vld [vmem:[%s4827_s22 + $0x1bc] sm:$0xf]  ;;  %v3810_v51 = vld [vmem:[%s4827_s22 + $0x4d0] sm:$0xf0] }
  0xa4   : > { %2250 = vmatpush.bf16.msra.mxu1 %v4313_v4  ;;  %v3426_v4 = vld [vmem:[%s4827_s22 + $0x1d0] sm:$0xf0] }
  0xa5   : > { %2264 = vmatpush.bf16.msra.mxu2 %v3357_v5  ;;  %v4001_v5 = vor.u32 %v4576_v60, %v4000_v59  ;;  %v3429_v14 = vor.u32 %v4429_v3, %v3426_v4  ;;  %v529_v60 = vperm.slane %v5221_v52, 0  ;;  %v3882_v4 = vld [vmem:[%s4827_s22 + $0x560] sm:$0xf0]  ;;  %v4002_v54 = vld [vmem:[%s4827_s22 + $0x650] sm:$0xf0] }
  0xa6   : > { %2278 = vmatpush.bf16.msra.mxu3 %v3549_v9  ;;  %v3237_v9 = vor.u32 %v4381_v1, %v3234_v2  ;;  %v3690_v1 = vld [vmem:[%s4827_s22 + $0x3e0] sm:$0xf0]  ;;  %v4543_v2 = vld [vmem:[%s4827_s22 + $0x54c] sm:$0xf] }
  0xa7   : > { %2237 = vmatpush.bf16.msra.mxu0 %v4097_v16  ;;  %v4423_v16 = vld [vmem:[%s4827_s22 + $0x18c] sm:$0xf]  ;;  %v3693_v10 = vor.u32 %v4495_v0, %v3690_v1  ;;  %v3885_v13 = vor.u32 %v4543_v2, %v3882_v4  ;;  %v3786_v2 = vld [vmem:[%s4827_s22 + $0x4a0] sm:$0xf0] }
  0xa8   : > { %2251 = vmatpush.bf16.msra.mxu1 %v4289_v17  ;;  %v3402_v17 = vld [vmem:[%s4827_s22 + $0x1a0] sm:$0xf0]  ;;  %v4519_v1 = vld [vmem:[%s4827_s22 + $0x48c] sm:$0xf] }
  0xa9   : > { %2265 = vmatpush.bf16.msra.mxu2 %v3333_v18  ;;  %v4513_v18 = vld [vmem:[%s4827_s22 + $0x45c] sm:$0xf] }
  0xaa   : > { %2279 = vmatpush.bf16.msra.mxu3 %v3525_v22  ;;  %v3954_v22 = vld [vmem:[%s4827_s22 + $0x5f0] sm:$0xf0] }
  0xab   : > { %2238 = vmatpush.bf16.msra.mxu0 %v4073_v30  ;;  %v4338_v30 = vld [vmem:[%s4827_s22 + $0x8f0] sm:$0xf0]  ;;  %v3957_v33 = vor.u32 %v4561_v20, %v3954_v22  ;;  %v4585_v20 = vld [vmem:[%s4827_s22 + $0x69c] sm:$0xf] }
  0xac   : > { %2252 = vmatpush.bf16.msra.mxu1 %v4265_v31  ;;  %v3405_v31 = vor.u32 %v4423_v16, %v3402_v17  ;;  %v4341_v38 = vor.u32 %v4657_v27, %v4338_v30  ;;  %v3666_v16 = vld [vmem:[%s4827_s22 + $0x3b0] sm:$0xf0]  ;;  %v4537_v17 = vld [vmem:[%s4827_s22 + $0x51c] sm:$0xf] }
  0xad   : > { %2266 = vmatpush.bf16.msra.mxu2 %v3309_v32  ;;  %v3765_v32 = vor.u32 %v4513_v18, %v3762_v19  ;;  %v3858_v19 = vld [vmem:[%s4827_s22 + $0x530] sm:$0xf0]  ;;  %v4633_v22 = vld [vmem:[%s4827_s22 + $0x81c] sm:$0xf] }
  0xae   : > { %2280 = vmatpush.bf16.msra.mxu3 %v3501_v36  ;;  %v3738_v36 = vld [vmem:[%s4827_s22 + $0x440] sm:$0xf0]  ;;  %v3861_v27 = vor.u32 %v4537_v17, %v3858_v19  ;;  %v3768_v17 = vld [vmem:[%s4827_s22 + $0x460] sm:$0xf] }
  0xaf   : > { %2239 = vmatpush.bf16.msra.mxu0 %v4049_v43  ;;  %v4651_v43 = vld [vmem:[%s4827_s22 + $0x8ac] sm:$0xf] }
  0xb0   : > { %2253 = vmatpush.bf16.msra.mxu1 %v4241_v44  ;;  %v4314_v44 = vld [vmem:[%s4827_s22 + $0x8c0] sm:$0xf0] }
  0xb1   : > { %2267 = vmatpush.bf16.msra.mxu2 %v3285_v46  ;;  %v3741_v46 = vor.u32 %v4507_v35, %v3738_v36  ;;  %v4317_v53 = vor.u32 %v4651_v43, %v4314_v44  ;;  %v3834_v35 = vld [vmem:[%s4827_s22 + $0x500] sm:$0xf0]  ;;  %v4579_v36 = vld [vmem:[%s4827_s22 + $0x66c] sm:$0xf] }
  0xb2   : > { %2281 = vmatpush.bf16.msra.mxu3 %v3477_v50  ;;  %v3714_v50 = vld [vmem:[%s4827_s22 + $0x410] sm:$0xf0] }
  0xb3   : > { %2240 = vmatpush.bf16.msra.mxu0 %v4025_v56  ;;  %v4098_v56 = vld [vmem:[%s4827_s22 + $0x710] sm:$0xf0]  ;;  %v3717_v59 = vor.u32 %v4501_v47, %v3714_v50  ;;  %v4477_v47 = vld [vmem:[%s4827_s22 + $0x33c] sm:$0xf] }
  0xb4   : > { %2254 = vmatpush.bf16.msra.mxu1 %v4217_v57  ;;  %v4645_v57 = vld [vmem:[%s4827_s22 + $0x87c] sm:$0xf] }
  0xb5   : > { %2268 = vmatpush.bf16.msra.mxu2 %v3261_v58  ;;  %v4290_v58 = vld [vmem:[%s4827_s22 + $0x890] sm:$0xf0] }
  0xb6   : > { %2282 = vmatpush.bf16.msra.mxu3 %v3453_v62  ;;  %v4101_v62 = vor.u32 %v4597_v55, %v4098_v56  ;;  %v4293_v3 = vor.u32 %v4645_v57, %v4290_v58  ;;  %v4621_v55 = vld [vmem:[%s4827_s22 + $0x7bc] sm:$0xf]  ;;  %v4194_v56 = vld [vmem:[%s4827_s22 + $0x7d0] sm:$0xf0] }
  0xb7   : > { %2241 = vmatpush.bf16.msra.mxu0 %v4001_v5  ;;  %v4591_v5 = vld [vmem:[%s4827_s22 + $0x6cc] sm:$0xf] }
  0xb8   : > { %2255 = vmatpush.bf16.msra.mxu1 %v4193_v8  ;;  %v4266_v8 = vld [vmem:[%s4827_s22 + $0x860] sm:$0xf0] }
  0xb9   : > { %2269 = vmatpush.bf16.msra.mxu2 %v3237_v9  ;;  %v4269_v18 = vor.u32 %v4639_v7, %v4266_v8  ;;  %v4615_v7 = vld [vmem:[%s4827_s22 + $0x78c] sm:$0xf]  ;;  %v4170_v8 = vld [vmem:[%s4827_s22 + $0x7a0] sm:$0xf0] }
  0xba   : > { %2283 = vmatpush.bf16.msra.mxu3 %v3429_v14  ;;  %v4077_v14 = vor.u32 %v4591_v5, %v4074_v6  ;;  %v4197_v5 = vor.u32 %v4621_v55, %v4194_v56  ;;  %v3978_v6 = vld [vmem:[%s4827_s22 + $0x620] sm:$0xf0]  ;;  %v3912_v56 = vld [vmem:[%s4827_s22 + $0x580] sm:$0xf] }
  0xbb   : > { %2242 = vmatpush.bf16.msra.mxu0 %v3977_v21  ;;  %v2020_v9 = vpop.f32.mrf.mxu0  ;;  %v4050_v21 = vld [vmem:[%s4827_s22 + $0x6b0] sm:$0xf0] }
  0xbc   : > { %2256 = vmatpush.bf16.msra.mxu1 %v4169_v25  ;;  %v2021_v11 = vadd.f32 %v2020_v9, %v529_v60  ;;  %v2034_v24 = vpop.f32.mrf.mxu1  ;;  %v3669_v25 = vor.u32 %v4489_v15, %v3666_v16  ;;  %v4053_v30 = vor.u32 %v4585_v20, %v4050_v21  ;;  %v4469_v16 = vld [vmem:[%s4827_s22 + $0x2f4] sm:$0xf0]  ;;  %v3789_v20 = vor.u32 %v4519_v1, %v3786_v2  ;;  %v4451_v2 = vld [vmem:[%s4827_s22 + $0x264] sm:$0xf0] }
  0xbd   : > { %2270 = vmatpush.bf16.msra.mxu2 %v3213_v26 }
  0xbe   : > { %2284 = vmatpush.bf16.msra.mxu3 %v3405_v31  ;;  %2243 = vmatmul.bf16.vlgmr.msra.gmra.mxu0 %v5004_v41  ;;  %v2035_v26 = vadd.f32 %v2034_v24, %v2021_v11  ;;  %v4483_v31 = vld [vmem:[%s4827_s22 + $0x36c] sm:$0xf]  ;;  %v3384_v11 = vld [vmem:[%s4827_s22 + $0x160] sm:$0xf]  ;;  %v4173_v24 = vor.u32 %v4615_v7, %v4170_v8  ;;  %v4547_v7 = vld [vmem:[%s4827_s22 + $0x564] sm:$0xf0] }
  0xbf   : > { %2291 = vmatpush.bf16.msrb.mxu0 %v3765_v32  ;;  %2257 = vmatmul.bf16.vlgmr.msra.gmra.mxu1 %v5009_v45  ;;  %v3642_v32 = vld [vmem:[%s4827_s22 + $0x380] sm:$0xf0] }
  0xc0   : > { %2305 = vmatpush.bf16.msrb.mxu1 %v3957_v33  ;;  %2271 = vmatmul.bf16.vlgmr.msra.gmra.mxu2 %v4935_v63  ;;  %v4531_v33 = vld [vmem:[%s4827_s22 + $0x4ec] sm:$0xf]  ;;  %v3645_v42 = vor.u32 %v4483_v31, %v3642_v32  ;;  %v4415_v31 = vld [vmem:[%s4827_s22 + $0x144] sm:$0xf0]  ;;  %v3552_v32 = vld [vmem:[%s4827_s22 + $0x2b0] sm:$0xf] }
  0xc1   : > { %2319 = vmatpush.bf16.msrb.mxu2 %v4149_v34  ;;  %2285 = vmatmul.bf16.vlgmr.msra.gmra.mxu3 %v4945_v12  ;;  %v4245_v34 = vor.u32 %v4633_v22, %v4242_v23  ;;  %v3837_v44 = vor.u32 %v4531_v33, %v3834_v35  ;;  %v3960_v22 = vld [vmem:[%s4827_s22 + $0x5e0] sm:$0xf]  ;;  %v4565_v23 = vld [vmem:[%s4827_s22 + $0x5f4] sm:$0xf0]  ;;  %v3744_v35 = vld [vmem:[%s4827_s22 + $0x430] sm:$0xf] }
  0xc2   : > { %2333 = vmatpush.bf16.msrb.mxu3 %v4341_v38  ;;  %v4627_v38 = vld [vmem:[%s4827_s22 + $0x7ec] sm:$0xf]  ;;  %v3961_v33 = vor.u32 %v4565_v23, %v3960_v22  ;;  %v3864_v22 = vld [vmem:[%s4827_s22 + $0x520] sm:$0xf]  ;;  %v4541_v23 = vld [vmem:[%s4827_s22 + $0x534] sm:$0xf0] }
  0xc3   : > { %2292 = vmatpush.bf16.msrb.mxu0 %v3741_v46  ;;  %v2022_v40 = vpop.f32.mrf.mxu0  ;;  %v4029_v46 = vor.u32 %v4579_v36, %v4026_v37  ;;  %v4221_v50 = vor.u32 %v4627_v38, %v4218_v39  ;;  %v2048_v4 = vpop.f32.mrf.mxu2  ;;  %v4511_v36 = vld [vmem:[%s4827_s22 + $0x444] sm:$0xf0]  ;;  %v3936_v37 = vld [vmem:[%s4827_s22 + $0x5b0] sm:$0xf] }
  0xc4   : > { %2306 = vmatpush.bf16.msrb.mxu1 %v3933_v48  ;;  %v2023_v43 = vadd.f32 %v2022_v40, %v529_v60  ;;  %v3618_v48 = vld [vmem:[%s4827_s22 + $0x350] sm:$0xf0]  ;;  %v2036_v57 = vpop.f32.mrf.mxu1  ;;  %v3594_v60 = vld [vmem:[%s4827_s22 + $0x320] sm:$0xf0]  ;;  %v2049_v9 = vadd.f32 %v2048_v4, %v2035_v26  ;;  %v4559_v38 = vld [vmem:[%s4827_s22 + $0x5c4] sm:$0xf0] }
  0xc5   : > { %2320 = vmatpush.bf16.msrb.mxu2 %v4125_v49  ;;  %v4525_v49 = vld [vmem:[%s4827_s22 + $0x4bc] sm:$0xf]  ;;  %v3621_v58 = vor.u32 %v4477_v47, %v3618_v48  ;;  %v3336_v47 = vld [vmem:[%s4827_s22 + $0x100] sm:$0xf]  ;;  %v4409_v48 = vld [vmem:[%s4827_s22 + $0x114] sm:$0xf0] }
  0xc6   : > { %2334 = vmatpush.bf16.msrb.mxu3 %v4317_v53  ;;  %v4573_v53 = vld [vmem:[%s4827_s22 + $0x63c] sm:$0xf]  ;;  %v4499_v4 = vld [vmem:[%s4827_s22 + $0x3e4] sm:$0xf0] }
  0xc7   : > { %2293 = vmatpush.bf16.msrb.mxu0 %v3717_v59  ;;  %v4471_v59 = vld [vmem:[%s4827_s22 + $0x30c] sm:$0xf]  ;;  %v4005_v0 = vor.u32 %v4573_v53, %v4002_v54  ;;  %v3720_v53 = vld [vmem:[%s4827_s22 + $0x400] sm:$0xf]  ;;  %v4505_v54 = vld [vmem:[%s4827_s22 + $0x414] sm:$0xf0] }
  0xc8   : > { %2307 = vmatpush.bf16.msrb.mxu1 %v3909_v61  ;;  %v2037_v61 = vadd.f32 %v2036_v57, %v2023_v43  ;;  %v3597_v15 = vor.u32 %v4471_v59, %v3594_v60  ;;  %v4553_v57 = vld [vmem:[%s4827_s22 + $0x594] sm:$0xf0]  ;;  %v3721_v60 = vor.u32 %v4505_v54, %v3720_v53  ;;  %v3432_v53 = vld [vmem:[%s4827_s22 + $0x1c0] sm:$0xf] }
  0xc9   : > { %2321 = vmatpush.bf16.msrb.mxu2 %v4101_v62  ;;  %v3813_v62 = vor.u32 %v4525_v49, %v3810_v51  ;;  %v3528_v49 = vld [vmem:[%s4827_s22 + $0x280] sm:$0xf]  ;;  %v4457_v51 = vld [vmem:[%s4827_s22 + $0x294] sm:$0xf0]  ;;  %v3913_v1 = vor.u32 %v4553_v57, %v3912_v56 }
  0xca   : > { %2335 = vmatpush.bf16.msrb.mxu3 %v4293_v3  ;;  %v4567_v3 = vld [vmem:[%s4827_s22 + $0x60c] sm:$0xf]  ;;  %v3529_v59 = vor.u32 %v4457_v51, %v3528_v49  ;;  %v4385_v51 = vld [vmem:[%s4827_s22 + $0x54] sm:$0xf0] }
  0xcb   : > { %2294 = vmatpush.bf16.msrb.mxu0 %v3693_v10  ;;  %v2062_v10 = vpop.f32.mrf.mxu3  ;;  %v3981_v21 = vor.u32 %v4567_v3, %v3978_v6  ;;  %v2050_v39 = vpop.f32.mrf.mxu2  ;;  %v3696_v3 = vld [vmem:[%s4827_s22 + $0x3d0] sm:$0xf]  ;;  %v4433_v57 = vld [vmem:[%s4827_s22 + $0x1d4] sm:$0xf0] }
  0xcc   : > { %2308 = vmatpush.bf16.msrb.mxu1 %v3885_v13  ;;  %v4421_v13 = vld [vmem:[%s4827_s22 + $0x174] sm:$0xf0]  ;;  %v5279_v19 = vadd.f32 %v2062_v10, %v2049_v9  ;;  %v3888_v6 = vld [vmem:[%s4827_s22 + $0x550] sm:$0xf] }
  0xcd   : > { %2322 = vmatpush.bf16.msrb.mxu2 %v4077_v14  ;;  %v3576_v14 = vld [vmem:[%s4827_s22 + $0x2e0] sm:$0xf] }
  0xce   : > { %2336 = vmatpush.bf16.msrb.mxu3 %v4269_v18  ;;  %v4517_v18 = vld [vmem:[%s4827_s22 + $0x474] sm:$0xf0]  ;;  %v3577_v26 = vor.u32 %v4469_v16, %v3576_v14  ;;  %v3288_v14 = vld [vmem:[%s4827_s22 + $0xa0] sm:$0xf] }
  0xcf   : > { %2295 = vmatpush.bf16.msrb.mxu0 %v3669_v25  ;;  %v3385_v25 = vor.u32 %v4421_v13, %v3384_v11  ;;  %v3697_v13 = vor.u32 %v4499_v4, %v3696_v3  ;;  %v3480_v16 = vld [vmem:[%s4827_s22 + $0x220] sm:$0xf]  ;;  %v3408_v4 = vld [vmem:[%s4827_s22 + $0x190] sm:$0xf] }
  0xd0   : > { %2309 = vmatpush.bf16.msrb.mxu1 %v3861_v27  ;;  %v3769_v27 = vor.u32 %v4517_v18, %v3768_v17  ;;  %v3889_v17 = vor.u32 %v4547_v7, %v3888_v6  ;;  %v3600_v6 = vld [vmem:[%s4827_s22 + $0x310] sm:$0xf] }
  0xd1   : > { %2323 = vmatpush.bf16.msrb.mxu2 %v4053_v30  ;;  %v3360_v30 = vld [vmem:[%s4827_s22 + $0x130] sm:$0xf] }
  0xd2   : > { %2337 = vmatpush.bf16.msrb.mxu3 %v4245_v34  ;;  %v4463_v34 = vld [vmem:[%s4827_s22 + $0x2c4] sm:$0xf0]  ;;  %v3361_v40 = vor.u32 %v4415_v31, %v3360_v30  ;;  %v3264_v30 = vld [vmem:[%s4827_s22 + $0x70] sm:$0xf] }
  0xd3   : > { %2296 = vmatpush.bf16.msrb.mxu0 %v3645_v42  ;;  %v2051_v42 = vadd.f32 %v2050_v39, %v2037_v61  ;;  %v2064_v43 = vpop.f32.mrf.mxu3  ;;  %v3312_v61 = vld [vmem:[%s4827_s22 + $0xd0] sm:$0xf]  ;;  %v4391_v31 = vld [vmem:[%s4827_s22 + $0x84] sm:$0xf0] }
  0xd4   : > { %2310 = vmatpush.bf16.msrb.mxu1 %v3837_v44  ;;  %v3553_v44 = vor.u32 %v4463_v34, %v3552_v32  ;;  %v3456_v32 = vld [vmem:[%s4827_s22 + $0x1f0] sm:$0xf]  ;;  %v4439_v34 = vld [vmem:[%s4827_s22 + $0x204] sm:$0xf0] }
  0xd5   : > { %2324 = vmatpush.bf16.msrb.mxu2 %v4029_v46  ;;  %v3745_v46 = vor.u32 %v4511_v36, %v3744_v35  ;;  %v5298_v55 = vadd.f32 %v2064_v43, %v2051_v42  ;;  %v3648_v35 = vld [vmem:[%s4827_s22 + $0x370] sm:$0xf]  ;;  %v4487_v36 = vld [vmem:[%s4827_s22 + $0x384] sm:$0xf0] }
  0xd6   : > { %2338 = vmatpush.bf16.msrb.mxu3 %v4221_v50  ;;  %v3937_v50 = vor.u32 %v4559_v38, %v3936_v37  ;;  %v3840_v39 = vld [vmem:[%s4827_s22 + $0x4f0] sm:$0xf]  ;;  %v3649_v49 = vor.u32 %v4487_v36, %v3648_v35  ;;  %v4607_v35 = vld [vmem:[%s4827_s22 + $0x744] sm:$0xf0] }
  0xd7   : > { %2297 = vmatpush.bf16.msrb.mxu0 %v3621_v58  ;;  %v3337_v58 = vor.u32 %v4409_v48, %v3336_v47  ;;  %v3457_v48 = vor.u32 %v4439_v34, %v3456_v32  ;;  %v4128_v34 = vld [vmem:[%s4827_s22 + $0x730] sm:$0xf] }
  0xd8   : > { %2311 = vmatpush.bf16.msrb.mxu1 %v3813_v62  ;;  %v4403_v62 = vld [vmem:[%s4827_s22 + $0xe4] sm:$0xf0]  ;;  %v4320_v36 = vld [vmem:[%s4827_s22 + $0x8b0] sm:$0xf] }
  0xd9   : > { %2325 = vmatpush.bf16.msrb.mxu2 %v4005_v0  ;;  %v3504_v0 = vld [vmem:[%s4827_s22 + $0x250] sm:$0xf]  ;;  %v3313_v9 = vor.u32 %v4403_v62, %v3312_v61  ;;  %v4529_v61 = vld [vmem:[%s4827_s22 + $0x4d4] sm:$0xf0] }
  0xda   : > { %2339 = vmatpush.bf16.msrb.mxu3 %v4197_v5  ;;  %v3505_v11 = vor.u32 %v4451_v2, %v3504_v0  ;;  %v3216_v0 = vld [vmem:[%s4827_s22 + $0x10] sm:$0xf]  ;;  %v3433_v2 = vor.u32 %v4433_v57, %v3432_v53  ;;  %v4649_v53 = vld [vmem:[%s4827_s22 + $0x894] sm:$0xf0]  ;;  %v3338_v57 = vld [vmem:[%s4827_s22 + $0x118] sm:$0xf0] }
  0xdb   : > { %2298 = vmatpush.bf16.msrb.mxu0 %v3597_v15  ;;  %v2076_v5 = vpop.f32.mrf.mxu0  ;;  %v4397_v15 = vld [vmem:[%s4827_s22 + $0xb4] sm:$0xf0] }
  0xdc   : > { %2312 = vmatpush.bf16.msrb.mxu1 %v3789_v20  ;;  %v2077_v8 = vadd.f32 %v2076_v5, %v5279_v19  ;;  %v2090_v10 = vpop.f32.mrf.mxu1  ;;  %v4445_v20 = vld [vmem:[%s4827_s22 + $0x234] sm:$0xf0]  ;;  %v3672_v19 = vld [vmem:[%s4827_s22 + $0x3a0] sm:$0xf]  ;;  %v4427_v5 = vld [vmem:[%s4827_s22 + $0x1a4] sm:$0xf0] }
  0xdd   : > { %2326 = vmatpush.bf16.msrb.mxu2 %v3981_v21  ;;  %v4493_v21 = vld [vmem:[%s4827_s22 + $0x3b4] sm:$0xf0] }
  0xde   : > { %2340 = vmatpush.bf16.msrb.mxu3 %v4173_v24  ;;  %2299 = vmatmul.bf16.vlgmr.msrb.gmra.mxu0 %v4955_v28  ;;  %v5317_v18 = vadd.f32 %v2090_v10, %v2077_v8  ;;  %v530_v24 = vperm.slane %v5221_v52, 1  ;;  %v4475_v8 = vld [vmem:[%s4827_s22 + $0x324] sm:$0xf0] }
  0xdf   : > { %2347 = vmatpush.bf16.msra.mxu0 %v3385_v25  ;;  %2313 = vmatmul.bf16.vlgmr.msrb.gmra.mxu1 %v4957_v29  ;;  %v3289_v25 = vor.u32 %v4397_v15, %v3288_v14  ;;  %v4523_v10 = vld [vmem:[%s4827_s22 + $0x4a4] sm:$0xf0]  ;;  %v4613_v14 = vld [vmem:[%s4827_s22 + $0x774] sm:$0xf0]  ;;  %v4344_v15 = vld [vmem:[%s4827_s22 + $0x8e0] sm:$0xf] }
  0xe0   : > { %2361 = vmatpush.bf16.msra.mxu1 %v3577_v26  ;;  %2327 = vmatmul.bf16.vlgmr.msrb.gmra.mxu2 %v5004_v41  ;;  %v3481_v26 = vor.u32 %v4445_v20, %v3480_v16  ;;  %v4661_v20 = vld [vmem:[%s4827_s22 + $0x8f4] sm:$0xf0] }
  0xe1   : > { %2375 = vmatpush.bf16.msra.mxu2 %v3769_v27  ;;  %2341 = vmatmul.bf16.vlgmr.msrb.gmra.mxu3 %v5009_v45  ;;  %v3673_v27 = vor.u32 %v4493_v21, %v3672_v19  ;;  %v4418_v19 = vld [vmem:[%s4827_s22 + $0x164] sm:$0xf]  ;;  %v3386_v21 = vld [vmem:[%s4827_s22 + $0x178] sm:$0xf0]  ;;  %v4345_v32 = vor.u32 %v4661_v20, %v4344_v15  ;;  %v4248_v20 = vld [vmem:[%s4827_s22 + $0x820] sm:$0xf] }
  0xe2   : > { %2389 = vmatpush.bf16.msra.mxu3 %v3961_v33  ;;  %v3865_v33 = vor.u32 %v4541_v23, %v3864_v22  ;;  %v3409_v23 = vor.u32 %v4427_v5, %v3408_v4  ;;  %v4643_v4 = vld [vmem:[%s4827_s22 + $0x864] sm:$0xf0]  ;;  %v4400_v5 = vld [vmem:[%s4827_s22 + $0xd4] sm:$0xf] }
  0xe3   : > { %2348 = vmatpush.bf16.msra.mxu0 %v3361_v40  ;;  %v2104_v37 = vpop.f32.mrf.mxu2  ;;  %v2078_v38 = vpop.f32.mrf.mxu0  ;;  %v4535_v40 = vld [vmem:[%s4827_s22 + $0x504] sm:$0xf0] }
  0xe4   : > { %2362 = vmatpush.bf16.msra.mxu1 %v3553_v44  ;;  %v2105_v42 = vadd.f32 %v2104_v37, %v530_v24  ;;  %v2118_v43 = vpop.f32.mrf.mxu3  ;;  %v2079_v44 = vadd.f32 %v2078_v38, %v5298_v55  ;;  %v2092_v47 = vpop.f32.mrf.mxu1  ;;  %v3841_v56 = vor.u32 %v4535_v40, %v3840_v39  ;;  %v4655_v38 = vld [vmem:[%s4827_s22 + $0x8c4] sm:$0xf0]  ;;  %v4412_v39 = vld [vmem:[%s4827_s22 + $0x134] sm:$0xf]  ;;  %v3362_v40 = vld [vmem:[%s4827_s22 + $0x148] sm:$0xf0] }
  0xe5   : > { %2376 = vmatpush.bf16.msra.mxu2 %v3745_v46  ;;  %v3265_v46 = vor.u32 %v4391_v31, %v3264_v30 }
  0xe6   : > { %2390 = vmatpush.bf16.msra.mxu3 %v3937_v50  ;;  %v3240_v50 = vld [vmem:[%s4827_s22 + $0x40] sm:$0xf]  ;;  %v5337_v54 = vadd.f32 %v2118_v43, %v2105_v42  ;;  %v5339_v55 = vadd.f32 %v2092_v47, %v2079_v44  ;;  %v4460_v42 = vld [vmem:[%s4827_s22 + $0x2b4] sm:$0xf]  ;;  %v3554_v43 = vld [vmem:[%s4827_s22 + $0x2c8] sm:$0xf0]  ;;  %v4129_v44 = vor.u32 %v4607_v35, %v4128_v34  ;;  %v3365_v47 = vor.u32 %v4412_v39, %v3362_v40 }
  0xe7   : > { %2349 = vmatpush.bf16.msra.mxu0 %v3337_v58  ;;  %v3624_v58 = vld [vmem:[%s4827_s22 + $0x340] sm:$0xf]  ;;  %v3241_v62 = vor.u32 %v4385_v51, %v3240_v50  ;;  %v3557_v51 = vor.u32 %v4460_v42, %v3554_v43  ;;  %v4224_v34 = vld [vmem:[%s4827_s22 + $0x7f0] sm:$0xf]  ;;  %v3266_v39 = vld [vmem:[%s4827_s22 + $0x88] sm:$0xf0] }
  0xe8   : > { %2363 = vmatpush.bf16.msra.mxu1 %v3529_v59  ;;  %6134 = vst [vmem:[#allocation6_spill] sm:$0xff] %v5339_v55  ;;  %v4481_v59 = vld [vmem:[%s4827_s22 + $0x354] sm:$0xf0]  ;;  %v4296_v50 = vld [vmem:[%s4827_s22 + $0x880] sm:$0xf] }
  0xe9   : > { %2377 = vmatpush.bf16.msra.mxu2 %v3721_v60  ;;  %v3816_v60 = vld [vmem:[%s4827_s22 + $0x4c0] sm:$0xf]  ;;  %v3625_v3 = vor.u32 %v4481_v59, %v3624_v58  ;;  %v4454_v58 = vld [vmem:[%s4827_s22 + $0x284] sm:$0xf]  ;;  %v3530_v59 = vld [vmem:[%s4827_s22 + $0x298] sm:$0xf0] }
  0xea   : > { %2391 = vmatpush.bf16.msra.mxu3 %v3913_v1  ;;  %v4379_v1 = vld [vmem:[%s4827_s22 + $0x24] sm:$0xf0]  ;;  %v3817_v7 = vor.u32 %v4529_v61, %v3816_v60  ;;  %v4297_v61 = vor.u32 %v4649_v53, %v4296_v50 }
  0xeb   : > { %2350 = vmatpush.bf16.msra.mxu0 %v3313_v9  ;;  %v3792_v9 = vld [vmem:[%s4827_s22 + $0x490] sm:$0xf] }
  0xec   : > { %2364 = vmatpush.bf16.msra.mxu1 %v3505_v11  ;;  %v2106_v11 = vpop.f32.mrf.mxu2  ;;  %v2120_v22 = vpop.f32.mrf.mxu3 }
  0xed   : > { %2378 = vmatpush.bf16.msra.mxu2 %v3697_v13  ;;  %v4152_v13 = vld [vmem:[%s4827_s22 + $0x760] sm:$0xf]  ;;  %v2107_v16 = vadd.f32 %v2106_v11, %v530_v24  ;;  %v3793_v24 = vor.u32 %v4523_v10, %v3792_v9  ;;  %v3506_v9 = vld [vmem:[%s4827_s22 + $0x268] sm:$0xf0] }
  0xee   : > { %2392 = vmatpush.bf16.msra.mxu3 %v3889_v17  ;;  %v3217_v17 = vor.u32 %v4379_v1, %v3216_v0  ;;  %v4153_v31 = vor.u32 %v4613_v14, %v4152_v13  ;;  %v4080_v0 = vld [vmem:[%s4827_s22 + $0x6d0] sm:$0xf]  ;;  %v4595_v1 = vld [vmem:[%s4827_s22 + $0x6e4] sm:$0xf0] }
  0xef   : > { %2351 = vmatpush.bf16.msra.mxu0 %v3289_v25  ;;  %v3601_v25 = vor.u32 %v4475_v8, %v3600_v6  ;;  %v5362_v30 = vadd.f32 %v2120_v22, %v2107_v16  ;;  %v3314_v6 = vld [vmem:[%s4827_s22 + $0xe8] sm:$0xf0]  ;;  %v4448_v8 = vld [vmem:[%s4827_s22 + $0x254] sm:$0xf]  ;;  %v4081_v11 = vor.u32 %v4595_v1, %v4080_v0  ;;  %v4056_v16 = vld [vmem:[%s4827_s22 + $0x6a0] sm:$0xf] }
  0xf0   : > { %2365 = vmatpush.bf16.msra.mxu1 %v3481_v26  ;;  %v4466_v26 = vld [vmem:[%s4827_s22 + $0x2e4] sm:$0xf]  ;;  %v3317_v15 = vor.u32 %v4400_v5, %v3314_v6  ;;  %v4637_v22 = vld [vmem:[%s4827_s22 + $0x834] sm:$0xf0]  ;;  %v3434_v1 = vld [vmem:[%s4827_s22 + $0x1d8] sm:$0xf0] }
  0xf1   : > { %2379 = vmatpush.bf16.msra.mxu2 %v3673_v27  ;;  %v3578_v27 = vld [vmem:[%s4827_s22 + $0x2f8] sm:$0xf0]  ;;  %v4430_v0 = vld [vmem:[%s4827_s22 + $0x1c4] sm:$0xf] }
  0xf2   : > { %2393 = vmatpush.bf16.msra.mxu3 %v3865_v33  ;;  %v3389_v33 = vor.u32 %v4418_v19, %v3386_v21  ;;  %v3581_v37 = vor.u32 %v4466_v26, %v3578_v27  ;;  %v3509_v19 = vor.u32 %v4448_v8, %v3506_v9  ;;  %v3482_v26 = vld [vmem:[%s4827_s22 + $0x238] sm:$0xf0]  ;;  %v4619_v8 = vld [vmem:[%s4827_s22 + $0x7a4] sm:$0xf0]  ;;  %v4376_v9 = vld [vmem:[%s4827_s22 + $0x14] sm:$0xf] }
  0xf3   : > { %2352 = vmatpush.bf16.msra.mxu0 %v3265_v46  ;;  %v4321_v46 = vor.u32 %v4655_v38, %v4320_v36  ;;  %v4388_v38 = vld [vmem:[%s4827_s22 + $0x74] sm:$0xf] }
  0xf4   : > { %2366 = vmatpush.bf16.msra.mxu1 %v3457_v48  ;;  %v4104_v48 = vld [vmem:[%s4827_s22 + $0x700] sm:$0xf]  ;;  %v3269_v53 = vor.u32 %v4388_v38, %v3266_v39  ;;  %v3746_v38 = vld [vmem:[%s4827_s22 + $0x448] sm:$0xf0]  ;;  %v4556_v39 = vld [vmem:[%s4827_s22 + $0x5b4] sm:$0xf] }
  0xf5   : > { %2380 = vmatpush.bf16.msra.mxu2 %v3649_v49  ;;  %v4601_v49 = vld [vmem:[%s4827_s22 + $0x714] sm:$0xf0] }
  0xf6   : > { %2394 = vmatpush.bf16.msra.mxu3 %v3841_v56  ;;  %v4406_v56 = vld [vmem:[%s4827_s22 + $0x104] sm:$0xf]  ;;  %v4105_v60 = vor.u32 %v4601_v49, %v4104_v48 }
  0xf7   : > { %2353 = vmatpush.bf16.msra.mxu0 %v3241_v62  ;;  %v3341_v62 = vor.u32 %v4406_v56, %v3338_v57  ;;  %v4008_v56 = vld [vmem:[%s4827_s22 + $0x640] sm:$0xf]  ;;  %v4577_v57 = vld [vmem:[%s4827_s22 + $0x654] sm:$0xf0] }
  0xf8   : > { %2367 = vmatpush.bf16.msra.mxu1 %v3433_v2  ;;  %v4272_v2 = vld [vmem:[%s4827_s22 + $0x850] sm:$0xf] }
  0xf9   : > { %2381 = vmatpush.bf16.msra.mxu2 %v3625_v3  ;;  %v3533_v3 = vor.u32 %v4454_v58, %v3530_v59  ;;  %v4273_v14 = vor.u32 %v4643_v4, %v4272_v2  ;;  %v4200_v58 = vld [vmem:[%s4827_s22 + $0x7c0] sm:$0xf]  ;;  %v4009_v2 = vor.u32 %v4577_v57, %v4008_v56  ;;  %v4571_v4 = vld [vmem:[%s4827_s22 + $0x624] sm:$0xf0]  ;;  %v3722_v56 = vld [vmem:[%s4827_s22 + $0x418] sm:$0xf0] }
  0xfa   : > { %2395 = vmatpush.bf16.msra.mxu3 %v3817_v7  ;;  %v4550_v57 = vld [vmem:[%s4827_s22 + $0x584] sm:$0xf] }
  0xfb   : > { %2354 = vmatpush.bf16.msra.mxu0 %v3217_v17  ;;  %v2132_v7 = vpop.f32.mrf.mxu0  ;;  %v4589_v17 = vld [vmem:[%s4827_s22 + $0x6b4] sm:$0xf0] }
  0xfc   : > { %2368 = vmatpush.bf16.msra.mxu1 %v3409_v23  ;;  %v2133_v10 = vadd.f32 %v2132_v7, %v5337_v54  ;;  %v2146_v13 = vpop.f32.mrf.mxu1  ;;  %v4394_v23 = vld [vmem:[%s4827_s22 + $0xa4] sm:$0xf]  ;;  %v3290_v54 = vld [vmem:[%s4827_s22 + $0xb8] sm:$0xf0]  ;;  %v4057_v27 = vor.u32 %v4589_v17, %v4056_v16  ;;  %v4176_v7 = vld [vmem:[%s4827_s22 + $0x790] sm:$0xf] }
  0xfd   : > { %2382 = vmatpush.bf16.msra.mxu2 %v3601_v25  ;;  %v4442_v25 = vld [vmem:[%s4827_s22 + $0x224] sm:$0xf] }
  0xfe   : > { %2396 = vmatpush.bf16.msra.mxu3 %v3793_v24  ;;  %2355 = vmatmul.bf16.vlgmr.msra.gmra.mxu0 %v4935_v63  ;;  %v2147_v21 = vadd.f32 %v2146_v13, %v2133_v10  ;;  %v4249_v24 = vor.u32 %v4637_v22, %v4248_v20  ;;  %v3485_v35 = vor.u32 %v4442_v25, %v3482_v26  ;;  %v3218_v13 = vld [vmem:[%s4827_s22 + $0x28] sm:$0xf0]  ;;  %v4514_v20 = vld [vmem:[%s4827_s22 + $0x464] sm:$0xf]  ;;  %v4154_v25 = vld [vmem:[%s4827_s22 + $0x778] sm:$0xf0] }
  0xff   : > { %2403 = vmatpush.bf16.msrb.mxu0 %v4153_v31  ;;  %2369 = vmatmul.bf16.vlgmr.msra.gmra.mxu1 %v4945_v12  ;;  %v3293_v31 = vor.u32 %v4394_v23, %v3290_v54  ;;  %v3437_v10 = vor.u32 %v4430_v0, %v3434_v1  ;;  %v3962_v23 = vld [vmem:[%s4827_s22 + $0x5f8] sm:$0xf0]  ;;  %v4610_v54 = vld [vmem:[%s4827_s22 + $0x764] sm:$0xf]  ;;  %v531_v1 = vperm.slane %v5221_v52, 2 }
 0x100   : > { %2417 = vmatpush.bf16.msrb.mxu1 %v4345_v32  ;;  %2383 = vmatmul.bf16.vlgmr.msra.gmra.mxu2 %v4955_v28  ;;  %v4032_v32 = vld [vmem:[%s4827_s22 + $0x670] sm:$0xf] }
 0x101   : > { %2431 = vmatpush.bf16.msrb.mxu2 %v3389_v33  ;;  %2397 = vmatmul.bf16.vlgmr.msra.gmra.mxu3 %v4957_v29  ;;  %v4583_v33 = vld [vmem:[%s4827_s22 + $0x684] sm:$0xf0] }
 0x102   : > { %2445 = vmatpush.bf16.msrb.mxu3 %v3581_v37  ;;  %v4631_v37 = vld [vmem:[%s4827_s22 + $0x804] sm:$0xf0]  ;;  %v4033_v48 = vor.u32 %v4583_v33, %v4032_v32  ;;  %v4346_v32 = vld [vmem:[%s4827_s22 + $0x8f8] sm:$0xf0] }
 0x103   : > { %2404 = vmatpush.bf16.msrb.mxu0 %v4129_v44  ;;  %v2160_v36 = vpop.f32.mrf.mxu2  ;;  %v2134_v42 = vpop.f32.mrf.mxu0  ;;  %v4436_v44 = vld [vmem:[%s4827_s22 + $0x1f4] sm:$0xf] }
 0x104   : > { %2418 = vmatpush.bf16.msrb.mxu1 %v4321_v46  ;;  %v2161_v40 = vadd.f32 %v2160_v36, %v2147_v21  ;;  %v2174_v43 = vpop.f32.mrf.mxu3  ;;  %v3458_v46 = vld [vmem:[%s4827_s22 + $0x208] sm:$0xf0]  ;;  %v2148_v49 = vpop.f32.mrf.mxu1  ;;  %v4562_v21 = vld [vmem:[%s4827_s22 + $0x5e4] sm:$0xf]  ;;  %v4157_v36 = vor.u32 %v4610_v54, %v4154_v25  ;;  %v4058_v54 = vld [vmem:[%s4827_s22 + $0x6b8] sm:$0xf0] }
 0x105   : > { %2432 = vmatpush.bf16.msrb.mxu2 %v3365_v47  ;;  %v2135_v47 = vadd.f32 %v2134_v42, %v5362_v30  ;;  %v3461_v59 = vor.u32 %v4436_v44, %v3458_v46  ;;  %v3938_v42 = vld [vmem:[%s4827_s22 + $0x5c8] sm:$0xf0]  ;;  %v4652_v46 = vld [vmem:[%s4827_s22 + $0x8b4] sm:$0xf] }
 0x106   : > { %2446 = vmatpush.bf16.msrb.mxu3 %v3557_v51  ;;  %v5410_v50 = vadd.f32 %v2174_v43, %v2161_v40  ;;  %v4225_v51 = vor.u32 %v4631_v37, %v4224_v34  ;;  %v4508_v37 = vld [vmem:[%s4827_s22 + $0x434] sm:$0xf]  ;;  %v4130_v44 = vld [vmem:[%s4827_s22 + $0x748] sm:$0xf0] }
 0x107   : > { %2405 = vmatpush.bf16.msrb.mxu0 %v4105_v60  ;;  %v2149_v30 = vadd.f32 %v2148_v49, %v2135_v47  ;;  %v4625_v60 = vld [vmem:[%s4827_s22 + $0x7d4] sm:$0xf0]  ;;  %v4604_v43 = vld [vmem:[%s4827_s22 + $0x734] sm:$0xf]  ;;  %v4322_v47 = vld [vmem:[%s4827_s22 + $0x8c8] sm:$0xf0]  ;;  %v3941_v49 = vor.u32 %v4556_v39, %v3938_v42 }
 0x108   : > { %2419 = vmatpush.bf16.msrb.mxu1 %v4297_v61  ;;  %v4382_v61 = vld [vmem:[%s4827_s22 + $0x44] sm:$0xf]  ;;  %v4201_v5 = vor.u32 %v4625_v60, %v4200_v58  ;;  %v4325_v58 = vor.u32 %v4652_v46, %v4322_v47  ;;  %v4106_v60 = vld [vmem:[%s4827_s22 + $0x718] sm:$0xf0]  ;;  %v4580_v39 = vld [vmem:[%s4827_s22 + $0x674] sm:$0xf] }
 0x109   : > { %2433 = vmatpush.bf16.msrb.mxu2 %v3341_v62  ;;  %v3242_v62 = vld [vmem:[%s4827_s22 + $0x58] sm:$0xf0] }
 0x10a   : > { %2447 = vmatpush.bf16.msrb.mxu3 %v3533_v3  ;;  %v3984_v3 = vld [vmem:[%s4827_s22 + $0x610] sm:$0xf]  ;;  %v3245_v6 = vor.u32 %v4382_v61, %v3242_v62  ;;  %v4646_v61 = vld [vmem:[%s4827_s22 + $0x884] sm:$0xf]  ;;  %v4298_v62 = vld [vmem:[%s4827_s22 + $0x898] sm:$0xf0] }
 0x10b   : > { %2406 = vmatpush.bf16.msrb.mxu0 %v4081_v11  ;;  %v2162_v11 = vpop.f32.mrf.mxu2  ;;  %v3985_v22 = vor.u32 %v4571_v4, %v3984_v3  ;;  %v4496_v4 = vld [vmem:[%s4827_s22 + $0x3d4] sm:$0xf] }
 0x10c   : > { %2420 = vmatpush.bf16.msrb.mxu1 %v4273_v14  ;;  %v4424_v14 = vld [vmem:[%s4827_s22 + $0x194] sm:$0xf]  ;;  %v2163_v16 = vadd.f32 %v2162_v11, %v2149_v30  ;;  %v2176_v17 = vpop.f32.mrf.mxu3  ;;  %v4598_v30 = vld [vmem:[%s4827_s22 + $0x704] sm:$0xf] }
 0x10d   : > { %2434 = vmatpush.bf16.msrb.mxu2 %v3317_v15  ;;  %v3410_v15 = vld [vmem:[%s4827_s22 + $0x1a8] sm:$0xf0]  ;;  %v4109_v3 = vor.u32 %v4598_v30, %v4106_v60 }
 0x10e   : > { %2448 = vmatpush.bf16.msrb.mxu3 %v3509_v19  ;;  %v3770_v19 = vld [vmem:[%s4827_s22 + $0x478] sm:$0xf0]  ;;  %v5434_v26 = vadd.f32 %v2176_v17, %v2163_v16  ;;  %v3413_v33 = vor.u32 %v4424_v14, %v3410_v15  ;;  %v4490_v17 = vld [vmem:[%s4827_s22 + $0x3a4] sm:$0xf] }
 0x10f   : > { %2407 = vmatpush.bf16.msrb.mxu0 %v4057_v27  ;;  %v4177_v27 = vor.u32 %v4619_v8, %v4176_v7  ;;  %v3773_v34 = vor.u32 %v4514_v20, %v3770_v19  ;;  %v3890_v7 = vld [vmem:[%s4827_s22 + $0x568] sm:$0xf0]  ;;  %v4592_v8 = vld [vmem:[%s4827_s22 + $0x6d4] sm:$0xf]  ;;  %v3674_v20 = vld [vmem:[%s4827_s22 + $0x3b8] sm:$0xf0] }
 0x110   : > { %2421 = vmatpush.bf16.msrb.mxu1 %v4249_v24  ;;  %6135 = vst [vmem:[#allocation7_spill] sm:$0xff] %v5434_v26  ;;  %v3221_v24 = vor.u32 %v4376_v9, %v3218_v13  ;;  %v4082_v9 = vld [vmem:[%s4827_s22 + $0x6e8] sm:$0xf0]  ;;  %v4538_v19 = vld [vmem:[%s4827_s22 + $0x524] sm:$0xf] }
 0x111   : > { %2435 = vmatpush.bf16.msrb.mxu2 %v3293_v31  ;;  %v4658_v31 = vld [vmem:[%s4827_s22 + $0x8e4] sm:$0xf]  ;;  %v4085_v16 = vor.u32 %v4592_v8, %v4082_v9  ;;  %v3602_v8 = vld [vmem:[%s4827_s22 + $0x328] sm:$0xf0]  ;;  %v4520_v9 = vld [vmem:[%s4827_s22 + $0x494] sm:$0xf] }
 0x112   : > { %2449 = vmatpush.bf16.msrb.mxu3 %v3485_v35  ;;  %v3965_v35 = vor.u32 %v4562_v21, %v3962_v23  ;;  %v4349_v40 = vor.u32 %v4658_v31, %v4346_v32  ;;  %v4586_v23 = vld [vmem:[%s4827_s22 + $0x6a4] sm:$0xf]  ;;  %v3677_v31 = vor.u32 %v4490_v17, %v3674_v20 }
 0x113   : > { %2408 = vmatpush.bf16.msrb.mxu0 %v4033_v48  ;;  %v3749_v48 = vor.u32 %v4508_v37, %v3746_v38  ;;  %v3842_v38 = vld [vmem:[%s4827_s22 + $0x508] sm:$0xf0] }
 0x114   : > { %2422 = vmatpush.bf16.msrb.mxu1 %v4225_v51  ;;  %v4133_v51 = vor.u32 %v4604_v43, %v4130_v44  ;;  %v4628_v43 = vld [vmem:[%s4827_s22 + $0x7f4] sm:$0xf]  ;;  %v4226_v44 = vld [vmem:[%s4827_s22 + $0x808] sm:$0xf0] }
 0x115   : > { %2436 = vmatpush.bf16.msrb.mxu2 %v3269_v53  ;;  %v4502_v53 = vld [vmem:[%s4827_s22 + $0x404] sm:$0xf] }
 0x116   : > { %2450 = vmatpush.bf16.msrb.mxu3 %v3461_v59  ;;  %v3914_v59 = vld [vmem:[%s4827_s22 + $0x598] sm:$0xf0]  ;;  %v3725_v0 = vor.u32 %v4502_v53, %v3722_v56 }
 0x117   : > { %2409 = vmatpush.bf16.msrb.mxu0 %v4009_v2  ;;  %v3917_v2 = vor.u32 %v4550_v57, %v3914_v59  ;;  %v4478_v57 = vld [vmem:[%s4827_s22 + $0x344] sm:$0xf] }
 0x118   : > { %2423 = vmatpush.bf16.msrb.mxu1 %v4201_v5  ;;  %v3698_v5 = vld [vmem:[%s4827_s22 + $0x3e8] sm:$0xf0]  ;;  %v4526_v59 = vld [vmem:[%s4827_s22 + $0x4c4] sm:$0xf] }
 0x119   : > { %2437 = vmatpush.bf16.msrb.mxu2 %v3245_v6  ;;  %v4301_v6 = vor.u32 %v4646_v61, %v4298_v62  ;;  %v3701_v11 = vor.u32 %v4496_v4, %v3698_v5  ;;  %v4229_v61 = vor.u32 %v4628_v43, %v4226_v44  ;;  %v3818_v62 = vld [vmem:[%s4827_s22 + $0x4d8] sm:$0xf0] }
 0x11a   : > { %2451 = vmatpush.bf16.msrb.mxu3 %v3437_v10  ;;  %v4640_v10 = vld [vmem:[%s4827_s22 + $0x854] sm:$0xf]  ;;  %v4202_v4 = vld [vmem:[%s4827_s22 + $0x7d8] sm:$0xf0] }
 0x11b   : > { %2410 = vmatpush.bf16.msrb.mxu0 %v3985_v22  ;;  %v2188_v52 = vpop.f32.mrf.mxu0  ;;  %v3866_v22 = vld [vmem:[%s4827_s22 + $0x538] sm:$0xf0] }
 0x11c   : > { %2424 = vmatpush.bf16.msrb.mxu1 %v4177_v27  ;;  %v2189_v13 = vadd.f32 %v2188_v52, %v531_v1  ;;  %v2202_v14 = vpop.f32.mrf.mxu1  ;;  %v4634_v27 = vld [vmem:[%s4827_s22 + $0x824] sm:$0xf]  ;;  %v3869_v32 = vor.u32 %v4538_v19, %v3866_v22  ;;  %v4568_v52 = vld [vmem:[%s4827_s22 + $0x614] sm:$0xf] }
 0x11d   : > { %2438 = vmatpush.bf16.msrb.mxu2 %v3221_v24  ;;  %v4250_v24 = vld [vmem:[%s4827_s22 + $0x838] sm:$0xf0] }
 0x11e   : > { %2452 = vmatpush.bf16.msrb.mxu3 %v3413_v33  ;;  %2411 = vmatmul.bf16.vlgmr.msrb.gmra.mxu0 %v5004_v41  ;;  %v2203_v25 = vadd.f32 %v2202_v14, %v2189_v13  ;;  %v4061_v33 = vor.u32 %v4586_v23, %v4058_v54  ;;  %v4253_v37 = vor.u32 %v4634_v27, %v4250_v24  ;;  %v4616_v14 = vld [vmem:[%s4827_s22 + $0x794] sm:$0xf] }
 0x11f   : > { %2459 = vmatpush.bf16.msra.mxu0 %v3773_v34  ;;  %2425 = vmatmul.bf16.vlgmr.msrb.gmra.mxu1 %v5009_v45  ;;  %v4484_v34 = vld [vmem:[%s4827_s22 + $0x374] sm:$0xf] }
 0x120   : > { %2473 = vmatpush.bf16.msra.mxu1 %v3965_v35  ;;  %2439 = vmatmul.bf16.vlgmr.msrb.gmra.mxu2 %v4935_v63  ;;  %v4544_v63 = vld [vmem:[%s4827_s22 + $0x554] sm:$0xf]  ;;  %v3650_v35 = vld [vmem:[%s4827_s22 + $0x388] sm:$0xf0] }
 0x121   : > { %2487 = vmatpush.bf16.msra.mxu2 %v4157_v36  ;;  %2453 = vmatmul.bf16.vlgmr.msrb.gmra.mxu3 %v4945_v12  ;;  %v4274_v12 = vld [vmem:[%s4827_s22 + $0x868] sm:$0xf0]  ;;  %v3893_v15 = vor.u32 %v4544_v63, %v3890_v7  ;;  %v4532_v36 = vld [vmem:[%s4827_s22 + $0x4f4] sm:$0xf]  ;;  %v3821_v63 = vor.u32 %v4526_v59, %v3818_v62 }
 0x122   : > { %2501 = vmatpush.bf16.msra.mxu3 %v4349_v40  ;;  %v4277_v21 = vor.u32 %v4640_v10, %v4274_v12  ;;  %v4034_v40 = vld [vmem:[%s4827_s22 + $0x688] sm:$0xf0]  ;;  %v3845_v53 = vor.u32 %v4532_v36, %v3842_v38  ;;  %v4472_v7 = vld [vmem:[%s4827_s22 + $0x314] sm:$0xf] }
 0x123   : > { %2460 = vmatpush.bf16.msra.mxu0 %v3749_v48  ;;  %v2216_v42 = vpop.f32.mrf.mxu2  ;;  %v2190_v46 = vpop.f32.mrf.mxu0  ;;  %v4037_v56 = vor.u32 %v4580_v39, %v4034_v40  ;;  %v3794_v12 = vld [vmem:[%s4827_s22 + $0x4a8] sm:$0xf0]  ;;  %v3605_v20 = vor.u32 %v4472_v7, %v3602_v8 }
 0x124   : > { %2474 = vmatpush.bf16.msra.mxu1 %v3941_v49  ;;  %v2217_v47 = vadd.f32 %v2216_v42, %v2203_v25  ;;  %v2230_v48 = vpop.f32.mrf.mxu3  ;;  %v3653_v49 = vor.u32 %v4484_v34, %v3650_v35  ;;  %v2204_v30 = vpop.f32.mrf.mxu1  ;;  %v3797_v19 = vor.u32 %v4520_v9, %v3794_v12 }
 0x125   : > { %2488 = vmatpush.bf16.msra.mxu2 %v4133_v51  ;;  %v2191_v51 = vadd.f32 %v2190_v46, %v531_v1  ;;  %v4010_v1 = vld [vmem:[%s4827_s22 + $0x658] sm:$0xf0] }
 0x126   : > { %2502 = vmatpush.bf16.msra.mxu3 %v4325_v58  ;;  %v3626_v58 = vld [vmem:[%s4827_s22 + $0x358] sm:$0xf0]  ;;  %v2231_v60 = vadd.f32 %v2230_v48, %v2217_v47 }
 0x127   : > { %2461 = vmatpush.bf16.msra.mxu0 %v3725_v0  ;;  %v4574_v0 = vld [vmem:[%s4827_s22 + $0x644] sm:$0xf]  ;;  %v3629_v5 = vor.u32 %v4478_v57, %v3626_v58 }
 0x128   : > { %2475 = vmatpush.bf16.msra.mxu1 %v3917_v2  ;;  %v2205_v2 = vadd.f32 %v2204_v30, %v2191_v51 }
 0x129   : > { %2489 = vmatpush.bf16.msra.mxu2 %v4109_v3  ;;  %v4622_v3 = vld [vmem:[%s4827_s22 + $0x7c4] sm:$0xf] }
 0x12a   : > { %2503 = vmatpush.bf16.msra.mxu3 %v4301_v6  ;;  %v4013_v6 = vor.u32 %v4574_v0, %v4010_v1  ;;  %v4205_v10 = vor.u32 %v4622_v3, %v4202_v4 }
 0x12b   : > { %2462 = vmatpush.bf16.msra.mxu0 %v3701_v11  ;;  %v3986_v11 = vld [vmem:[%s4827_s22 + $0x628] sm:$0xf0]  ;;  %v2218_v13 = vpop.f32.mrf.mxu2 }
 0x12c   : > { %2476 = vmatpush.bf16.msra.mxu1 %v3893_v15  ;;  %v4178_v15 = vld [vmem:[%s4827_s22 + $0x7a8] sm:$0xf0]  ;;  %v2232_v17 = vpop.f32.mrf.mxu3 }
 0x12d   : > { %2490 = vmatpush.bf16.msra.mxu2 %v4085_v16  ;;  %v2219_v16 = vadd.f32 %v2218_v13, %v2205_v2  ;;  %v4181_v23 = vor.u32 %v4616_v14, %v4178_v15 }
 0x12e   : > { %2504 = vmatpush.bf16.msra.mxu3 %v4277_v21  ;;  %v3989_v21 = vor.u32 %v4568_v52, %v3986_v11 }
 0x12f   : > { %2463 = vmatpush.bf16.msra.mxu0 %v3677_v31  ;;  %v2233_v22 = vadd.f32 %v2232_v17, %v2219_v16  ;;  %v5506_v31 = vld [vmem:[%s4832_s25] sm:$0x3f] }
 0x130   : > { %2477 = vmatpush.bf16.msra.mxu1 %v3869_v32  ;;  %v532_v32 = vperm.slane %v5506_v31, 3  ;;  %v533_v0 = vperm.slane %v5506_v31, 4 }
 0x131   : > { %2491 = vmatpush.bf16.msra.mxu2 %v4061_v33 }
 0x132   : > { %2505 = vmatpush.bf16.msra.mxu3 %v4253_v37 }
 0x133   : > { %2464 = vmatpush.bf16.msra.mxu0 %v3653_v49 }
 0x134   : > { %2478 = vmatpush.bf16.msra.mxu1 %v3845_v53 }
 0x135   : > { %2492 = vmatpush.bf16.msra.mxu2 %v4037_v56 }
 0x136   : > { %2506 = vmatpush.bf16.msra.mxu3 %v4229_v61 }
 0x137   : > { %2465 = vmatpush.bf16.msra.mxu0 %v3629_v5 }
 0x138   : > { %2479 = vmatpush.bf16.msra.mxu1 %v3821_v63 }
 0x139   : > { %2493 = vmatpush.bf16.msra.mxu2 %v4013_v6 }
 0x13a   : > { %2507 = vmatpush.bf16.msra.mxu3 %v4205_v10 }
 0x13b   : > { %2466 = vmatpush.bf16.msra.mxu0 %v3605_v20  ;;  %v2244_v54 = vpop.f32.mrf.mxu0 }
 0x13c   : > { %2480 = vmatpush.bf16.msra.mxu1 %v3797_v19  ;;  %v2245_v25 = vadd.f32 %v2244_v54, %v2231_v60  ;;  %v2258_v27 = vpop.f32.mrf.mxu1 }
 0x13d   : > { %2494 = vmatpush.bf16.msra.mxu2 %v3989_v21 }
 0x13e   : > { %2508 = vmatpush.bf16.msra.mxu3 %v4181_v23  ;;  %2467 = vmatmul.bf16.vlgmr.msra.gmra.mxu0 %v4955_v28  ;;  %v5503_v24 = vadd.f32 %v2258_v27, %v2245_v25  ;;  %v534_v25 = vperm.slane %v5506_v31, 5 }
 0x13f   : > { %2481 = vmatmul.bf16.vlgmr.msra.gmra.mxu1 %v4957_v29 }
 0x140   : > { %2495 = vmatmul.bf16.vlgmr.msra.gmra.mxu2 %v5004_v41 }
 0x141   : > { %2509 = vmatmul.bf16.vlgmr.msra.gmra.mxu3 %v5009_v45 }
 0x143   : > { %v2272_v33 = vpop.f32.mrf.mxu2  ;;  %v2246_v34 = vpop.f32.mrf.mxu0 }
 0x144   : > { %v2273_v35 = vadd.f32 %v2272_v33, %v532_v32  ;;  %v2247_v36 = vadd.f32 %v2246_v34, %v2233_v22  ;;  %v2260_v28 = vpop.f32.mrf.mxu1  ;;  %v2286_v37 = vpop.f32.mrf.mxu3 }
 0x146   : > { %v2287_v29 = vadd.f32 %v2286_v37, %v2273_v35  ;;  %v5509_v38 = vadd.f32 %v2260_v28, %v2247_v36 }
 0x148   : > { %6136 = vst [vmem:[#allocation8_spill] sm:$0xff] %v5509_v38 }
 0x14b   : > { %v2274_v41 = vpop.f32.mrf.mxu2 }
 0x14c   : > { %v2288_v45 = vpop.f32.mrf.mxu3  ;;  %v2275_v43 = vadd.f32 %v2274_v41, %v532_v32 }
 0x14e   : > { %v2289_v46 = vadd.f32 %v2288_v45, %v2275_v43 }
 0x15b   : > { %v2300_v39 = vpop.f32.mrf.mxu0 }
 0x15c   : > { %v2301_v40 = vadd.f32 %v2300_v39, %v2287_v29  ;;  %v2314_v42 = vpop.f32.mrf.mxu1 }
 0x15e   : > { %v2315_v44 = vadd.f32 %v2314_v42, %v2301_v40 }
 0x163   : > { %v2328_v47 = vpop.f32.mrf.mxu2  ;;  %v2302_v49 = vpop.f32.mrf.mxu0 }
 0x164   : > { %v2329_v48 = vadd.f32 %v2328_v47, %v2315_v44  ;;  %v2342_v51 = vpop.f32.mrf.mxu3  ;;  %v2303_v53 = vadd.f32 %v2302_v49, %v2289_v46  ;;  %v2316_v57 = vpop.f32.mrf.mxu1 }
 0x166   : > { %v5511_v56 = vadd.f32 %v2342_v51, %v2329_v48  ;;  %v2317_v58 = vadd.f32 %v2316_v57, %v2303_v53 }
 0x168   : > { %6137 = vst [vmem:[#allocation9_spill] sm:$0xff] %v5511_v56 }
 0x16b   : > { %v2330_v59 = vpop.f32.mrf.mxu2 }
 0x16c   : > { %v2331_v30 = vadd.f32 %v2330_v59, %v2317_v58  ;;  %v2344_v60 = vpop.f32.mrf.mxu3 }
 0x16e   : > { %v5513_v61 = vadd.f32 %v2344_v60, %v2331_v30 }
 0x170   : > { %6138 = vst [vmem:[#allocation10_spill] sm:$0xff] %v5513_v61 }
 0x17b   : > { %v2356_v62 = vpop.f32.mrf.mxu0 }
 0x17c   : > { %v2370_v1 = vpop.f32.mrf.mxu1  ;;  %v2357_v2 = vadd.f32 %v2356_v62, %v533_v0 }
 0x17e   : > { %v2371_v4 = vadd.f32 %v2370_v1, %v2357_v2 }
 0x183   : > { %v2384_v3 = vpop.f32.mrf.mxu2  ;;  %v2358_v5 = vpop.f32.mrf.mxu0 }
 0x184   : > { %v2372_v63 = vpop.f32.mrf.mxu1  ;;  %v2398_v6 = vpop.f32.mrf.mxu3  ;;  %v2359_v7 = vadd.f32 %v2358_v5, %v533_v0  ;;  %v2385_v8 = vadd.f32 %v2384_v3, %v2371_v4 }
 0x186   : > { %v2373_v9 = vadd.f32 %v2372_v63, %v2359_v7  ;;  %v2399_v10 = vadd.f32 %v2398_v6, %v2385_v8 }
 0x18b   : > { %v2386_v12 = vpop.f32.mrf.mxu2 }
 0x18c   : > { %v2387_v14 = vadd.f32 %v2386_v12, %v2373_v9  ;;  %v2400_v15 = vpop.f32.mrf.mxu3 }
 0x18e   : > { %v2401_v17 = vadd.f32 %v2400_v15, %v2387_v14 }
 0x19b   : > { %v2412_v52 = vpop.f32.mrf.mxu0 }
 0x19c   : > { %v2413_v11 = vadd.f32 %v2412_v52, %v2399_v10  ;;  %v2426_v13 = vpop.f32.mrf.mxu1 }
 0x19e   : > { %v5516_v16 = vadd.f32 %v2426_v13, %v2413_v11 }
 0x1a0   : > { %6139 = vst [vmem:[#allocation11_spill] sm:$0xff] %v5516_v16 }
 0x1a3   : > { %v2414_v20 = vpop.f32.mrf.mxu0  ;;  %v2440_v23 = vpop.f32.mrf.mxu2 }
 0x1a4   : > { %v2415_v19 = vadd.f32 %v2414_v20, %v2401_v17  ;;  %v2428_v21 = vpop.f32.mrf.mxu1  ;;  %v2454_v54 = vpop.f32.mrf.mxu3  ;;  %v2441_v27 = vadd.f32 %v2440_v23, %v534_v25 }
 0x1a6   : > { %v5518_v22 = vadd.f32 %v2428_v21, %v2415_v19  ;;  %v2455_v33 = vadd.f32 %v2454_v54, %v2441_v27 }
 0x1ab   : > { %v2442_v32 = vpop.f32.mrf.mxu2 }
 0x1ac   : > { %v2456_v34 = vpop.f32.mrf.mxu3  ;;  %v2443_v37 = vadd.f32 %v2442_v32, %v534_v25 }
 0x1ae   : > { %v2457_v45 = vadd.f32 %v2456_v34, %v2443_v37 }
 0x1bb   : > { %v2468_v35 = vpop.f32.mrf.mxu0 }
 0x1bc   : > { %v2469_v36 = vadd.f32 %v2468_v35, %v2455_v33  ;;  %v2482_v28 = vpop.f32.mrf.mxu1 }
 0x1be   : > { %v2483_v29 = vadd.f32 %v2482_v28, %v2469_v36 }
 0x1c3   : > { %v2496_v41 = vpop.f32.mrf.mxu2  ;;  %v2470_v42 = vpop.f32.mrf.mxu0 }
 0x1c4   : > { %v2497_v39 = vadd.f32 %v2496_v41, %v2483_v29  ;;  %v2510_v40 = vpop.f32.mrf.mxu3  ;;  %v2471_v44 = vadd.f32 %v2470_v42, %v2457_v45  ;;  %v2484_v46 = vpop.f32.mrf.mxu1 }
 0x1c6   : > { %v5521_v43 = vadd.f32 %v2510_v40, %v2497_v39  ;;  %v2485_v47 = vadd.f32 %v2484_v46, %v2471_v44 }
 0x1c8   : > { %6140 = vst [vmem:[#allocation12_spill] sm:$0xff] %v5521_v43 }
 0x1ca   : > { %2518 = sbr.rel (%p4350_p6) target bundleno = 609 (0x261), region = 40 }
 0x1cb   : > { %v2498_v31 = vpop.f32.mrf.mxu2 }
 0x1cc   : > { %v2499_v48 = vadd.f32 %v2498_v31, %v2485_v47  ;;  %v2512_v49 = vpop.f32.mrf.mxu3 }
 0x1ce   : > { %v5523_v51 = vadd.f32 %v2512_v49, %v2499_v48 }
 0x1cf   : > { %v5527_v53 = vmul.f32 0.70710677, %v5317_v18  ;;  %v5530_v57 = vmul.f32 0.70710677, %v5410_v50  ;;  %v5533_v58 = vmul.f32 0.70710677, %v5503_v24 }
 0x1d0   : > { %v5536_v59 = vmul.f32 0.70710677, %v5511_v56  ;;  %v5551_v3 = vmul.f32 0.5, %v5317_v18  ;;  %v5558_v6 = vmul.f32 0.5, %v5410_v50 }
 0x1d1   : > { %v2543_v30 = vmul.f32 %v5527_v53, %v5527_v53  ;;  %v2583_v60 = vmul.f32 %v5530_v57, %v5530_v57  ;;  %v2623_v0 = vmul.f32 %v5533_v58, %v5533_v58 }
 0x1d2   : > { %v2663_v1 = vmul.f32 %v5536_v59, %v5536_v59 }
 0x1d3   : > { %v5542_v62 = vmin.f32 %v2543_v30, 16.0  ;;  %v5548_v2 = vmin.f32 %v2583_v60, 16.0  ;;  %v5555_v63 = vmin.f32 %v2623_v0, 16.0 }
 0x1d4   : > { %v5562_v9 = vmin.f32 %v2663_v1, 16.0 }
 0x1d5   : > { %v2545_v4 = vmul.f32 2.1237322e-06, %v5542_v62  ;;  %v2556_v5 = vmul.f32 3.8918573e-05, %v5542_v62  ;;  %v2585_v7 = vmul.f32 2.1237322e-06, %v5548_v2 }
 0x1d6   : > { %v2596_v8 = vmul.f32 3.8918573e-05, %v5548_v2  ;;  %v2625_v52 = vmul.f32 2.1237322e-06, %v5555_v63  ;;  %v2636_v14 = vmul.f32 3.8918573e-05, %v5555_v63 }
 0x1d7   : > { %v2546_v10 = vadd.f32 0.00028619796, %v2545_v4  ;;  %v2557_v12 = vadd.f32 0.001143296, %v2556_v5  ;;  %v2586_v11 = vadd.f32 0.00028619796, %v2585_v7 }
 0x1d8   : > { %v2597_v13 = vadd.f32 0.001143296, %v2596_v8  ;;  %v2626_v20 = vadd.f32 0.00028619796, %v2625_v52  ;;  %v2665_v19 = vmul.f32 2.1237322e-06, %v5562_v9 }
 0x1d9   : > { %v2547_v15 = vmul.f32 %v2546_v10, %v5542_v62  ;;  %v2558_v17 = vmul.f32 %v2557_v12, %v5542_v62  ;;  %v2587_v21 = vmul.f32 %v2586_v11, %v5548_v2  ;;  %v2637_v54 = vadd.f32 0.001143296, %v2636_v14 }
 0x1da   : > { %v2598_v23 = vmul.f32 %v2597_v13, %v5548_v2  ;;  %v2676_v25 = vmul.f32 3.8918573e-05, %v5562_v9  ;;  %v2627_v33 = vmul.f32 %v2626_v20, %v5555_v63  ;;  %v2666_v34 = vadd.f32 0.00028619796, %v2665_v19 }
 0x1db   : > { %v2548_v27 = vadd.f32 0.0036580483, %v2547_v15  ;;  %v2559_v32 = vadd.f32 0.014752088, %v2558_v17  ;;  %v2588_v35 = vadd.f32 0.0036580483, %v2587_v21  ;;  %v2638_v28 = vmul.f32 %v2637_v54, %v5555_v63 }
 0x1dc   : > { %v2599_v36 = vadd.f32 0.014752088, %v2598_v23  ;;  %v2677_v37 = vadd.f32 0.001143296, %v2676_v25  ;;  %v2628_v45 = vadd.f32 0.0036580483, %v2627_v33  ;;  %v2667_v39 = vmul.f32 %v2666_v34, %v5562_v9 }
 0x1dd   : > { %v2549_v29 = vmul.f32 %v2548_v27, %v5542_v62  ;;  %v2560_v41 = vmul.f32 %v2559_v32, %v5542_v62  ;;  %v2589_v40 = vmul.f32 %v2588_v35, %v5548_v2  ;;  %v2639_v44 = vadd.f32 0.014752088, %v2638_v28 }
 0x1de   : > { %v2600_v42 = vmul.f32 %v2599_v36, %v5548_v2  ;;  %v2678_v46 = vmul.f32 %v2677_v37, %v5562_v9  ;;  %v2629_v48 = vmul.f32 %v2628_v45, %v5555_v63  ;;  %v2668_v49 = vadd.f32 0.0036580483, %v2667_v39 }
 0x1df   : > { %v2550_v47 = vadd.f32 0.05243302, %v2549_v29  ;;  %v2561_v31 = vadd.f32 0.112945676, %v2560_v41  ;;  %v2590_v30 = vadd.f32 0.05243302, %v2589_v40  ;;  %v2640_v0 = vmul.f32 %v2639_v44, %v5555_v63 }
 0x1e0   : > { %v2601_v60 = vadd.f32 0.112945676, %v2600_v42  ;;  %v2679_v1 = vadd.f32 0.014752088, %v2678_v46  ;;  %v5583_v4 = vmul.f32 0.5, %v5503_v24  ;;  %v5586_v5 = vmul.f32 0.5, %v5511_v56 }
 0x1e1   : > { %v2551_v7 = vmul.f32 %v2550_v47, %v5542_v62  ;;  %v2562_v8 = vmul.f32 %v2561_v31, %v5542_v62  ;;  %v2630_v12 = vadd.f32 0.05243302, %v2629_v48  ;;  %v2641_v52 = vadd.f32 0.112945676, %v2640_v0 }
 0x1e2   : > { %v2602_v10 = vmul.f32 %v2601_v60, %v5548_v2  ;;  %v2680_v11 = vmul.f32 %v2679_v1, %v5562_v9  ;;  %v5593_v13 = vmul.f32 0.5, %v5516_v16  ;;  %v5596_v14 = vmul.f32 0.70710677, %v5516_v16 }
 0x1e3   : > { %v2563_v15 = vadd.f32 0.4994258, %v2562_v8  ;;  %v2591_v17 = vmul.f32 %v2590_v30, %v5548_v2  ;;  %v2642_v19 = vmul.f32 %v2641_v52, %v5555_v63  ;;  %v2669_v21 = vmul.f32 %v2668_v49, %v5562_v9 }
 0x1e4   : > { %v2603_v20 = vadd.f32 0.4994258, %v2602_v10  ;;  %v2681_v23 = vadd.f32 0.112945676, %v2680_v11  ;;  %v5602_v54 = vmul.f32 0.5, %v5521_v43  ;;  %v5605_v25 = vmul.f32 0.5, %v5339_v55 }
 0x1e5   : > { %v2552_v27 = vadd.f32 0.18741608, %v2551_v7  ;;  %v2564_v32 = vmul.f32 %v2563_v15, %v5542_v62  ;;  %v2631_v34 = vmul.f32 %v2630_v12, %v5555_v63  ;;  %v2643_v35 = vadd.f32 0.4994258, %v2642_v19 }
 0x1e6   : > { %v2604_v33 = vmul.f32 %v2603_v20, %v5548_v2  ;;  %v2682_v36 = vmul.f32 %v2681_v23, %v5562_v9  ;;  %v5612_v28 = vmul.f32 0.70710677, %v5521_v43  ;;  %v2592_v29 = vadd.f32 0.18741608, %v2591_v17 }
 0x1e7   : > { %v5614_v37 = vadd.f32 1.0, %v2564_v32  ;;  %v2703_v41 = vmul.f32 %v5596_v14, %v5596_v14  ;;  %v2644_v39 = vmul.f32 %v2643_v35, %v5555_v63  ;;  %v2670_v40 = vadd.f32 0.05243302, %v2669_v21 }
 0x1e8   : > { %v5618_v45 = vadd.f32 1.0, %v2604_v33  ;;  %v2683_v42 = vadd.f32 0.4994258, %v2682_v36  ;;  %v5622_v44 = vmul.f32 0.5, %v5434_v26  ;;  %v5625_v46 = vmul.f32 0.5, %v5509_v38 }
 0x1e9   : > { %v2553_v47 = vmul.f32 %v2552_v27, %v5542_v62  ;;  %4698 = vrcp.f32 %v5614_v37  ;;  %v5630_v31 = vmul.f32 0.5, %v5513_v61  ;;  %v5633_v48 = vmul.f32 0.70710677, %v5339_v55 }
 0x1ea   : > { %4700 = vrcp.f32 %v5618_v45  ;;  %v2632_v49 = vadd.f32 0.18741608, %v2631_v34  ;;  %v5637_v30 = vmul.f32 0.70710677, %v5434_v26  ;;  %v2593_v60 = vmul.f32 %v2592_v29, %v5548_v2 }
 0x1eb   : > { %v5640_v0 = vmin.f32 %v2703_v41, 16.0  ;;  %v2743_v62 = vmul.f32 %v5612_v28, %v5612_v28  ;;  %v5645_v1 = vmul.f32 0.70710677, %v5509_v38  ;;  %v5647_v7 = vadd.f32 1.0, %v2644_v39 }
 0x1ec   : > { %v2671_v8 = vmul.f32 %v2670_v40, %v5562_v9  ;;  %v2684_v10 = vmul.f32 %v2683_v42, %v5562_v9  ;;  %v5652_v12 = vmul.f32 0.70710677, %v5513_v61  ;;  %v2554_v52 = vadd.f32 1.1283791, %v2553_v47 }
 0x1ed   : > { %v2705_v2 = vmul.f32 2.1237322e-06, %v5640_v0  ;;  %v5656_v11 = vmul.f32 0.70710677, %v5518_v22  ;;  %v5659_v15 = vmul.f32 0.70710677, %v5523_v51  ;;  %v2633_v17 = vmul.f32 %v2632_v49, %v5555_v63 }
 0x1ee   : > { %4702 = vrcp.f32 %v5647_v7  ;;  %v2594_v19 = vadd.f32 1.1283791, %v2593_v60  ;;  %v5665_v21 = vadd.f32 1.0, %v2684_v10  ;;  %v5667_v27 = vmin.f32 %v2743_v62, 16.0 }
 0x1ef   : > { %v5663_v20 = vpop.eup %4698  ;;  %v2706_v23 = vadd.f32 0.00028619796, %v2705_v2  ;;  %v2577_v34 = vand.u32 2147483648, %v5614_v37  ;;  %v2672_v35 = vadd.f32 0.18741608, %v2671_v8  ;;  %v2783_v63 = vmul.f32 %v5633_v48, %v5633_v48 }
 0x1f0   : > { %v5669_v32 = vpop.eup %4700  ;;  %v2567_v33 = vmul.f32 %v5663_v20, %v5614_v37  ;;  %v5677_v36 = vmul.f32 %v2554_v52, %v5527_v53  ;;  %vm2571_vm0 = vweird.f32 %v5614_v37  ;;  %4704 = vrcp.f32 %v5665_v21 }
 0x1f1   : > { %v2607_v29 = vmul.f32 %v5669_v32, %v5618_v45  ;;  %v2575_v39 = vand.u32 2147483647, %v5614_v37  ;;  %v2617_v40 = vand.u32 2147483648, %v5618_v45  ;;  %v2634_v42 = vadd.f32 1.1283791, %v2633_v17 }
 0x1f2   : > { %v2568_v41 = vsub.f32 1.0, %v2567_v33  ;;  %v5686_v47 = vmul.f32 %v2594_v19, %v5530_v57  ;;  %v2707_v49 = vmul.f32 %v2706_v23, %v5640_v0  ;;  %v2716_v53 = vmul.f32 3.8918573e-05, %v5640_v0 }
 0x1f3   : > { %v2745_v60 = vmul.f32 2.1237322e-06, %v5667_v27  ;;  %v5693_v8 = vor.u32 1.1754944e-38, %v2577_v34  ;;  %vm2611_vm1 = vweird.f32 %v5618_v45  ;;  %v2615_v10 = vand.u32 2147483647, %v5618_v45 }
 0x1f4   : > { %v5691_v62 = vpop.eup %4702  ;;  %v2756_v52 = vmul.f32 3.8918573e-05, %v5667_v27  ;;  %v2608_v2 = vsub.f32 1.0, %v2607_v29  ;;  %v2673_v17 = vmul.f32 %v2672_v35, %v5562_v9  ;;  %v2708_v19 = vadd.f32 0.0036580483, %v2707_v49 }
 0x1f5   : > { %v2647_v57 = vmul.f32 %v5691_v62, %v5647_v7  ;;  %v2569_v23 = vmul.f32 %v5663_v20, %v2568_v41  ;;  %v5702_v33 = vor.u32 1.1754944e-38, %v2617_v40  ;;  %v5705_v34 = vmul.f32 %v2634_v42, %v5533_v58 }
 0x1f6   : > { %v2717_v61 = vadd.f32 0.001143296, %v2716_v53  ;;  %v5707_v38 = vpop.eup %4704  ;;  %vm5709_vm2 = vcmp.eq.f32.partialorder %v2575_v39, 8.507059e+37  ;;  %v2655_v55 = vand.u32 2147483647, %v5647_v7  ;;  %v2709_v9 = vmul.f32 %v2708_v19, %v5640_v0 }
 0x1f7   : > { %v2648_v29 = vsub.f32 1.0, %v2647_v57  ;;  %v2746_v35 = vadd.f32 0.00028619796, %v2745_v60  ;;  %vm2651_vm3 = vweird.f32 %v5647_v7  ;;  %v2657_v41 = vand.u32 2147483648, %v5647_v7 }
 0x1f8   : > { %v2718_v58 = vmul.f32 %v2717_v61, %v5640_v0  ;;  %v2757_v40 = vadd.f32 0.001143296, %v2756_v52  ;;  %vm2572_vm4 = vweird.f32 %v5663_v20  ;;  %v2609_v39 = vmul.f32 %v5669_v32, %v2608_v2 }
 0x1f9   : > { %vm5720_vm5 = vcmp.eq.f32.partialorder %v2615_v10, 8.507059e+37  ;;  %v2687_v49 = vmul.f32 %v5707_v38, %v5665_v21  ;;  %v5726_v53 = vmin.f32 %v2783_v63, 16.0  ;;  %v2570_v60 = vadd.f32 %v5663_v20, %v2569_v23  ;;  %vm5741_vm8 = vmor %vm2571_vm0, %vm2572_vm4 }
 0x1fa   : > { %vm2612_vm6 = vweird.f32 %v5669_v32  ;;  %v5730_v57 = vadd.f32 1.1283791, %v2673_v17  ;;  %v2719_v61 = vadd.f32 0.014752088, %v2718_v58  ;;  %v2649_v52 = vmul.f32 %v5691_v62, %v2648_v29 }
 0x1fb   : > { %vm5733_vm7 = vcmp.eq.f32.partialorder %v2655_v55, 8.507059e+37  ;;  %v2710_v10 = vadd.f32 0.05243302, %v2709_v9  ;;  %v2747_v19 = vmul.f32 %v2746_v35, %v5667_v27  ;;  %v2785_v43 = vmul.f32 2.1237322e-06, %v5726_v53  ;;  %vm5754_vm10 = vmor %vm2611_vm1, %vm2612_vm6 }
 0x1fc   : > { %v2658_v17 = vor.u32 1.1754944e-38, %v2657_v41  ;;  %v2695_v23 = vand.u32 2147483647, %v5665_v21  ;;  %v2720_v29 = vmul.f32 %v2719_v61, %v5640_v0  ;;  %v2758_v55 = vmul.f32 %v2757_v40, %v5667_v27 }
 0x1fd   : > { %v2610_v58 = vadd.f32 %v5669_v32, %v2609_v39  ;;  %vm2652_vm9 = vweird.f32 %v5691_v62  ;;  %v2688_v9 = vsub.f32 1.0, %v2687_v49  ;;  %v2748_v35 = vadd.f32 0.0036580483, %v2747_v19 }
 0x1fe   : > { %vm2691_vm11 = vweird.f32 %v5665_v21  ;;  %v2697_v41 = vand.u32 2147483648, %v5665_v21  ;;  %v2721_v61 = vadd.f32 0.112945676, %v2720_v29  ;;  %v2759_v40 = vadd.f32 0.014752088, %v2758_v55  ;;  %vm5767_vm12 = vmor %vm2651_vm3, %vm2652_vm9 }
 0x1ff   : > { %v2574_v39 = vsel %vm5741_vm8, %v5663_v20, %v2570_v60  ;;  %v2650_v49 = vadd.f32 %v5691_v62, %v2649_v52  ;;  %v2711_v19 = vmul.f32 %v2710_v10, %v5640_v0  ;;  %v2786_v16 = vadd.f32 0.00028619796, %v2785_v43 }
 0x200   : > { %v2722_v56 = vmul.f32 %v2721_v61, %v5640_v0  ;;  %v2749_v29 = vmul.f32 %v2748_v35, %v5667_v27  ;;  %v2760_v55 = vmul.f32 %v2759_v40, %v5667_v27  ;;  %v2796_v63 = vmul.f32 3.8918573e-05, %v5726_v53 }
 0x201   : > { %v2614_v20 = vsel %vm5754_vm10, %v5669_v32, %v2610_v58  ;;  %v2689_v43 = vmul.f32 %v5707_v38, %v2688_v9  ;;  %vm2692_vm13 = vweird.f32 %v5707_v38  ;;  %vm5780_vm14 = vcmp.eq.f32.partialorder %v2695_v23, 8.507059e+37 }
 0x202   : > { %v2579_v60 = vsel %vm5709_vm2, %v5693_v8, %v2574_v39  ;;  %v2723_v52 = vadd.f32 0.4994258, %v2722_v56  ;;  %v2761_v10 = vadd.f32 0.112945676, %v2760_v55  ;;  %v2787_v35 = vmul.f32 %v2786_v16, %v5726_v53  ;;  %vm5808_vm15 = vmor %vm2691_vm11, %vm2692_vm13 }
 0x203   : > { %v2654_v32 = vsel %vm5767_vm12, %v5691_v62, %v2650_v49  ;;  %v2712_v58 = vadd.f32 0.18741608, %v2711_v19  ;;  %v2797_v9 = vadd.f32 0.001143296, %v2796_v63  ;;  %v2823_v23 = vmul.f32 %v5637_v30, %v5637_v30 }
 0x204   : > { %v2619_v37 = vsel %vm5720_vm5, %v5702_v33, %v2614_v20  ;;  %v2724_v26 = vmul.f32 %v2723_v52, %v5640_v0  ;;  %v2750_v8 = vadd.f32 0.05243302, %v2749_v29  ;;  %v2762_v56 = vmul.f32 %v2761_v10, %v5667_v27 }
 0x205   : > { %v2690_v16 = vadd.f32 %v5707_v38, %v2689_v43  ;;  %v2788_v61 = vadd.f32 0.0036580483, %v2787_v35  ;;  %v2798_v40 = vmul.f32 %v2797_v9, %v5726_v53  ;;  %v5800_v62 = vmin.f32 %v2823_v23, 16.0 }
 0x206   : > { %v2659_v39 = vsel %vm5733_vm7, %v2658_v17, %v2654_v32  ;;  %v2698_v42 = vor.u32 1.1754944e-38, %v2697_v41  ;;  %v5812_v49 = vadd.f32 1.0, %v2724_v26  ;;  %v2763_v19 = vadd.f32 0.4994258, %v2762_v56 }
 0x207   : > { %v2713_v45 = vmul.f32 %v2712_v58, %v5640_v0  ;;  %v2799_v29 = vadd.f32 0.014752088, %v2798_v40  ;;  %v2825_v55 = vmul.f32 2.1237322e-06, %v5800_v62  ;;  %v2836_v2 = vmul.f32 3.8918573e-05, %v5800_v62 }
 0x208   : > { %v5818_v17 = vmul.f32 %v2579_v60, %v5677_v36  ;;  %v5821_v21 = vmul.f32 %v2619_v37, %v5686_v47  ;;  %4706 = vrcp.f32 %v5812_v49  ;;  %v2751_v41 = vmul.f32 %v2750_v8, %v5667_v27 }
 0x209   : > { %v2694_v63 = vsel %vm5808_vm15, %v5707_v38, %v2690_v16  ;;  %v2764_v0 = vmul.f32 %v2763_v19, %v5667_v27  ;;  %v2789_v20 = vmul.f32 %v2788_v61, %v5726_v53  ;;  %v2800_v43 = vmul.f32 %v2799_v29, %v5726_v53 }
 0x20a   : > { %v5832_v36 = vmul.f32 %v2659_v39, %v5705_v34  ;;  %v2826_v60 = vadd.f32 0.00028619796, %v2825_v55  ;;  %v2837_v47 = vadd.f32 0.001143296, %v2836_v2  ;;  %v2863_v52 = vmul.f32 %v5645_v1, %v5645_v1 }
 0x20b   : > { %v2675_v10 = vmul.f32 %v5730_v57, %v5536_v59  ;;  %v2714_v35 = vadd.f32 1.1283791, %v2713_v45  ;;  %v5838_v32 = vadd.f32 1.0, %v2764_v0  ;;  %v2801_v38 = vadd.f32 0.112945676, %v2800_v43 }
 0x20c   : > { %v2699_v58 = vsel %vm5780_vm14, %v2698_v42, %v2694_v63  ;;  %v2752_v9 = vadd.f32 0.18741608, %v2751_v41  ;;  %v2827_v23 = vmul.f32 %v2826_v60, %v5800_v62  ;;  %v2838_v34 = vmul.f32 %v2837_v47, %v5800_v62 }
 0x20d   : > { %v4351_v37 = vclamps-f32 %v5818_v17, 1.0  ;;  %v4352_v26 = vclamps-f32 %v5821_v21, 1.0  ;;  %4708 = vrcp.f32 %v5838_v32  ;;  %v2790_v8 = vadd.f32 0.05243302, %v2789_v20 }
 0x20e   : > { %v5847_v59 = vpop.eup %4706  ;;  %v4353_v57 = vclamps-f32 %v5832_v36, 1.0  ;;  %v2802_v56 = vmul.f32 %v2801_v38, %v5726_v53  ;;  %v2839_v7 = vadd.f32 0.014752088, %v2838_v34  ;;  %v5851_v16 = vmin.f32 %v2863_v52, 16.0 }
 0x20f   : > { %v5853_v61 = vmul.f32 %v2699_v58, %v2675_v10  ;;  %v5856_v40 = vmul.f32 %v2714_v35, %v5596_v14  ;;  %v2727_v39 = vmul.f32 %v5847_v59, %v5812_v49  ;;  %v2828_v33 = vadd.f32 0.0036580483, %v2827_v23 }
 0x210   : > { %v2753_v42 = vmul.f32 %v2752_v9, %v5667_v27  ;;  %v2803_v19 = vadd.f32 0.4994258, %v2802_v56  ;;  %v2840_v45 = vmul.f32 %v2839_v7, %v5800_v62  ;;  %v2903_v29 = vmul.f32 %v5652_v12, %v5652_v12 }
 0x211   : > { %v2728_v55 = vsub.f32 1.0, %v2727_v39  ;;  %vm2731_vm0 = vweird.f32 %v5812_v49  ;;  %v2791_v2 = vmul.f32 %v2790_v8, %v5726_v53  ;;  %v2865_v14 = vmul.f32 2.1237322e-06, %v5851_v16 }
 0x212   : > { %v2735_v41 = vand.u32 2147483647, %v5812_v49  ;;  %v2804_v63 = vmul.f32 %v2803_v19, %v5726_v53  ;;  %v2841_v0 = vadd.f32 0.112945676, %v2840_v45  ;;  %v2876_v27 = vmul.f32 3.8918573e-05, %v5851_v16 }
 0x213   : > { %v5870_v20 = vpop.eup %4708  ;;  %v2729_v43 = vmul.f32 %v5847_v59, %v2728_v55  ;;  %vm2732_vm1 = vweird.f32 %v5847_v59  ;;  %v2829_v60 = vmul.f32 %v2828_v33, %v5800_v62  ;;  %v2866_v47 = vadd.f32 0.00028619796, %v2865_v14 }
 0x214   : > { %v2737_v52 = vand.u32 2147483648, %v5812_v49  ;;  %v2767_v10 = vmul.f32 %v5870_v20, %v5838_v32  ;;  %v5878_v35 = vadd.f32 1.0, %v2804_v63  ;;  %v5880_v38 = vmin.f32 %v2903_v29, 16.0  ;;  %vm5887_vm2 = vmor %vm2731_vm0, %vm2732_vm1 }
 0x215   : > { %v2730_v58 = vadd.f32 %v5847_v59, %v2729_v43  ;;  %v2792_v9 = vadd.f32 0.18741608, %v2791_v2  ;;  %v2842_v23 = vmul.f32 %v2841_v0, %v5800_v62  ;;  %v2867_v34 = vmul.f32 %v2866_v47, %v5851_v16 }
 0x216   : > { %v2775_v56 = vand.u32 2147483647, %v5838_v32  ;;  %4710 = vrcp.f32 %v5878_v35  ;;  %v2877_v7 = vadd.f32 0.001143296, %v2876_v27  ;;  %v2905_v39 = vmul.f32 2.1237322e-06, %v5880_v38 }
 0x217   : > { %v2768_v33 = vsub.f32 1.0, %v2767_v10  ;;  %v2777_v19 = vand.u32 2147483648, %v5838_v32  ;;  %v2830_v45 = vadd.f32 0.05243302, %v2829_v60  ;;  %v2843_v29 = vadd.f32 0.4994258, %v2842_v23 }
 0x218   : > { %v4354_v55 = vclamps-f32 %v5853_v61, 1.0  ;;  %v2738_v2 = vor.u32 1.1754944e-38, %v2737_v52  ;;  %v2754_v49 = vadd.f32 1.1283791, %v2753_v42  ;;  %v2868_v14 = vadd.f32 0.0036580483, %v2867_v34 }
 0x219   : > { %v2734_v63 = vsel %vm5887_vm2, %v5847_v59, %v2730_v58  ;;  %vm2736_vm3 = vcmp.eq.f32.partialorder %v2735_v41, 8.507059e+37  ;;  %v2793_v0 = vmul.f32 %v2792_v9, %v5726_v53  ;;  %v2844_v27 = vmul.f32 %v2843_v29, %v5800_v62 }
 0x21a   : > { %vm2771_vm4 = vweird.f32 %v5838_v32  ;;  %v2869_v43 = vmul.f32 %v2868_v14, %v5851_v16  ;;  %v2878_v60 = vmul.f32 %v2877_v7, %v5851_v16  ;;  %v2906_v47 = vadd.f32 0.00028619796, %v2905_v39 }
 0x21b   : > { %v2769_v52 = vmul.f32 %v5870_v20, %v2768_v33  ;;  %vm5905_vm5 = vcmp.eq.f32.partialorder %v2775_v56, 8.507059e+37  ;;  %v2778_v10 = vor.u32 1.1754944e-38, %v2777_v19  ;;  %v2831_v59 = vmul.f32 %v2830_v45, %v5800_v62 }
 0x21c   : > { %v5910_v41 = vadd.f32 1.0, %v2844_v27  ;;  %v5912_v53 = vpop.eup %4710  ;;  %v2739_v58 = vsel %vm2736_vm3, %v2738_v2, %v2734_v63  ;;  %v2879_v9 = vadd.f32 0.014752088, %v2878_v60  ;;  %v2907_v23 = vmul.f32 %v2906_v47, %v5880_v38 }
 0x21d   : > { %v2916_v34 = vmul.f32 3.8918573e-05, %v5880_v38  ;;  %vm2772_vm6 = vweird.f32 %v5870_v20  ;;  %v2794_v8 = vadd.f32 1.1283791, %v2793_v0  ;;  %v2807_v56 = vmul.f32 %v5912_v53, %v5878_v35 }
 0x21e   : > { %v2870_v7 = vadd.f32 0.05243302, %v2869_v43  ;;  %v2815_v39 = vand.u32 2147483647, %v5878_v35  ;;  %v2817_v33 = vand.u32 2147483648, %v5878_v35  ;;  %4712 = vrcp.f32 %v5910_v41  ;;  %vm5932_vm7 = vmor %vm2771_vm4, %vm2772_vm6 }
 0x21f   : > { %v2943_v19 = vmul.f32 %v5656_v11, %v5656_v11  ;;  %v5925_v45 = vmul.f32 %v2739_v58, %v5856_v40  ;;  %v2770_v29 = vadd.f32 %v5870_v20, %v2769_v52  ;;  %v2808_v2 = vsub.f32 1.0, %v2807_v56 }
 0x220   : > { %v2880_v14 = vmul.f32 %v2879_v9, %v5851_v16  ;;  %v2755_v63 = vmul.f32 %v2754_v49, %v5612_v28  ;;  %v2832_v27 = vadd.f32 0.18741608, %v2831_v59  ;;  %v2908_v43 = vadd.f32 0.0036580483, %v2907_v23 }
 0x221   : > { %v2917_v60 = vadd.f32 0.001143296, %v2916_v34  ;;  %v5937_v47 = vmul.f32 %v2794_v8, %v5633_v48  ;;  %vm2811_vm8 = vweird.f32 %v5878_v35  ;;  %v2871_v40 = vmul.f32 %v2870_v7, %v5851_v16 }
 0x222   : > { %v2881_v52 = vadd.f32 0.112945676, %v2880_v14  ;;  %v2818_v58 = vor.u32 1.1754944e-38, %v2817_v33  ;;  %v2909_v28 = vmul.f32 %v2908_v43, %v5880_v38  ;;  %v5943_v49 = vmin.f32 %v2943_v19, 16.0 }
 0x223   : > { %v2918_v32 = vmul.f32 %v2917_v60, %v5880_v38  ;;  %v4355_v9 = vclamps-f32 %v5925_v45, 1.0  ;;  %v2774_v59 = vsel %vm5932_vm7, %v5870_v20, %v2770_v29  ;;  %v2809_v48 = vmul.f32 %v5912_v53, %v2808_v2 }
 0x224   : > { %vm5950_vm9 = vcmp.eq.f32.partialorder %v2815_v39, 8.507059e+37  ;;  %v2882_v34 = vmul.f32 %v2881_v52, %v5851_v16  ;;  %v5955_v8 = vpop.eup %4712  ;;  %v2833_v56 = vmul.f32 %v2832_v27, %v5800_v62  ;;  %v2910_v7 = vadd.f32 0.05243302, %v2909_v28 }
 0x225   : > { %v2919_v33 = vadd.f32 0.014752088, %v2918_v32  ;;  %v2945_v19 = vmul.f32 2.1237322e-06, %v5943_v49  ;;  %vm2812_vm10 = vweird.f32 %v5912_v53  ;;  %v2847_v20 = vmul.f32 %v5955_v8, %v5910_v41 }
 0x226   : > { %v2872_v29 = vadd.f32 0.18741608, %v2871_v40  ;;  %v2983_v39 = vmul.f32 %v5659_v15, %v5659_v15  ;;  %v2779_v2 = vsel %vm5905_vm5, %v2778_v10, %v2774_v59  ;;  %vm2851_vm11 = vweird.f32 %v5910_v41  ;;  %vm5972_vm12 = vmor %vm2811_vm8, %vm2812_vm10 }
 0x227   : > { %v2883_v14 = vadd.f32 0.4994258, %v2882_v34  ;;  %v2920_v62 = vmul.f32 %v2919_v33, %v5880_v38  ;;  %v2810_v0 = vadd.f32 %v5912_v53, %v2809_v48  ;;  %v2848_v27 = vsub.f32 1.0, %v2847_v20 }
 0x228   : > { %v2911_v43 = vmul.f32 %v2910_v7, %v5880_v38  ;;  %v2946_v60 = vadd.f32 0.00028619796, %v2945_v19  ;;  %v2855_v42 = vand.u32 2147483647, %v5910_v41  ;;  %v2956_v28 = vmul.f32 3.8918573e-05, %v5943_v49 }
 0x229   : > { %v2884_v10 = vmul.f32 %v2883_v14, %v5851_v16  ;;  %v2921_v52 = vadd.f32 0.112945676, %v2920_v62  ;;  %v2849_v32 = vmul.f32 %v5955_v8, %v2848_v27  ;;  %v2873_v59 = vmul.f32 %v2872_v29, %v5851_v16 }
 0x22a   : > { %v2947_v48 = vmul.f32 %v2946_v60, %v5943_v49  ;;  %v5982_v34 = vmin.f32 %v2983_v39, 16.0  ;;  %vm2852_vm13 = vweird.f32 %v5955_v8  ;;  %v2957_v33 = vadd.f32 0.001143296, %v2956_v28 }
 0x22b   : > { %v2885_v35 = vadd.f32 1.0, %v2884_v10  ;;  %v2922_v7 = vmul.f32 %v2921_v52, %v5880_v38  ;;  %v2814_v19 = vsel %vm5972_vm12, %v5912_v53, %v2810_v0  ;;  %v2857_v20 = vand.u32 2147483648, %v5910_v41  ;;  %vm5997_vm14 = vmor %vm2851_vm11, %vm2852_vm13 }
 0x22c   : > { %v2912_v14 = vadd.f32 0.18741608, %v2911_v43  ;;  %v2948_v62 = vadd.f32 0.0036580483, %v2947_v48  ;;  %v2850_v16 = vadd.f32 %v5955_v8, %v2849_v32  ;;  %v2985_v29 = vmul.f32 2.1237322e-06, %v5982_v34 }
 0x22d   : > { %4714 = vrcp.f32 %v2885_v35  ;;  %v2996_v39 = vmul.f32 3.8918573e-05, %v5982_v34  ;;  %v5993_v27 = vmul.f32 %v2779_v2, %v2755_v63  ;;  %v2834_v60 = vadd.f32 1.1283791, %v2833_v56 }
 0x22e   : > { %v2923_v53 = vadd.f32 0.4994258, %v2922_v7  ;;  %v2949_v0 = vmul.f32 %v2948_v62, %v5943_v49  ;;  %v2819_v43 = vsel %vm5950_vm9, %v2818_v58, %v2814_v19  ;;  %vm6004_vm15 = vcmp.eq.f32.partialorder %v2855_v42, 8.507059e+37 }
 0x22f   : > { %v2874_v52 = vadd.f32 1.1283791, %v2873_v59  ;;  %v2958_v63 = vmul.f32 %v2957_v33, %v5943_v49  ;;  %v2858_v56 = vor.u32 1.1754944e-38, %v2857_v20  ;;  %v2913_v41 = vmul.f32 %v2912_v14, %v5880_v38 }
 0x230   : > { %v2924_v2 = vmul.f32 %v2923_v53, %v5880_v38  ;;  %v2950_v28 = vadd.f32 0.05243302, %v2949_v0  ;;  %v2854_v32 = vsel %vm5997_vm14, %v5955_v8, %v2850_v16  ;;  %v2986_v23 = vadd.f32 0.00028619796, %v2985_v29 }
 0x231   : > { %v2959_v48 = vadd.f32 0.014752088, %v2958_v63  ;;  %v2997_v58 = vadd.f32 0.001143296, %v2996_v39  ;;  %v4356_v42 = vclamps-f32 %v5993_v27, 1.0  ;;  %v6016_v7 = vmul.f32 %v2819_v43, %v5937_v47 }
 0x232   : > { %v2835_v59 = vmul.f32 %v2834_v60, %v5637_v30  ;;  %v2925_v33 = vadd.f32 1.0, %v2924_v2  ;;  %v2875_v20 = vmul.f32 %v2874_v52, %v5645_v1  ;;  %v2987_v14 = vmul.f32 %v2986_v23, %v5982_v34 }
 0x233   : > { %v4715_v19 = vpop.eup %4714  ;;  %v2960_v38 = vmul.f32 %v2959_v48, %v5943_v49  ;;  %v2998_v8 = vmul.f32 %v2997_v58, %v5982_v34  ;;  %v2859_v62 = vsel %vm6004_vm15, %v2858_v56, %v2854_v32  ;;  %vm2891_vm0 = vweird.f32 %v2885_v35 }
 0x234   : > { %v2887_v16 = vmul.f32 %v4715_v19, %v2885_v35  ;;  %4716 = vrcp.f32 %v2925_v33  ;;  %v2895_v47 = vand.u32 2147483647, %v2885_v35  ;;  %v2897_v29 = vand.u32 2147483648, %v2885_v35 }
 0x235   : > { %v2914_v39 = vadd.f32 1.1283791, %v2913_v41  ;;  %v2951_v30 = vmul.f32 %v2950_v28, %v5943_v49  ;;  %vm2892_vm1 = vweird.f32 %v4715_v19  ;;  %v2961_v1 = vadd.f32 0.112945676, %v2960_v38 }
 0x236   : > { %v2888_v60 = vsub.f32 1.0, %v2887_v16  ;;  %v2988_v10 = vadd.f32 0.0036580483, %v2987_v14  ;;  %v4357_v53 = vclamps-f32 %v6016_v7, 1.0  ;;  %v2860_v0 = vmul.f32 %v2859_v62, %v2835_v59  ;;  %vm6030_vm2 = vmor %vm2891_vm0, %vm2892_vm1 }
 0x237   : > { %v2935_v43 = vand.u32 2147483647, %v2925_v33  ;;  %v2999_v52 = vadd.f32 0.014752088, %v2998_v8  ;;  %v2937_v40 = vand.u32 2147483648, %v2925_v33  ;;  %v2962_v56 = vmul.f32 %v2961_v1, %v5943_v49 }
 0x238   : > { %v2889_v63 = vmul.f32 %v4715_v19, %v2888_v60  ;;  %v2989_v2 = vmul.f32 %v2988_v10, %v5982_v34  ;;  %vm6034_vm3 = vcmp.eq.f32.partialorder %v2895_v47, 8.507059e+37  ;;  %v2898_v32 = vor.u32 1.1754944e-38, %v2897_v29 }
 0x239   : > { %v2915_v48 = vmul.f32 %v2914_v39, %v5652_v12  ;;  %v3000_v23 = vmul.f32 %v2999_v52, %v5982_v34  ;;  %v2952_v59 = vadd.f32 0.18741608, %v2951_v30  ;;  %v2963_v38 = vadd.f32 0.4994258, %v2962_v56 }
 0x23a   : > { %v4717_v58 = vpop.eup %4716  ;;  %v2890_v7 = vadd.f32 %v4715_v19, %v2889_v63  ;;  %v2990_v14 = vadd.f32 0.05243302, %v2989_v2  ;;  %v4358_v8 = vclamps-f32 %v2860_v0, 1.0  ;;  %vm2931_vm4 = vweird.f32 %v2925_v33 }
 0x23b   : > { %v2927_v35 = vmul.f32 %v4717_v58, %v2925_v33  ;;  %v3001_v62 = vadd.f32 0.112945676, %v3000_v23  ;;  %vm6042_vm5 = vcmp.eq.f32.partialorder %v2935_v43, 8.507059e+37  ;;  %v2938_v29 = vor.u32 1.1754944e-38, %v2937_v40 }
 0x23c   : > { %v2894_v16 = vsel %vm6030_vm2, %v4715_v19, %v2890_v7  ;;  %v2964_v12 = vmul.f32 %v2963_v38, %v5943_v49  ;;  %vm2932_vm6 = vweird.f32 %v4717_v58  ;;  %v2953_v10 = vmul.f32 %v2952_v59, %v5943_v49 }
 0x23d   : > { %v2899_v39 = vsel %vm6034_vm3, %v2898_v32, %v2894_v16  ;;  %v2928_v30 = vsub.f32 1.0, %v2927_v35  ;;  %v3002_v60 = vmul.f32 %v3001_v62, %v5982_v34  ;;  %v2991_v19 = vmul.f32 %v2990_v14, %v5982_v34  ;;  %vm6057_vm7 = vmor %vm2931_vm4, %vm2932_vm6 }
 0x23e   : > { %v2900_v1 = vmul.f32 %v2899_v39, %v2875_v20  ;;  %v2965_v0 = vadd.f32 1.0, %v2964_v12  ;;  %v3023_v63 = vadd.f32 1.0, %v4351_v37  ;;  %v3024_v40 = vadd.f32 1.0, %v4352_v26 }
 0x23f   : > { %v2929_v43 = vmul.f32 %v4717_v58, %v2928_v30  ;;  %v3003_v52 = vadd.f32 0.4994258, %v3002_v60  ;;  %v3025_v49 = vadd.f32 1.0, %v4353_v57  ;;  %v3026_v20 = vadd.f32 1.0, %v4354_v55 }
 0x240   : > { %v4359_v56 = vclamps-f32 %v2900_v1, 1.0  ;;  %4718 = vrcp.f32 %v2965_v0  ;;  %v3027_v21 = vadd.f32 1.0, %v4355_v9  ;;  %v3028_v37 = vadd.f32 1.0, %v4356_v42 }
 0x241   : > { %v2930_v41 = vadd.f32 %v4717_v58, %v2929_v43  ;;  %v3004_v17 = vmul.f32 %v3003_v52, %v5982_v34  ;;  %v2954_v26 = vadd.f32 1.1283791, %v2953_v10  ;;  %v2992_v33 = vadd.f32 0.18741608, %v2991_v19 }
 0x242   : > { %v3029_v28 = vadd.f32 1.0, %v4357_v53  ;;  %v3030_v32 = vadd.f32 1.0, %v4358_v8  ;;  %v3031_v23 = vadd.f32 1.0, %v4359_v56  ;;  %v3035_v61 = vmul.f32 %v3023_v63, %v5551_v3 }
 0x243   : > { %v2934_v36 = vsel %vm6057_vm7, %v4717_v58, %v2930_v41  ;;  %v3005_v57 = vadd.f32 1.0, %v3004_v17  ;;  %v3036_v45 = vmul.f32 %v3024_v40, %v5558_v6  ;;  %v3037_v9 = vmul.f32 %v3025_v49, %v5583_v4 }
 0x244   : > { %v2939_v55 = vsel %vm6042_vm5, %v2938_v29, %v2934_v36  ;;  %v3038_v27 = vmul.f32 %v3026_v20, %v5586_v5  ;;  %v3039_v53 = vmul.f32 %v3027_v21, %v5593_v13  ;;  %v3040_v7 = vmul.f32 %v3028_v37, %v5602_v54 }
 0x245   : > { %v2940_v42 = vmul.f32 %v2939_v55, %v2915_v48  ;;  %4720 = vrcp.f32 %v3005_v57  ;;  %vm2971_vm8 = vweird.f32 %v2965_v0  ;;  %v2975_v59 = vand.u32 2147483647, %v2965_v0 }
 0x246   : > { %v4719_v58 = vpop.eup %4718  ;;  %v3041_v3 = vmul.f32 %v3029_v28, %v5605_v25  ;;  %v3042_v38 = vmul.f32 %v3030_v32, %v5622_v44  ;;  %v2977_v6 = vand.u32 2147483648, %v2965_v0  ;;  %v2993_v4 = vmul.f32 %v2992_v33, %v5982_v34 }
 0x247   : > { %v4360_v14 = vclamps-f32 %v2940_v42, 1.0  ;;  %v2967_v8 = vmul.f32 %v4719_v58, %v2965_v0  ;;  %vm2972_vm9 = vweird.f32 %v4719_v58  ;;  %v3043_v5 = vmul.f32 %v3031_v23, %v5625_v46 }
 0x248   : > { %v3047_v48 = vpack.c.bf16 %v3036_v45, %v3035_v61  ;;  %v3048_v35 = vpack.c.bf16 %v3038_v27, %v3037_v9  ;;  %v3049_v54 = vpack.c.bf16 %v3040_v7, %v3039_v53  ;;  %v3050_v16 = vpack.c.bf16 %v3042_v38, %v3041_v3  ;;  %vm6087_vm10 = vmor %vm2971_vm8, %vm2972_vm9 }
 0x249   : > { %v2968_v13 = vsub.f32 1.0, %v2967_v8  ;;  %v3032_v62 = vadd.f32 1.0, %v4360_v14  ;;  %v2955_v44 = vmul.f32 %v2954_v26, %v5656_v11  ;;  %vm2976_vm11 = vcmp.eq.f32.partialorder %v2975_v59, 8.507059e+37 }
 0x24a   : > { %3053 = vst [vmem:[#allocation2] sm:$0xff] %v3047_v48  ;;  %v2978_v46 = vor.u32 1.1754944e-38, %v2977_v6  ;;  %v2994_v30 = vadd.f32 1.1283791, %v2993_v4  ;;  %v3017_v60 = vand.u32 2147483648, %v3005_v57  ;;  %vm3011_vm12 = vweird.f32 %v3005_v57 }
 0x24b   : > { %v4721_v47 = vpop.eup %4720  ;;  %v2969_v29 = vmul.f32 %v4719_v58, %v2968_v13  ;;  %v3044_v25 = vmul.f32 %v3032_v62, %v5630_v31  ;;  %3054 = vst [vmem:[#allocation2 + $0x8] sm:$0xff] %v3048_v35  ;;  %v3015_v31 = vand.u32 2147483647, %v3005_v57  ;;  %v2529_v20 = vmul.f32 0.5, %v5518_v22 }
 0x24c   : > { %v3007_v12 = vmul.f32 %v4721_v47, %v3005_v57  ;;  %3055 = vst [vmem:[#allocation2 + $0x10] sm:$0xff] %v3049_v54  ;;  %vm3012_vm13 = vweird.f32 %v4721_v47  ;;  %v3018_v52 = vor.u32 1.1754944e-38, %v3017_v60  ;;  %v2995_v63 = vmul.f32 %v2994_v30, %v5659_v15 }
 0x24d   : > { %v2970_v39 = vadd.f32 %v4719_v58, %v2969_v29  ;;  %v3051_v1 = vpack.c.bf16 %v3044_v25, %v3043_v5  ;;  %3056 = vst [vmem:[#allocation2 + $0x18] sm:$0xff] %v3050_v16  ;;  %vm3013_vm14 = vmor %vm3011_vm12, %vm3012_vm13  ;;  %vm3016_vm15 = vcmp.eq.f32.partialorder %v3015_v31, 8.507059e+37  ;;  %v2530_v21 = vmul.f32 0.5, %v5523_v51 }
 0x24e   : > { %v3008_v10 = vsub.f32 1.0, %v3007_v12 }
 0x24f   : > { %v2974_v11 = vsel %vm6087_vm10, %v4719_v58, %v2970_v39  ;;  %3057 = vst [vmem:[#allocation2 + $0x20] sm:$0xff] %v3051_v1 }
 0x250   : > { %v2979_v0 = vsel %vm2976_vm11, %v2978_v46, %v2974_v11  ;;  %v3009_v19 = vmul.f32 %v4721_v47, %v3008_v10 }
 0x251   : > { %v2980_v43 = vmul.f32 %v2979_v0, %v2955_v44 }
 0x252   : > { %v3010_v40 = vadd.f32 %v4721_v47, %v3009_v19 }
 0x253   : > { %v4361_v56 = vclamps-f32 %v2980_v43, 1.0 }
 0x254   : > { %v3014_v2 = vsel %vm3013_vm14, %v4721_v47, %v3010_v40 }
 0x255   : > { %v3019_v49 = vsel %vm3016_vm15, %v3018_v52, %v3014_v2  ;;  %v3033_v17 = vadd.f32 1.0, %v4361_v56 }
 0x256   : > { %v3020_v41 = vmul.f32 %v3019_v49, %v2995_v63 }
 0x257   : > { %v3045_v33 = vmul.f32 %v3033_v17, %v2529_v20 }
 0x258   : > { %v4362_v37 = vclamps-f32 %v3020_v41, 1.0 }
 0x25a   : > { %v3034_v26 = vadd.f32 1.0, %v4362_v37 }
 0x25c   : > { %v3046_v28 = vmul.f32 %v3034_v26, %v2530_v21 }
 0x25e   : > { %v3052_v32 = vpack.c.bf16 %v3046_v28, %v3045_v33 }
 0x260   : > { %3058 = vst [vmem:[#allocation2 + $0x28] sm:$0xff] %v3052_v32 }
 0x261 PF: > { %p4363_p7 = scmp.ne.s32.totalorder %s4768_s12, 6 }
 0x263   : > { %3062 = sbr.rel (%p4363_p7) target bundleno = 628 (0x274), region = 44 }
 0x268   : > { %3063 = vst [vmem:[#allocation3] sm:$0xff] %v5317_v18  ;;  %v6181_v15 = vld [vmem:[#allocation9_spill] sm:$0xff]  ;;  %v6182_v36 = vld [vmem:[#allocation11_spill] sm:$0xff]  ;;  %v6183_v57 = vld [vmem:[#allocation12_spill] sm:$0xff] }
 0x269   : > { %3064 = vst [vmem:[#allocation3 + $0x8] sm:$0xff] %v5410_v50  ;;  %v6184_v23 = vld [vmem:[#allocation6_spill] sm:$0xff]  ;;  %v6185_v61 = vld [vmem:[#allocation7_spill] sm:$0xff]  ;;  %v6186_v55 = vld [vmem:[#allocation8_spill] sm:$0xff] }
 0x26a   : > { %3065 = vst [vmem:[#allocation3 + $0x10] sm:$0xff] %v5503_v24  ;;  %v6187_v45 = vld [vmem:[#allocation10_spill] sm:$0xff] }
 0x26b   : > { %3066 = vst [vmem:[#allocation3 + $0x18] sm:$0xff] %v6181_v15 }
 0x26c   : > { %3067 = vst [vmem:[#allocation3 + $0x20] sm:$0xff] %v6182_v36 }
 0x26d   : > { %3068 = vst [vmem:[#allocation3 + $0x28] sm:$0xff] %v6183_v57 }
 0x26e   : > { %3069 = vst [vmem:[#allocation3 + $0x30] sm:$0xff] %v6184_v23 }
 0x26f   : > { %3070 = vst [vmem:[#allocation3 + $0x38] sm:$0xff] %v6185_v61 }
 0x270   : > { %3071 = vst [vmem:[#allocation3 + $0x40] sm:$0xff] %v6186_v55 }
 0x271   : > { %3072 = vst [vmem:[#allocation3 + $0x48] sm:$0xff] %v6187_v45 }
 0x272   : > { %3073 = vst [vmem:[#allocation3 + $0x50] sm:$0xff] %v5518_v22 }
 0x273   : > { %3074 = vst [vmem:[#allocation3 + $0x58] sm:$0xff] %v5523_v51 }
 0x274 PF: > { %p4668_p8 = scmp.eq.s32.totalorder %s3167_s15, 6  ;;  %s3086_s17 = sshll.u32 %s6126_s3, 4  ;;  %s3087_s17 = int_to_ptr.hbm [resolvable:$true] %s3086_s17 }
 0x275   : > { %s4778_s18 = smov [#allocation3]   ;;  %s4779_s20 = smov 768  }
 0x276   : > { %s3084_s19 = sshll.u32 %s4778_s18, 4  ;;  %s4780_s21 = smov 48   ;;  %s3085_s19 = int_to_ptr.vmem [resolvable:$true] %s3084_s19 }
 0x277   : > { %4665 = dma.vmem_to_hbm [thread:$0]  (%p4668_p8), %s3085_s19, 1536, %s3087_s17, [#allocation4], %s4779_s20, %s4779_s20, %s4780_s21  }
 0x278   : > { %4763 = dma.done.wait (%p4668_p8), [#allocation4], 1536  }
 0x279   : > { %4765 = vsyncadd (%p4668_p8), [#allocation4], 4294965760 }
 0x27a PF: > { %s14_s14 = sadd.s32 1, %s4776_s14   ;;  %s6188_s12 = smov %s4772_s13 }
 0x27b   : > { %p11_p9 = scmp.ge.s32.totalorder %s14_s14, 9   ;;  %s6189_s13 = smov %s6191_s16 }
 0x27d   :  { %13 = sbr.rel (!%p11_p9) target bundleno = 2 (0x2), region = 78 }
 0x282   :  { %3103 = vsyncpa [#allocation4], 1 }
 0x283   :  { %3105 = vsyncpa [#allocation4 + $0x1], 1 }

</bundles_post_ra>
